<compile_context>
chip_gen: v7x
topology: tpu7x:2x2x1
jax: 0.10.0
libtpu: 0.0.40
codegen_flags: <defaults>
</compile_context>

<pallas_src>
import functools
import math

import jax
import jax.numpy as jnp
from jax import lax
from jax.experimental import pallas as pl
from jax.experimental.pallas import tpu as pltpu


_LANE = 128                         # lane tile (last dim)
_SUBLANE = 16                       # batch padding (covers bf16 sublane packing)
_VMEM_TARGET = 24 * 1024 * 1024     # live-VMEM budget per layer (v5e/v6e/v7x safe)


def _round_up(x, m):
    return ((x + m - 1) // m) * m


def _divisors_desc(n):
    divs = set()
    i = 1
    while i * i <= n:
        if n % i == 0:
            divs.add(i)
            divs.add(n // i)
        i += 1
    return sorted(divs, reverse=True)


def _hint_aligned(off):
    if isinstance(off, int):
        return off
    return pl.multiple_of(off, _SUBLANE)


# --------------------------------------------------------------------------
# Kernel: one time-chunk of one bidirectional LSTM layer (both directions).
# --------------------------------------------------------------------------
def _bidi_lstm_layer_kernel(*refs, num_x, chunk, batch_p, hidden_p, num_chunks):
    nx = num_x
    Bp, Hp = batch_p, hidden_p

    x_f = refs[0:nx]                      # input slices, fwd-direction chunk i
    x_b = refs[nx:2 * nx]                 # input slices, bwd-direction chunk nc-1-i
    wih_f = refs[2 * nx:3 * nx]           # (Din_j, 4Hp) per slice, fwd direction
    wih_b = refs[3 * nx:4 * nx]           # (Din_j, 4Hp) per slice, bwd direction
    whh_f, whh_b, bias_f, bias_b = refs[4 * nx:4 * nx + 4]
    out_f, out_b, hn_ref, cn_ref = refs[4 * nx + 4:4 * nx + 8]
    gx_f, gx_b, hf, cf, hb, cb = refs[4 * nx + 8:]

    step_idx = pl.program_id(0)

    @pl.when(step_idx == 0)
    def _init():
        hf[...] = jnp.zeros(hf.shape, hf.dtype)
        hb[...] = jnp.zeros(hb.shape, hb.dtype)
        cf[...] = jnp.zeros(cf.shape, cf.dtype)
        cb[...] = jnp.zeros(cb.shape, cb.dtype)

    # ---- Stage 1 (off the serial path): whole-chunk input projection for
    #      both directions as big MXU matmuls; fused (b_ih+b_hh) bias added once.
    acc_f = jnp.dot(x_f[0][...], wih_f[0][...], preferred_element_type=jnp.float32)
    acc_b = jnp.dot(x_b[0][...], wih_b[0][...], preferred_element_type=jnp.float32)
    for j in range(1, nx):
        acc_f = acc_f + jnp.dot(x_f[j][...], wih_f[j][...],
                                preferred_element_type=jnp.float32)
        acc_b = acc_b + jnp.dot(x_b[j][...], wih_b[j][...],
                                preferred_element_type=jnp.float32)
    gx_f[...] = acc_f + bias_f[...]
    gx_b[...] = acc_b + bias_b[...]

    # ---- Stage 2: the two recurrences; only h @ W_hh is on the serial chain.
    def lstm_step(s):
        rf = _hint_aligned(s * Bp)                    # fwd rows (front-to-back)
        rb = _hint_aligned((chunk - 1 - s) * Bp)      # bwd rows (back-to-front)

        gh_f = jnp.dot(hf[...], whh_f[...], preferred_element_type=jnp.float32)
        gh_b = jnp.dot(hb[...], whh_b[...], preferred_element_type=jnp.float32)
        gates_f = gx_f[pl.ds(rf, Bp), :] + gh_f
        gates_b = gx_b[pl.ds(rb, Bp), :] + gh_b

        # PyTorch gate order i | f | g | o.  Hp % 128 == 0 -> lane-aligned views.
        i_f = jax.nn.sigmoid(gates_f[:, 0 * Hp:1 * Hp])
        f_f = jax.nn.sigmoid(gates_f[:, 1 * Hp:2 * Hp])
        g_f = jnp.tanh(gates_f[:, 2 * Hp:3 * Hp])
        o_f = jax.nn.sigmoid(gates_f[:, 3 * Hp:4 * Hp])
        c_new_f = f_f * cf[...] + i_f * g_f
        h_new_f = o_f * jnp.tanh(c_new_f)

        i_b = jax.nn.sigmoid(gates_b[:, 0 * Hp:1 * Hp])
        f_b = jax.nn.sigmoid(gates_b[:, 1 * Hp:2 * Hp])
        g_b = jnp.tanh(gates_b[:, 2 * Hp:3 * Hp])
        o_b = jax.nn.sigmoid(gates_b[:, 3 * Hp:4 * Hp])
        c_new_b = f_b * cb[...] + i_b * g_b
        h_new_b = o_b * jnp.tanh(c_new_b)

        cf[...] = c_new_f
        cb[...] = c_new_b
        hf[...] = h_new_f.astype(jnp.bfloat16)        # bf16 h feeds MXU directly
        hb[...] = h_new_b.astype(jnp.bfloat16)
        out_f[pl.ds(rf, Bp), :] = h_new_f.astype(out_f.dtype)
        out_b[pl.ds(rb, Bp), :] = h_new_b.astype(out_b.dtype)

    # Unroll-by-2: lets the scheduler interleave fwd/bwd work of adjacent steps.
    def unrolled_body(it, carry):
        base = it * 2
        lstm_step(base)
        lstm_step(base + 1)
        return carry

    if chunk >= 2:
        lax.fori_loop(0, chunk // 2, unrolled_body, 0)
    if chunk % 2:
        lstm_step(chunk - 1)

    @pl.when(step_idx == num_chunks - 1)
    def _finalize():
        hn_ref[0] = hf[...].astype(jnp.float32)
        hn_ref[1] = hb[...].astype(jnp.float32)
        cn_ref[0] = cf[...]
        cn_ref[1] = cb[...]


# --------------------------------------------------------------------------
# Per-layer wrapper: chunk sizing, block specs, scratch, pallas_call.
# --------------------------------------------------------------------------
def _layer_vmem_bytes(chunk, Bp, Hp, in_dims, out_itemsize):
    rows = chunk * Bp
    gcols = 4 * Hp
    x_blk = 2 * 2 * sum(rows * d * 2 for d in in_dims)          # 2 specs/dir, 2 bufs, bf16
    w_res = 2 * (2 * sum(d * gcols for d in in_dims) * 2        # W_ih both dirs (bf16)
                 + 2 * Hp * gcols * 2                           # W_hh both dirs (bf16)
                 + 2 * gcols * 4)                               # biases (f32)
    out_blk = 2 * 2 * rows * Hp * out_itemsize                  # 2 dirs, 2 bufs
    hncn = 2 * 2 * 2 * Bp * Hp * 4
    scratch = 2 * rows * gcols * 4 + Bp * Hp * (2 * 2 + 2 * 4)
    return x_blk + w_res + out_blk + hncn + scratch


def _pick_chunk(T, Bp, Hp, in_dims, out_itemsize):
    for c in _divisors_desc(T):
        if T // c < 2 and T > 1:
            continue  # keep >= 2 chunks so the x/out DMAs pipeline behind compute
        if _layer_vmem_bytes(c, Bp, Hp, in_dims, out_itemsize) <= _VMEM_TARGET:
            return c
    return 1


def _run_bidi_lstm_layer(xs, layer_params, *, seq_len, batch_p, hidden_p, out_dtype):
    (wih_f, wih_b, whh_f, whh_b, bias_f, bias_b) = layer_params
    T, Bp, Hp = seq_len, batch_p, hidden_p
    nx = len(xs)
    in_dims = [int(x.shape[1]) for x in xs]
    out_itemsize = jnp.dtype(out_dtype).itemsize

    chunk = _pick_chunk(T, Bp, Hp, in_dims, out_itemsize)
    nc = T // chunk
    rows = chunk * Bp
    est = _layer_vmem_bytes(chunk, Bp, Hp, in_dims, out_itemsize)
    vmem_limit = int(min(max(2 * est, 16 * 1024 * 1024), 64 * 1024 * 1024))

    def fwd_idx(i):
        return (i, 0)

    def bwd_idx(i):
        return (nc - 1 - i, 0)

    def full2(shape):
        return pl.BlockSpec(shape, lambda i: (0, 0))

    in_specs = (
        [pl.BlockSpec((rows, d), fwd_idx) for d in in_dims]
        + [pl.BlockSpec((rows, d), bwd_idx) for d in in_dims]
        + [full2(w.shape) for w in wih_f]
        + [full2(w.shape) for w in wih_b]
        + [full2(whh_f.shape), full2(whh_b.shape),
           full2(bias_f.shape), full2(bias_b.shape)]
    )
    out_specs = (
        pl.BlockSpec((rows, Hp), fwd_idx),
        pl.BlockSpec((rows, Hp), bwd_idx),
        pl.BlockSpec((2, Bp, Hp), lambda i: (0, 0, 0)),
        pl.BlockSpec((2, Bp, Hp), lambda i: (0, 0, 0)),
    )
    out_shape = (
        jax.ShapeDtypeStruct((T * Bp, Hp), out_dtype),
        jax.ShapeDtypeStruct((T * Bp, Hp), out_dtype),
        jax.ShapeDtypeStruct((2, Bp, Hp), jnp.float32),
        jax.ShapeDtypeStruct((2, Bp, Hp), jnp.float32),
    )
    scratch_shapes = [
        pltpu.VMEM((rows, 4 * Hp), jnp.float32),   # gx fwd (chunk pre-activations)
        pltpu.VMEM((rows, 4 * Hp), jnp.float32),   # gx bwd
        pltpu.VMEM((Bp, Hp), jnp.bfloat16),        # h fwd (bf16, MXU-native)
        pltpu.VMEM((Bp, Hp), jnp.float32),         # c fwd
        pltpu.VMEM((Bp, Hp), jnp.bfloat16),        # h bwd
        pltpu.VMEM((Bp, Hp), jnp.float32),         # c bwd
    ]

    kernel = functools.partial(
        _bidi_lstm_layer_kernel, num_x=nx, chunk=chunk,
        batch_p=Bp, hidden_p=Hp, num_chunks=nc)

    return pl.pallas_call(
        kernel,
        grid=(nc,),
        out_shape=out_shape,
        in_specs=in_specs,
        out_specs=out_specs,
        scratch_shapes=scratch_shapes,
        compiler_params=pltpu.CompilerParams(
            dimension_semantics=("arbitrary",),   # time chunks carry the recurrence
            vmem_limit_bytes=vmem_limit),
    )(*xs, *xs, *wih_f, *wih_b, whh_f, whh_b, bias_f, bias_b)


# --------------------------------------------------------------------------
# Full forward (all layers).
# --------------------------------------------------------------------------
@functools.partial(jax.jit, static_argnames=("hidden_dim",))
def _bidi_lstm_forward(x, params, *, hidden_dim):
    B, T, Din = x.shape
    H = hidden_dim
    Hp = _round_up(H, _LANE)
    Bp = _round_up(B, _SUBLANE)

    # bf16 cast BEFORE the layout change (half the bytes moved), pad batch to
    # the sublane tile, flatten time-major rows for lane/sublane-aligned access.
    x_tbd = jnp.transpose(x.astype(jnp.bfloat16), (1, 0, 2))          # (T, B, D)
    x_tbd = jnp.pad(x_tbd, ((0, 0), (0, Bp - B), (0, 0)))             # (T, Bp, D)
    xs = [x_tbd.reshape(T * Bp, Din)]

    num_layers = len(params)
    h_finals, c_finals = [], []
    out_f = out_b = None
    for layer_idx, layer_params in enumerate(params):
        last = layer_idx == num_layers - 1
        out_dtype = jnp.float32 if last else jnp.bfloat16
        out_f, out_b, hn, cn = _run_bidi_lstm_layer(
            xs, layer_params, seq_len=T, batch_p=Bp, hidden_p=Hp,
            out_dtype=out_dtype)
        h_finals.append(hn[:, :B, :H])
        c_finals.append(cn[:, :B, :H])
        xs = [out_f, out_b]       # lane-dense halves; next layer splits its W_ih

    of = out_f.reshape(T, Bp, Hp)[:, :B, :H]
    ob = out_b.reshape(T, Bp, Hp)[:, :B, :H]
    out = jnp.transpose(jnp.concatenate([of, ob], axis=-1), (1, 0, 2))  # (B,T,2H)
    hidden = jnp.concatenate(h_finals, axis=0)        # (num_layers*2, B, H)
    cell = jnp.concatenate(c_finals, axis=0)
    return out, hidden, cell


class RNNEncoderBidiPallas:
    """Pallas TPU implementation of RNNEncoderBidi.forward (eval semantics)."""

    def __init__(self, input_dim, hidden_dim, num_layers, dropout=0.1, key=None):
        self.input_dim = input_dim
        self.hidden_size = hidden_dim
        self.num_layers = num_layers
        # TODO(synk): inter-layer dropout is a training-mode stochastic op; not
        # applied here, matching nn.LSTM eval-mode semantics.
        self.dropout = dropout
        if key is None:
            key = jax.random.PRNGKey(42)

        H = hidden_dim
        Hp = _round_up(H, _LANE)
        bound = 1.0 / math.sqrt(hidden_dim)

        def pad_gate_cols(w_t):              # (in, 4H) -> (in, 4Hp), per gate
            n_in = w_t.shape[0]
            w4 = w_t.reshape(n_in, 4, H)
            return jnp.pad(w4, ((0, 0), (0, 0), (0, Hp - H))).reshape(n_in, 4 * Hp)

        def pad_rows(w, rows_to):            # zero-pad the contraction dim
            return jnp.pad(w, ((0, rows_to - w.shape[0]), (0, 0)))

        self.torch_weights = []   # raw per-direction weights (PyTorch layout)
        self.params = []          # packed/padded kernel weights per layer
        for layer in range(num_layers):
            in_size = input_dim if layer == 0 else 2 * hidden_dim
            dir_raw, wih_dirs, whh_dirs, bias_dirs = [], [], [], []
            for _direction in range(2):
                key, k1, k2, k3, k4 = jax.random.split(key, 5)
                w_ih = jax.random.uniform(k1, (4 * H, in_size), jnp.float32, -bound, bound)
                w_hh = jax.random.uniform(k2, (4 * H, H), jnp.float32, -bound, bound)
                b_ih = jax.random.uniform(k3, (4 * H,), jnp.float32, -bound, bound)
                b_hh = jax.random.uniform(k4, (4 * H,), jnp.float32, -bound, bound)
                dir_raw.append((w_ih, w_hh, b_ih, b_hh))

                wih_t = pad_gate_cols(w_ih.T)                          # (in, 4Hp)
                if layer == 0:
                    wih_slices = (wih_t.astype(jnp.bfloat16),)
                else:
                    wih_slices = (
                        pad_rows(wih_t[:H], Hp).astype(jnp.bfloat16),   # fwd half of input
                        pad_rows(wih_t[H:], Hp).astype(jnp.bfloat16),   # bwd half of input
                    )
                whh_t = pad_rows(pad_gate_cols(w_hh.T), Hp).astype(jnp.bfloat16)
                bias = pad_gate_cols((b_ih + b_hh)[None, :])            # (1, 4Hp) f32
                wih_dirs.append(wih_slices)
                whh_dirs.append(whh_t)
                bias_dirs.append(bias)
            self.torch_weights.append(dir_raw)
            self.params.append((wih_dirs[0], wih_dirs[1],
                                whh_dirs[0], whh_dirs[1],
                                bias_dirs[0], bias_dirs[1]))

    def __call__(self, x):
        return _bidi_lstm_forward(x, self.params, hidden_dim=self.hidden_size)


# --------------------------------------------------------------------------
# Pure-JAX reference (PyTorch nn.LSTM eval semantics, bf16-stored weights).
# --------------------------------------------------------------------------
def _reference_forward(x, torch_weights, hidden_dim):
    H = hidden_dim
    B, T, _ = x.shape

    def q(a):  # match the kernel's bf16 weight / layer-0 input storage
        return a.astype(jnp.bfloat16).astype(jnp.float32)

    def run_direction(xseq, w_ih, w_hh, b_ih, b_hh, reverse):
        w_ih, w_hh = q(w_ih), q(w_hh)
        h = jnp.zeros((B, H), jnp.float32)
        c = jnp.zeros((B, H), jnp.float32)
        outs = [None] * T
        order = range(T - 1, -1, -1) if reverse else range(T)
        for t in order:
            g = xseq[:, t, :] @ w_ih.T + h @ w_hh.T + b_ih + b_hh
            i = jax.nn.sigmoid(g[:, 0 * H:1 * H])
            f = jax.nn.sigmoid(g[:, 1 * H:2 * H])
            gg = jnp.tanh(g[:, 2 * H:3 * H])
            o = jax.nn.sigmoid(g[:, 3 * H:4 * H])
            c = f * c + i * gg
            h = o * jnp.tanh(c)
            outs[t] = h
        return jnp.stack(outs, axis=1), h, c

    cur = q(x)
    hs, cs = [], []
    for dir_raw in torch_weights:
        (wf_ih, wf_hh, bf_ih, bf_hh) = dir_raw[0]
        (wb_ih, wb_hh, bb_ih, bb_hh) = dir_raw[1]
        o_f, h_f, c_f = run_direction(cur, wf_ih, wf_hh, bf_ih, bf_hh, False)
        o_b, h_b, c_b = run_direction(cur, wb_ih, wb_hh, bb_ih, bb_hh, True)
        cur = jnp.concatenate([o_f, o_b], axis=-1)
        hs += [h_f, h_b]
        cs += [c_f, c_b]
    return cur, jnp.stack(hs, axis=0), jnp.stack(cs, axis=0)


if __name__ == "__main__":
    batch, seq, input_dim, hidden_dim, num_layers = 2, 8, 16, 32, 2

    key = jax.random.PRNGKey(0)
    k_x, k_w = jax.random.split(key)
    x = jax.random.normal(k_x, (batch, seq, input_dim), dtype=jnp.float32)

    model = RNNEncoderBidiPallas(input_dim, hidden_dim, num_layers, key=k_w)
    out, hidden, cell = model(x)
    jax.block_until_ready((out, hidden, cell))

    assert out.shape == (batch, seq, 2 * hidden_dim), out.shape
    assert hidden.shape == (num_layers * 2, batch, hidden_dim), hidden.shape
    assert cell.shape == (num_layers * 2, batch, hidden_dim), cell.shape
    assert bool(jnp.all(jnp.isfinite(out)))
    assert bool(jnp.all(jnp.isfinite(hidden)))
    assert bool(jnp.all(jnp.isfinite(cell)))

    # Numerical check against a pure-JAX reference (bf16 weight storage, f32
    # math); tolerance covers the kernel's bf16 recurrent h / inter-layer acts.
    ref_out, ref_hidden, ref_cell = _reference_forward(
        x, model.torch_weights, hidden_dim)
    for name, got, ref in (("out", out, ref_out),
                           ("hidden", hidden, ref_hidden),
                           ("cell", cell, ref_cell)):
        err = float(jnp.max(jnp.abs(got - ref)))
        tol = 5e-2 * (1.0 + float(jnp.max(jnp.abs(ref))))
        assert err <= tol, (name, err, tol)

    print("KERNEL_OK")
</pallas_src>

<mosaic_0001>
module attributes {stable_mosaic.version = 11 : i64} {
  func.func @_bidi_lstm_layer_kernel(%arg0: i32, %arg1: memref<64x16xbf16, #tpu.memory_space<vmem>>, %arg2: memref<64x16xbf16, #tpu.memory_space<vmem>>, %arg3: memref<16x512xbf16, #tpu.memory_space<vmem>>, %arg4: memref<16x512xbf16, #tpu.memory_space<vmem>>, %arg5: memref<128x512xbf16, #tpu.memory_space<vmem>>, %arg6: memref<128x512xbf16, #tpu.memory_space<vmem>>, %arg7: memref<1x512xf32, #tpu.memory_space<vmem>>, %arg8: memref<1x512xf32, #tpu.memory_space<vmem>>, %arg9: memref<64x128xbf16, #tpu.memory_space<vmem>>, %arg10: memref<64x128xbf16, #tpu.memory_space<vmem>>, %arg11: memref<2x16x128xf32, #tpu.memory_space<vmem>>, %arg12: memref<2x16x128xf32, #tpu.memory_space<vmem>>, %arg13: memref<64x512xf32, #tpu.memory_space<vmem>>, %arg14: memref<64x512xf32, #tpu.memory_space<vmem>>, %arg15: memref<16x128xbf16, #tpu.memory_space<vmem>>, %arg16: memref<16x128xf32, #tpu.memory_space<vmem>>, %arg17: memref<16x128xbf16, #tpu.memory_space<vmem>>, %arg18: memref<16x128xf32, #tpu.memory_space<vmem>>) attributes {dimension_semantics = [#tpu.dimension_semantics<arbitrary>], iteration_bounds = array<i64: 2>, scalar_prefetch = 0 : i64, scratch_operands = 6 : i64, tpu.core_type = #tpu.core_type<tc>, window_params = [{transform_indices = @transform_0, window_bounds = array<i64: 64, 16>}, {transform_indices = @transform_1, window_bounds = array<i64: 64, 16>}, {pipeline_mode = #tpu.pipeline_mode<synchronous>, transform_indices = @transform_2, window_bounds = array<i64: 16, 512>}, {pipeline_mode = #tpu.pipeline_mode<synchronous>, transform_indices = @transform_3, window_bounds = array<i64: 16, 512>}, {pipeline_mode = #tpu.pipeline_mode<synchronous>, transform_indices = @transform_4, window_bounds = array<i64: 128, 512>}, {pipeline_mode = #tpu.pipeline_mode<synchronous>, transform_indices = @transform_5, window_bounds = array<i64: 128, 512>}, {pipeline_mode = #tpu.pipeline_mode<synchronous>, transform_indices = @transform_6, window_bounds = array<i64: 1, 512>}, {pipeline_mode = #tpu.pipeline_mode<synchronous>, transform_indices = @transform_7, window_bounds = array<i64: 1, 512>}, {transform_indices = @transform_8, window_bounds = array<i64: 64, 128>}, {transform_indices = @transform_9, window_bounds = array<i64: 64, 128>}, {pipeline_mode = #tpu.pipeline_mode<synchronous>, transform_indices = @transform_10, window_bounds = array<i64: 2, 16, 128>}, {pipeline_mode = #tpu.pipeline_mode<synchronous>, transform_indices = @transform_11, window_bounds = array<i64: 2, 16, 128>}]} {
    %c0_i32 = arith.constant 0 : i32
    %0 = arith.cmpi eq, %arg0, %c0_i32 : i32
    %1 = arith.extui %0 : i1 to i32
    %c0_i32_0 = arith.constant 0 : i32
    %2 = arith.cmpi ne, %1, %c0_i32_0 : i32
    scf.if %2 {
      %cst_21 = arith.constant 0.000000e+00 : bf16
      %21 = vector.broadcast %cst_21 : bf16 to vector<16x128xbf16>
      %c0_22 = arith.constant 0 : index
      %c0_23 = arith.constant 0 : index
      %22 = vector.load %arg15[%c0_22, %c0_23] : memref<16x128xbf16, #tpu.memory_space<vmem>>, vector<16x128xbf16>
      tpu.vector_store %arg15[%c0_22, %c0_23], %21 {strides = array<i32>} : memref<16x128xbf16, #tpu.memory_space<vmem>>, vector<16x128xbf16>,
      %cst_24 = arith.constant 0.000000e+00 : bf16
      %23 = vector.broadcast %cst_24 : bf16 to vector<16x128xbf16>
      %c0_25 = arith.constant 0 : index
      %c0_26 = arith.constant 0 : index
      %24 = vector.load %arg17[%c0_25, %c0_26] : memref<16x128xbf16, #tpu.memory_space<vmem>>, vector<16x128xbf16>
      tpu.vector_store %arg17[%c0_25, %c0_26], %23 {strides = array<i32>} : memref<16x128xbf16, #tpu.memory_space<vmem>>, vector<16x128xbf16>,
      %cst_27 = arith.constant 0.000000e+00 : f32
      %25 = vector.broadcast %cst_27 : f32 to vector<16x128xf32>
      %c0_28 = arith.constant 0 : index
      %c0_29 = arith.constant 0 : index
      %26 = vector.load %arg16[%c0_28, %c0_29] : memref<16x128xf32, #tpu.memory_space<vmem>>, vector<16x128xf32>
      tpu.vector_store %arg16[%c0_28, %c0_29], %25 {strides = array<i32>} : memref<16x128xf32, #tpu.memory_space<vmem>>, vector<16x128xf32>,
      %cst_30 = arith.constant 0.000000e+00 : f32
      %27 = vector.broadcast %cst_30 : f32 to vector<16x128xf32>
      %c0_31 = arith.constant 0 : index
      %c0_32 = arith.constant 0 : index
      %28 = vector.load %arg18[%c0_31, %c0_32] : memref<16x128xf32, #tpu.memory_space<vmem>>, vector<16x128xf32>
      tpu.vector_store %arg18[%c0_31, %c0_32], %27 {strides = array<i32>} : memref<16x128xf32, #tpu.memory_space<vmem>>, vector<16x128xf32>,
    } else {
    }
    %c0 = arith.constant 0 : index
    %c0_1 = arith.constant 0 : index
    %3 = vector.load %arg1[%c0, %c0_1] : memref<64x16xbf16, #tpu.memory_space<vmem>>, vector<64x16xbf16>
    %c0_2 = arith.constant 0 : index
    %c0_3 = arith.constant 0 : index
    %4 = vector.load %arg3[%c0_2, %c0_3] : memref<16x512xbf16, #tpu.memory_space<vmem>>, vector<16x512xbf16>
    %cst = arith.constant dense<0.000000e+00> : vector<64x512xf32>
    %5 = tpu.matmul %3, %4, %cst {dimension_numbers = #tpu.dot_dimension_numbers<[1], [0], [0], [1], [0, 0, 1, 1], [], []>} : vector<64x16xbf16>, vector<16x512xbf16>, vector<64x512xf32> -> vector<64x512xf32>
    %c0_4 = arith.constant 0 : index
    %c0_5 = arith.constant 0 : index
    %6 = vector.load %arg2[%c0_4, %c0_5] : memref<64x16xbf16, #tpu.memory_space<vmem>>, vector<64x16xbf16>
    %c0_6 = arith.constant 0 : index
    %c0_7 = arith.constant 0 : index
    %7 = vector.load %arg4[%c0_6, %c0_7] : memref<16x512xbf16, #tpu.memory_space<vmem>>, vector<16x512xbf16>
    %cst_8 = arith.constant dense<0.000000e+00> : vector<64x512xf32>
    %8 = tpu.matmul %6, %7, %cst_8 {dimension_numbers = #tpu.dot_dimension_numbers<[1], [0], [0], [1], [0, 0, 1, 1], [], []>} : vector<64x16xbf16>, vector<16x512xbf16>, vector<64x512xf32> -> vector<64x512xf32>
    %c0_9 = arith.constant 0 : index
    %c0_10 = arith.constant 0 : index
    %9 = vector.load %arg7[%c0_9, %c0_10] : memref<1x512xf32, #tpu.memory_space<vmem>>, vector<1x512xf32>
    %10 = vector.broadcast %9 : vector<1x512xf32> to vector<64x512xf32>
    %11 = arith.addf %5, %10 : vector<64x512xf32>
    %c0_11 = arith.constant 0 : index
    %c0_12 = arith.constant 0 : index
    %12 = vector.load %arg13[%c0_11, %c0_12] : memref<64x512xf32, #tpu.memory_space<vmem>>, vector<64x512xf32>
    tpu.vector_store %arg13[%c0_11, %c0_12], %11 {strides = array<i32>} : memref<64x512xf32, #tpu.memory_space<vmem>>, vector<64x512xf32>,
    %c0_13 = arith.constant 0 : index
    %c0_14 = arith.constant 0 : index
    %13 = vector.load %arg8[%c0_13, %c0_14] : memref<1x512xf32, #tpu.memory_space<vmem>>, vector<1x512xf32>
    %14 = vector.broadcast %13 : vector<1x512xf32> to vector<64x512xf32>
    %15 = arith.addf %8, %14 : vector<64x512xf32>
    %c0_15 = arith.constant 0 : index
    %c0_16 = arith.constant 0 : index
    %16 = vector.load %arg14[%c0_15, %c0_16] : memref<64x512xf32, #tpu.memory_space<vmem>>, vector<64x512xf32>
    tpu.vector_store %arg14[%c0_15, %c0_16], %15 {strides = array<i32>} : memref<64x512xf32, #tpu.memory_space<vmem>>, vector<64x512xf32>,
    %c0_i32_17 = arith.constant 0 : i32
    %c2_i32 = arith.constant 2 : i32
    %17 = arith.addi %c0_i32_17, %c2_i32 : i32
    %c1_i32 = arith.constant 1 : i32
    scf.for %arg19 = %c0_i32_17 to %17 step %c1_i32  : i32 {
      %c2_i32_21 = arith.constant 2 : i32
      %21 = arith.muli %arg19, %c2_i32_21 : i32
      %c16_i32 = arith.constant 16 : i32
      %22 = arith.muli %21, %c16_i32 : i32
      %23 = tpu.assume_multiple %22, 16 : i32
      %c3_i32 = arith.constant 3 : i32
      %24 = arith.subi %c3_i32, %21 : i32
      %c16_i32_22 = arith.constant 16 : i32
      %25 = arith.muli %24, %c16_i32_22 : i32
      %26 = tpu.assume_multiple %25, 16 : i32
      %c0_23 = arith.constant 0 : index
      %c0_24 = arith.constant 0 : index
      %27 = vector.load %arg15[%c0_23, %c0_24] : memref<16x128xbf16, #tpu.memory_space<vmem>>, vector<16x128xbf16>
      %c0_25 = arith.constant 0 : index
      %c0_26 = arith.constant 0 : index
      %28 = vector.load %arg5[%c0_25, %c0_26] : memref<128x512xbf16, #tpu.memory_space<vmem>>, vector<128x512xbf16>
      %cst_27 = arith.constant dense<0.000000e+00> : vector<16x512xf32>
      %29 = tpu.matmul %27, %28, %cst_27 {dimension_numbers = #tpu.dot_dimension_numbers<[1], [0], [0], [1], [0, 0, 1, 1], [], []>} : vector<16x128xbf16>, vector<128x512xbf16>, vector<16x512xf32> -> vector<16x512xf32>
      %c0_28 = arith.constant 0 : index
      %c0_29 = arith.constant 0 : index
      %30 = vector.load %arg17[%c0_28, %c0_29] : memref<16x128xbf16, #tpu.memory_space<vmem>>, vector<16x128xbf16>
      %c0_30 = arith.constant 0 : index
      %c0_31 = arith.constant 0 : index
      %31 = vector.load %arg6[%c0_30, %c0_31] : memref<128x512xbf16, #tpu.memory_space<vmem>>, vector<128x512xbf16>
      %cst_32 = arith.constant dense<0.000000e+00> : vector<16x512xf32>
      %32 = tpu.matmul %30, %31, %cst_32 {dimension_numbers = #tpu.dot_dimension_numbers<[1], [0], [0], [1], [0, 0, 1, 1], [], []>} : vector<16x128xbf16>, vector<128x512xbf16>, vector<16x512xf32> -> vector<16x512xf32>
      %33 = arith.index_cast %23 : i32 to index
      %c0_33 = arith.constant 0 : index
      %34 = vector.load %arg13[%33, %c0_33] : memref<64x512xf32, #tpu.memory_space<vmem>>, vector<16x512xf32>
      %35 = arith.addf %34, %29 : vector<16x512xf32>
      %36 = arith.index_cast %26 : i32 to index
      %c0_34 = arith.constant 0 : index
      %37 = vector.load %arg14[%36, %c0_34] : memref<64x512xf32, #tpu.memory_space<vmem>>, vector<16x512xf32>
      %38 = arith.addf %37, %32 : vector<16x512xf32>
      %39 = vector.extract_strided_slice %35 {offsets = [0, 0], sizes = [16, 128], strides = [1, 1]} : vector<16x512xf32> to vector<16x128xf32>
      %40 = arith.negf %39 : vector<16x128xf32>
      %41 = math.exp %40 : vector<16x128xf32>
      %cst_35 = arith.constant 1.000000e+00 : f32
      %42 = vector.broadcast %cst_35 : f32 to vector<16x128xf32>
      %43 = arith.addf %42, %41 : vector<16x128xf32>
      %44 = arith.divf %42, %43 : vector<16x128xf32>
      %45 = vector.extract_strided_slice %35 {offsets = [0, 128], sizes = [16, 128], strides = [1, 1]} : vector<16x512xf32> to vector<16x128xf32>
      %46 = arith.negf %45 : vector<16x128xf32>
      %47 = math.exp %46 : vector<16x128xf32>
      %cst_36 = arith.constant 1.000000e+00 : f32
      %48 = vector.broadcast %cst_36 : f32 to vector<16x128xf32>
      %49 = arith.addf %48, %47 : vector<16x128xf32>
      %50 = arith.divf %48, %49 : vector<16x128xf32>
      %51 = vector.extract_strided_slice %35 {offsets = [0, 256], sizes = [16, 128], strides = [1, 1]} : vector<16x512xf32> to vector<16x128xf32>
      %52 = math.tanh %51 : vector<16x128xf32>
      %53 = vector.extract_strided_slice %35 {offsets = [0, 384], sizes = [16, 128], strides = [1, 1]} : vector<16x512xf32> to vector<16x128xf32>
      %54 = arith.negf %53 : vector<16x128xf32>
      %55 = math.exp %54 : vector<16x128xf32>
      %cst_37 = arith.constant 1.000000e+00 : f32
      %56 = vector.broadcast %cst_37 : f32 to vector<16x128xf32>
      %57 = arith.addf %56, %55 : vector<16x128xf32>
      %58 = arith.divf %56, %57 : vector<16x128xf32>
      %c0_38 = arith.constant 0 : index
      %c0_39 = arith.constant 0 : index
      %59 = vector.load %arg16[%c0_38, %c0_39] : memref<16x128xf32, #tpu.memory_space<vmem>>, vector<16x128xf32>
      %60 = arith.mulf %50, %59 : vector<16x128xf32>
      %61 = arith.mulf %44, %52 : vector<16x128xf32>
      %62 = arith.addf %60, %61 : vector<16x128xf32>
      %63 = math.tanh %62 : vector<16x128xf32>
      %64 = arith.mulf %58, %63 : vector<16x128xf32>
      %65 = vector.extract_strided_slice %38 {offsets = [0, 0], sizes = [16, 128], strides = [1, 1]} : vector<16x512xf32> to vector<16x128xf32>
      %66 = arith.negf %65 : vector<16x128xf32>
      %67 = math.exp %66 : vector<16x128xf32>
      %cst_40 = arith.constant 1.000000e+00 : f32
      %68 = vector.broadcast %cst_40 : f32 to vector<16x128xf32>
      %69 = arith.addf %68, %67 : vector<16x128xf32>
      %70 = arith.divf %68, %69 : vector<16x128xf32>
      %71 = vector.extract_strided_slice %38 {offsets = [0, 128], sizes = [16, 128], strides = [1, 1]} : vector<16x512xf32> to vector<16x128xf32>
      %72 = arith.negf %71 : vector<16x128xf32>
      %73 = math.exp %72 : vector<16x128xf32>
      %cst_41 = arith.constant 1.000000e+00 : f32
      %74 = vector.broadcast %cst_41 : f32 to vector<16x128xf32>
      %75 = arith.addf %74, %73 : vector<16x128xf32>
      %76 = arith.divf %74, %75 : vector<16x128xf32>
      %77 = vector.extract_strided_slice %38 {offsets = [0, 256], sizes = [16, 128], strides = [1, 1]} : vector<16x512xf32> to vector<16x128xf32>
      %78 = math.tanh %77 : vector<16x128xf32>
      %79 = vector.extract_strided_slice %38 {offsets = [0, 384], sizes = [16, 128], strides = [1, 1]} : vector<16x512xf32> to vector<16x128xf32>
      %80 = arith.negf %79 : vector<16x128xf32>
      %81 = math.exp %80 : vector<16x128xf32>
      %cst_42 = arith.constant 1.000000e+00 : f32
      %82 = vector.broadcast %cst_42 : f32 to vector<16x128xf32>
      %83 = arith.addf %82, %81 : vector<16x128xf32>
      %84 = arith.divf %82, %83 : vector<16x128xf32>
      %c0_43 = arith.constant 0 : index
      %c0_44 = arith.constant 0 : index
      %85 = vector.load %arg18[%c0_43, %c0_44] : memref<16x128xf32, #tpu.memory_space<vmem>>, vector<16x128xf32>
      %86 = arith.mulf %76, %85 : vector<16x128xf32>
      %87 = arith.mulf %70, %78 : vector<16x128xf32>
      %88 = arith.addf %86, %87 : vector<16x128xf32>
      %89 = math.tanh %88 : vector<16x128xf32>
      %90 = arith.mulf %84, %89 : vector<16x128xf32>
      %c0_45 = arith.constant 0 : index
      %c0_46 = arith.constant 0 : index
      %91 = vector.load %arg16[%c0_45, %c0_46] : memref<16x128xf32, #tpu.memory_space<vmem>>, vector<16x128xf32>
      tpu.vector_store %arg16[%c0_45, %c0_46], %62 {strides = array<i32>} : memref<16x128xf32, #tpu.memory_space<vmem>>, vector<16x128xf32>,
      %c0_47 = arith.constant 0 : index
      %c0_48 = arith.constant 0 : index
      %92 = vector.load %arg18[%c0_47, %c0_48] : memref<16x128xf32, #tpu.memory_space<vmem>>, vector<16x128xf32>
      tpu.vector_store %arg18[%c0_47, %c0_48], %88 {strides = array<i32>} : memref<16x128xf32, #tpu.memory_space<vmem>>, vector<16x128xf32>,
      %93 = arith.truncf %64 : vector<16x128xf32> to vector<16x128xbf16>
      %c0_49 = arith.constant 0 : index
      %c0_50 = arith.constant 0 : index
      %94 = vector.load %arg15[%c0_49, %c0_50] : memref<16x128xbf16, #tpu.memory_space<vmem>>, vector<16x128xbf16>
      tpu.vector_store %arg15[%c0_49, %c0_50], %93 {strides = array<i32>} : memref<16x128xbf16, #tpu.memory_space<vmem>>, vector<16x128xbf16>,
      %95 = arith.truncf %90 : vector<16x128xf32> to vector<16x128xbf16>
      %c0_51 = arith.constant 0 : index
      %c0_52 = arith.constant 0 : index
      %96 = vector.load %arg17[%c0_51, %c0_52] : memref<16x128xbf16, #tpu.memory_space<vmem>>, vector<16x128xbf16>
      tpu.vector_store %arg17[%c0_51, %c0_52], %95 {strides = array<i32>} : memref<16x128xbf16, #tpu.memory_space<vmem>>, vector<16x128xbf16>,
      %97 = arith.truncf %64 : vector<16x128xf32> to vector<16x128xbf16>
      %98 = arith.index_cast %23 : i32 to index
      %c0_53 = arith.constant 0 : index
      %99 = vector.load %arg9[%98, %c0_53] : memref<64x128xbf16, #tpu.memory_space<vmem>>, vector<16x128xbf16>
      tpu.vector_store %arg9[%98, %c0_53], %97 {strides = array<i32>} : memref<64x128xbf16, #tpu.memory_space<vmem>>, vector<16x128xbf16>,
      %100 = arith.truncf %90 : vector<16x128xf32> to vector<16x128xbf16>
      %101 = arith.index_cast %26 : i32 to index
      %c0_54 = arith.constant 0 : index
      %102 = vector.load %arg10[%101, %c0_54] : memref<64x128xbf16, #tpu.memory_space<vmem>>, vector<16x128xbf16>
      tpu.vector_store %arg10[%101, %c0_54], %100 {strides = array<i32>} : memref<64x128xbf16, #tpu.memory_space<vmem>>, vector<16x128xbf16>,
      %c1_i32_55 = arith.constant 1 : i32
      %103 = arith.addi %21, %c1_i32_55 : i32
      %c16_i32_56 = arith.constant 16 : i32
      %104 = arith.muli %103, %c16_i32_56 : i32
      %105 = tpu.assume_multiple %104, 16 : i32
      %c3_i32_57 = arith.constant 3 : i32
      %106 = arith.subi %c3_i32_57, %103 : i32
      %c16_i32_58 = arith.constant 16 : i32
      %107 = arith.muli %106, %c16_i32_58 : i32
      %108 = tpu.assume_multiple %107, 16 : i32
      %c0_59 = arith.constant 0 : index
      %c0_60 = arith.constant 0 : index
      %109 = vector.load %arg15[%c0_59, %c0_60] : memref<16x128xbf16, #tpu.memory_space<vmem>>, vector<16x128xbf16>
      %c0_61 = arith.constant 0 : index
      %c0_62 = arith.constant 0 : index
      %110 = vector.load %arg5[%c0_61, %c0_62] : memref<128x512xbf16, #tpu.memory_space<vmem>>, vector<128x512xbf16>
      %cst_63 = arith.constant dense<0.000000e+00> : vector<16x512xf32>
      %111 = tpu.matmul %109, %110, %cst_63 {dimension_numbers = #tpu.dot_dimension_numbers<[1], [0], [0], [1], [0, 0, 1, 1], [], []>} : vector<16x128xbf16>, vector<128x512xbf16>, vector<16x512xf32> -> vector<16x512xf32>
      %c0_64 = arith.constant 0 : index
      %c0_65 = arith.constant 0 : index
      %112 = vector.load %arg17[%c0_64, %c0_65] : memref<16x128xbf16, #tpu.memory_space<vmem>>, vector<16x128xbf16>
      %c0_66 = arith.constant 0 : index
      %c0_67 = arith.constant 0 : index
      %113 = vector.load %arg6[%c0_66, %c0_67] : memref<128x512xbf16, #tpu.memory_space<vmem>>, vector<128x512xbf16>
      %cst_68 = arith.constant dense<0.000000e+00> : vector<16x512xf32>
      %114 = tpu.matmul %112, %113, %cst_68 {dimension_numbers = #tpu.dot_dimension_numbers<[1], [0], [0], [1], [0, 0, 1, 1], [], []>} : vector<16x128xbf16>, vector<128x512xbf16>, vector<16x512xf32> -> vector<16x512xf32>
      %115 = arith.index_cast %105 : i32 to index
      %c0_69 = arith.constant 0 : index
      %116 = vector.load %arg13[%115, %c0_69] : memref<64x512xf32, #tpu.memory_space<vmem>>, vector<16x512xf32>
      %117 = arith.addf %116, %111 : vector<16x512xf32>
      %118 = arith.index_cast %108 : i32 to index
      %c0_70 = arith.constant 0 : index
      %119 = vector.load %arg14[%118, %c0_70] : memref<64x512xf32, #tpu.memory_space<vmem>>, vector<16x512xf32>
      %120 = arith.addf %119, %114 : vector<16x512xf32>
      %121 = vector.extract_strided_slice %117 {offsets = [0, 0], sizes = [16, 128], strides = [1, 1]} : vector<16x512xf32> to vector<16x128xf32>
      %122 = arith.negf %121 : vector<16x128xf32>
      %123 = math.exp %122 : vector<16x128xf32>
      %cst_71 = arith.constant 1.000000e+00 : f32
      %124 = vector.broadcast %cst_71 : f32 to vector<16x128xf32>
      %125 = arith.addf %124, %123 : vector<16x128xf32>
      %126 = arith.divf %124, %125 : vector<16x128xf32>
      %127 = vector.extract_strided_slice %117 {offsets = [0, 128], sizes = [16, 128], strides = [1, 1]} : vector<16x512xf32> to vector<16x128xf32>
      %128 = arith.negf %127 : vector<16x128xf32>
      %129 = math.exp %128 : vector<16x128xf32>
      %cst_72 = arith.constant 1.000000e+00 : f32
      %130 = vector.broadcast %cst_72 : f32 to vector<16x128xf32>
      %131 = arith.addf %130, %129 : vector<16x128xf32>
      %132 = arith.divf %130, %131 : vector<16x128xf32>
      %133 = vector.extract_strided_slice %117 {offsets = [0, 256], sizes = [16, 128], strides = [1, 1]} : vector<16x512xf32> to vector<16x128xf32>
      %134 = math.tanh %133 : vector<16x128xf32>
      %135 = vector.extract_strided_slice %117 {offsets = [0, 384], sizes = [16, 128], strides = [1, 1]} : vector<16x512xf32> to vector<16x128xf32>
      %136 = arith.negf %135 : vector<16x128xf32>
      %137 = math.exp %136 : vector<16x128xf32>
      %cst_73 = arith.constant 1.000000e+00 : f32
      %138 = vector.broadcast %cst_73 : f32 to vector<16x128xf32>
      %139 = arith.addf %138, %137 : vector<16x128xf32>
      %140 = arith.divf %138, %139 : vector<16x128xf32>
      %c0_74 = arith.constant 0 : index
      %c0_75 = arith.constant 0 : index
      %141 = vector.load %arg16[%c0_74, %c0_75] : memref<16x128xf32, #tpu.memory_space<vmem>>, vector<16x128xf32>
      %142 = arith.mulf %132, %141 : vector<16x128xf32>
      %143 = arith.mulf %126, %134 : vector<16x128xf32>
      %144 = arith.addf %142, %143 : vector<16x128xf32>
      %145 = math.tanh %144 : vector<16x128xf32>
      %146 = arith.mulf %140, %145 : vector<16x128xf32>
      %147 = vector.extract_strided_slice %120 {offsets = [0, 0], sizes = [16, 128], strides = [1, 1]} : vector<16x512xf32> to vector<16x128xf32>
      %148 = arith.negf %147 : vector<16x128xf32>
      %149 = math.exp %148 : vector<16x128xf32>
      %cst_76 = arith.constant 1.000000e+00 : f32
      %150 = vector.broadcast %cst_76 : f32 to vector<16x128xf32>
      %151 = arith.addf %150, %149 : vector<16x128xf32>
      %152 = arith.divf %150, %151 : vector<16x128xf32>
      %153 = vector.extract_strided_slice %120 {offsets = [0, 128], sizes = [16, 128], strides = [1, 1]} : vector<16x512xf32> to vector<16x128xf32>
      %154 = arith.negf %153 : vector<16x128xf32>
      %155 = math.exp %154 : vector<16x128xf32>
      %cst_77 = arith.constant 1.000000e+00 : f32
      %156 = vector.broadcast %cst_77 : f32 to vector<16x128xf32>
      %157 = arith.addf %156, %155 : vector<16x128xf32>
      %158 = arith.divf %156, %157 : vector<16x128xf32>
      %159 = vector.extract_strided_slice %120 {offsets = [0, 256], sizes = [16, 128], strides = [1, 1]} : vector<16x512xf32> to vector<16x128xf32>
      %160 = math.tanh %159 : vector<16x128xf32>
      %161 = vector.extract_strided_slice %120 {offsets = [0, 384], sizes = [16, 128], strides = [1, 1]} : vector<16x512xf32> to vector<16x128xf32>
      %162 = arith.negf %161 : vector<16x128xf32>
      %163 = math.exp %162 : vector<16x128xf32>
      %cst_78 = arith.constant 1.000000e+00 : f32
      %164 = vector.broadcast %cst_78 : f32 to vector<16x128xf32>
      %165 = arith.addf %164, %163 : vector<16x128xf32>
      %166 = arith.divf %164, %165 : vector<16x128xf32>
      %c0_79 = arith.constant 0 : index
      %c0_80 = arith.constant 0 : index
      %167 = vector.load %arg18[%c0_79, %c0_80] : memref<16x128xf32, #tpu.memory_space<vmem>>, vector<16x128xf32>
      %168 = arith.mulf %158, %167 : vector<16x128xf32>
      %169 = arith.mulf %152, %160 : vector<16x128xf32>
      %170 = arith.addf %168, %169 : vector<16x128xf32>
      %171 = math.tanh %170 : vector<16x128xf32>
      %172 = arith.mulf %166, %171 : vector<16x128xf32>
      %c0_81 = arith.constant 0 : index
      %c0_82 = arith.constant 0 : index
      %173 = vector.load %arg16[%c0_81, %c0_82] : memref<16x128xf32, #tpu.memory_space<vmem>>, vector<16x128xf32>
      tpu.vector_store %arg16[%c0_81, %c0_82], %144 {strides = array<i32>} : memref<16x128xf32, #tpu.memory_space<vmem>>, vector<16x128xf32>,
      %c0_83 = arith.constant 0 : index
      %c0_84 = arith.constant 0 : index
      %174 = vector.load %arg18[%c0_83, %c0_84] : memref<16x128xf32, #tpu.memory_space<vmem>>, vector<16x128xf32>
      tpu.vector_store %arg18[%c0_83, %c0_84], %170 {strides = array<i32>} : memref<16x128xf32, #tpu.memory_space<vmem>>, vector<16x128xf32>,
      %175 = arith.truncf %146 : vector<16x128xf32> to vector<16x128xbf16>
      %c0_85 = arith.constant 0 : index
      %c0_86 = arith.constant 0 : index
      %176 = vector.load %arg15[%c0_85, %c0_86] : memref<16x128xbf16, #tpu.memory_space<vmem>>, vector<16x128xbf16>
      tpu.vector_store %arg15[%c0_85, %c0_86], %175 {strides = array<i32>} : memref<16x128xbf16, #tpu.memory_space<vmem>>, vector<16x128xbf16>,
      %177 = arith.truncf %172 : vector<16x128xf32> to vector<16x128xbf16>
      %c0_87 = arith.constant 0 : index
      %c0_88 = arith.constant 0 : index
      %178 = vector.load %arg17[%c0_87, %c0_88] : memref<16x128xbf16, #tpu.memory_space<vmem>>, vector<16x128xbf16>
      tpu.vector_store %arg17[%c0_87, %c0_88], %177 {strides = array<i32>} : memref<16x128xbf16, #tpu.memory_space<vmem>>, vector<16x128xbf16>,
      %179 = arith.truncf %146 : vector<16x128xf32> to vector<16x128xbf16>
      %180 = arith.index_cast %105 : i32 to index
      %c0_89 = arith.constant 0 : index
      %181 = vector.load %arg9[%180, %c0_89] : memref<64x128xbf16, #tpu.memory_space<vmem>>, vector<16x128xbf16>
      tpu.vector_store %arg9[%180, %c0_89], %179 {strides = array<i32>} : memref<64x128xbf16, #tpu.memory_space<vmem>>, vector<16x128xbf16>,
      %182 = arith.truncf %172 : vector<16x128xf32> to vector<16x128xbf16>
      %183 = arith.index_cast %108 : i32 to index
      %c0_90 = arith.constant 0 : index
      %184 = vector.load %arg10[%183, %c0_90] : memref<64x128xbf16, #tpu.memory_space<vmem>>, vector<16x128xbf16>
      tpu.vector_store %arg10[%183, %c0_90], %182 {strides = array<i32>} : memref<64x128xbf16, #tpu.memory_space<vmem>>, vector<16x128xbf16>,
    }
    %c2_i32_18 = arith.constant 2 : i32
    %c1_i32_19 = arith.constant 1 : i32
    %18 = arith.cmpi eq, %arg0, %c1_i32_19 : i32
    %19 = arith.extui %18 : i1 to i32
    %c0_i32_20 = arith.constant 0 : i32
    %20 = arith.cmpi ne, %19, %c0_i32_20 : i32
    scf.if %20 {
      %c0_21 = arith.constant 0 : index
      %c0_22 = arith.constant 0 : index
      %21 = vector.load %arg15[%c0_21, %c0_22] : memref<16x128xbf16, #tpu.memory_space<vmem>>, vector<16x128xbf16>
      %22 = arith.extf %21 : vector<16x128xbf16> to vector<16x128xf32>
      %c0_23 = arith.constant 0 : index
      %c0_24 = arith.constant 0 : index
      %c0_25 = arith.constant 0 : index
      %23 = vector.load %arg11[%c0_23, %c0_24, %c0_25] : memref<2x16x128xf32, #tpu.memory_space<vmem>>, vector<1x16x128xf32>
      %24 = vector.shape_cast %23 : vector<1x16x128xf32> to vector<16x128xf32>
      %25 = vector.shape_cast %22 : vector<16x128xf32> to vector<1x16x128xf32>
      tpu.vector_store %arg11[%c0_23, %c0_24, %c0_25], %25 {strides = array<i32>} : memref<2x16x128xf32, #tpu.memory_space<vmem>>, vector<1x16x128xf32>,
      %c0_26 = arith.constant 0 : index
      %c0_27 = arith.constant 0 : index
      %26 = vector.load %arg17[%c0_26, %c0_27] : memref<16x128xbf16, #tpu.memory_space<vmem>>, vector<16x128xbf16>
      %27 = arith.extf %26 : vector<16x128xbf16> to vector<16x128xf32>
      %c1 = arith.constant 1 : index
      %c0_28 = arith.constant 0 : index
      %c0_29 = arith.constant 0 : index
      %28 = vector.load %arg11[%c1, %c0_28, %c0_29] : memref<2x16x128xf32, #tpu.memory_space<vmem>>, vector<1x16x128xf32>
      %29 = vector.shape_cast %28 : vector<1x16x128xf32> to vector<16x128xf32>
      %30 = vector.shape_cast %27 : vector<16x128xf32> to vector<1x16x128xf32>
      tpu.vector_store %arg11[%c1, %c0_28, %c0_29], %30 {strides = array<i32>} : memref<2x16x128xf32, #tpu.memory_space<vmem>>, vector<1x16x128xf32>,
      %c0_30 = arith.constant 0 : index
      %c0_31 = arith.constant 0 : index
      %31 = vector.load %arg16[%c0_30, %c0_31] : memref<16x128xf32, #tpu.memory_space<vmem>>, vector<16x128xf32>
      %c0_32 = arith.constant 0 : index
      %c0_33 = arith.constant 0 : index
      %c0_34 = arith.constant 0 : index
      %32 = vector.load %arg12[%c0_32, %c0_33, %c0_34] : memref<2x16x128xf32, #tpu.memory_space<vmem>>, vector<1x16x128xf32>
      %33 = vector.shape_cast %32 : vector<1x16x128xf32> to vector<16x128xf32>
      %34 = vector.shape_cast %31 : vector<16x128xf32> to vector<1x16x128xf32>
      tpu.vector_store %arg12[%c0_32, %c0_33, %c0_34], %34 {strides = array<i32>} : memref<2x16x128xf32, #tpu.memory_space<vmem>>, vector<1x16x128xf32>,
      %c0_35 = arith.constant 0 : index
      %c0_36 = arith.constant 0 : index
      %35 = vector.load %arg18[%c0_35, %c0_36] : memref<16x128xf32, #tpu.memory_space<vmem>>, vector<16x128xf32>
      %c1_37 = arith.constant 1 : index
      %c0_38 = arith.constant 0 : index
      %c0_39 = arith.constant 0 : index
      %36 = vector.load %arg12[%c1_37, %c0_38, %c0_39] : memref<2x16x128xf32, #tpu.memory_space<vmem>>, vector<1x16x128xf32>
      %37 = vector.shape_cast %36 : vector<1x16x128xf32> to vector<16x128xf32>
      %38 = vector.shape_cast %35 : vector<16x128xf32> to vector<1x16x128xf32>
      tpu.vector_store %arg12[%c1_37, %c0_38, %c0_39], %38 {strides = array<i32>} : memref<2x16x128xf32, #tpu.memory_space<vmem>>, vector<1x16x128xf32>,
    } else {
    }
    return
  }
  func.func @transform_0(%arg0: i32) -> (i32, i32) {
    %c0_i32 = arith.constant 0 : i32
    %c0_i32_0 = arith.constant 0 : i32
    return %arg0, %c0_i32 : i32, i32
  }
  func.func @transform_1(%arg0: i32) -> (i32, i32) {
    %c1_i32 = arith.constant 1 : i32
    %0 = arith.subi %c1_i32, %arg0 : i32
    %c0_i32 = arith.constant 0 : i32
    %c0_i32_0 = arith.constant 0 : i32
    return %0, %c0_i32 : i32, i32
  }
  func.func @transform_2(%arg0: i32) -> (i32, i32) {
    %c0_i32 = arith.constant 0 : i32
    %c0_i32_0 = arith.constant 0 : i32
    %c0_i32_1 = arith.constant 0 : i32
    return %c0_i32, %c0_i32_0 : i32, i32
  }
  func.func @transform_3(%arg0: i32) -> (i32, i32) {
    %c0_i32 = arith.constant 0 : i32
    %c0_i32_0 = arith.constant 0 : i32
    %c0_i32_1 = arith.constant 0 : i32
    return %c0_i32, %c0_i32_0 : i32, i32
  }
  func.func @transform_4(%arg0: i32) -> (i32, i32) {
    %c0_i32 = arith.constant 0 : i32
    %c0_i32_0 = arith.constant 0 : i32
    %c0_i32_1 = arith.constant 0 : i32
    return %c0_i32, %c0_i32_0 : i32, i32
  }
  func.func @transform_5(%arg0: i32) -> (i32, i32) {
    %c0_i32 = arith.constant 0 : i32
    %c0_i32_0 = arith.constant 0 : i32
    %c0_i32_1 = arith.constant 0 : i32
    return %c0_i32, %c0_i32_0 : i32, i32
  }
  func.func @transform_6(%arg0: i32) -> (i32, i32) {
    %c0_i32 = arith.constant 0 : i32
    %c0_i32_0 = arith.constant 0 : i32
    %c0_i32_1 = arith.constant 0 : i32
    return %c0_i32, %c0_i32_0 : i32, i32
  }
  func.func @transform_7(%arg0: i32) -> (i32, i32) {
    %c0_i32 = arith.constant 0 : i32
    %c0_i32_0 = arith.constant 0 : i32
    %c0_i32_1 = arith.constant 0 : i32
    return %c0_i32, %c0_i32_0 : i32, i32
  }
  func.func @transform_8(%arg0: i32) -> (i32, i32) {
    %c0_i32 = arith.constant 0 : i32
    %c0_i32_0 = arith.constant 0 : i32
    return %arg0, %c0_i32 : i32, i32
  }
  func.func @transform_9(%arg0: i32) -> (i32, i32) {
    %c1_i32 = arith.constant 1 : i32
    %0 = arith.subi %c1_i32, %arg0 : i32
    %c0_i32 = arith.constant 0 : i32
    %c0_i32_0 = arith.constant 0 : i32
    return %0, %c0_i32 : i32, i32
  }
  func.func @transform_10(%arg0: i32) -> (i32, i32, i32) {
    %c0_i32 = arith.constant 0 : i32
    %c0_i32_0 = arith.constant 0 : i32
    %c0_i32_1 = arith.constant 0 : i32
    %c0_i32_2 = arith.constant 0 : i32
    return %c0_i32, %c0_i32_0, %c0_i32_1 : i32, i32, i32
  }
  func.func @transform_11(%arg0: i32) -> (i32, i32, i32) {
    %c0_i32 = arith.constant 0 : i32
    %c0_i32_0 = arith.constant 0 : i32
    %c0_i32_1 = arith.constant 0 : i32
    %c0_i32_2 = arith.constant 0 : i32
    return %c0_i32, %c0_i32_0, %c0_i32_1 : i32, i32, i32
  }
}

module attributes {stable_mosaic.version = 11 : i64} {
  func.func @_bidi_lstm_layer_kernel(%arg0: i32, %arg1: memref<64x128xbf16, #tpu.memory_space<vmem>>, %arg2: memref<64x128xbf16, #tpu.memory_space<vmem>>, %arg3: memref<64x128xbf16, #tpu.memory_space<vmem>>, %arg4: memref<64x128xbf16, #tpu.memory_space<vmem>>, %arg5: memref<128x512xbf16, #tpu.memory_space<vmem>>, %arg6: memref<128x512xbf16, #tpu.memory_space<vmem>>, %arg7: memref<128x512xbf16, #tpu.memory_space<vmem>>, %arg8: memref<128x512xbf16, #tpu.memory_space<vmem>>, %arg9: memref<128x512xbf16, #tpu.memory_space<vmem>>, %arg10: memref<128x512xbf16, #tpu.memory_space<vmem>>, %arg11: memref<1x512xf32, #tpu.memory_space<vmem>>, %arg12: memref<1x512xf32, #tpu.memory_space<vmem>>, %arg13: memref<64x128xf32, #tpu.memory_space<vmem>>, %arg14: memref<64x128xf32, #tpu.memory_space<vmem>>, %arg15: memref<2x16x128xf32, #tpu.memory_space<vmem>>, %arg16: memref<2x16x128xf32, #tpu.memory_space<vmem>>, %arg17: memref<64x512xf32, #tpu.memory_space<vmem>>, %arg18: memref<64x512xf32, #tpu.memory_space<vmem>>, %arg19: memref<16x128xbf16, #tpu.memory_space<vmem>>, %arg20: memref<16x128xf32, #tpu.memory_space<vmem>>, %arg21: memref<16x128xbf16, #tpu.memory_space<vmem>>, %arg22: memref<16x128xf32, #tpu.memory_space<vmem>>) attributes {dimension_semantics = [#tpu.dimension_semantics<arbitrary>], iteration_bounds = array<i64: 2>, scalar_prefetch = 0 : i64, scratch_operands = 6 : i64, tpu.core_type = #tpu.core_type<tc>, window_params = [{transform_indices = @transform_0, window_bounds = array<i64: 64, 128>}, {transform_indices = @transform_1, window_bounds = array<i64: 64, 128>}, {transform_indices = @transform_2, window_bounds = array<i64: 64, 128>}, {transform_indices = @transform_3, window_bounds = array<i64: 64, 128>}, {pipeline_mode = #tpu.pipeline_mode<synchronous>, transform_indices = @transform_4, window_bounds = array<i64: 128, 512>}, {pipeline_mode = #tpu.pipeline_mode<synchronous>, transform_indices = @transform_5, window_bounds = array<i64: 128, 512>}, {pipeline_mode = #tpu.pipeline_mode<synchronous>, transform_indices = @transform_6, window_bounds = array<i64: 128, 512>}, {pipeline_mode = #tpu.pipeline_mode<synchronous>, transform_indices = @transform_7, window_bounds = array<i64: 128, 512>}, {pipeline_mode = #tpu.pipeline_mode<synchronous>, transform_indices = @transform_8, window_bounds = array<i64: 128, 512>}, {pipeline_mode = #tpu.pipeline_mode<synchronous>, transform_indices = @transform_9, window_bounds = array<i64: 128, 512>}, {pipeline_mode = #tpu.pipeline_mode<synchronous>, transform_indices = @transform_10, window_bounds = array<i64: 1, 512>}, {pipeline_mode = #tpu.pipeline_mode<synchronous>, transform_indices = @transform_11, window_bounds = array<i64: 1, 512>}, {transform_indices = @transform_12, window_bounds = array<i64: 64, 128>}, {transform_indices = @transform_13, window_bounds = array<i64: 64, 128>}, {pipeline_mode = #tpu.pipeline_mode<synchronous>, transform_indices = @transform_14, window_bounds = array<i64: 2, 16, 128>}, {pipeline_mode = #tpu.pipeline_mode<synchronous>, transform_indices = @transform_15, window_bounds = array<i64: 2, 16, 128>}]} {
    %c0_i32 = arith.constant 0 : i32
    %0 = arith.cmpi eq, %arg0, %c0_i32 : i32
    %1 = arith.extui %0 : i1 to i32
    %c0_i32_0 = arith.constant 0 : i32
    %2 = arith.cmpi ne, %1, %c0_i32_0 : i32
    scf.if %2 {
      %cst_31 = arith.constant 0.000000e+00 : bf16
      %29 = vector.broadcast %cst_31 : bf16 to vector<16x128xbf16>
      %c0_32 = arith.constant 0 : index
      %c0_33 = arith.constant 0 : index
      %30 = vector.load %arg19[%c0_32, %c0_33] : memref<16x128xbf16, #tpu.memory_space<vmem>>, vector<16x128xbf16>
      tpu.vector_store %arg19[%c0_32, %c0_33], %29 {strides = array<i32>} : memref<16x128xbf16, #tpu.memory_space<vmem>>, vector<16x128xbf16>,
      %cst_34 = arith.constant 0.000000e+00 : bf16
      %31 = vector.broadcast %cst_34 : bf16 to vector<16x128xbf16>
      %c0_35 = arith.constant 0 : index
      %c0_36 = arith.constant 0 : index
      %32 = vector.load %arg21[%c0_35, %c0_36] : memref<16x128xbf16, #tpu.memory_space<vmem>>, vector<16x128xbf16>
      tpu.vector_store %arg21[%c0_35, %c0_36], %31 {strides = array<i32>} : memref<16x128xbf16, #tpu.memory_space<vmem>>, vector<16x128xbf16>,
      %cst_37 = arith.constant 0.000000e+00 : f32
      %33 = vector.broadcast %cst_37 : f32 to vector<16x128xf32>
      %c0_38 = arith.constant 0 : index
      %c0_39 = arith.constant 0 : index
      %34 = vector.load %arg20[%c0_38, %c0_39] : memref<16x128xf32, #tpu.memory_space<vmem>>, vector<16x128xf32>
      tpu.vector_store %arg20[%c0_38, %c0_39], %33 {strides = array<i32>} : memref<16x128xf32, #tpu.memory_space<vmem>>, vector<16x128xf32>,
      %cst_40 = arith.constant 0.000000e+00 : f32
      %35 = vector.broadcast %cst_40 : f32 to vector<16x128xf32>
      %c0_41 = arith.constant 0 : index
      %c0_42 = arith.constant 0 : index
      %36 = vector.load %arg22[%c0_41, %c0_42] : memref<16x128xf32, #tpu.memory_space<vmem>>, vector<16x128xf32>
      tpu.vector_store %arg22[%c0_41, %c0_42], %35 {strides = array<i32>} : memref<16x128xf32, #tpu.memory_space<vmem>>, vector<16x128xf32>,
    } else {
    }
    %c0 = arith.constant 0 : index
    %c0_1 = arith.constant 0 : index
    %3 = vector.load %arg1[%c0, %c0_1] : memref<64x128xbf16, #tpu.memory_space<vmem>>, vector<64x128xbf16>
    %c0_2 = arith.constant 0 : index
    %c0_3 = arith.constant 0 : index
    %4 = vector.load %arg5[%c0_2, %c0_3] : memref<128x512xbf16, #tpu.memory_space<vmem>>, vector<128x512xbf16>
    %cst = arith.constant dense<0.000000e+00> : vector<64x512xf32>
    %5 = tpu.matmul %3, %4, %cst {dimension_numbers = #tpu.dot_dimension_numbers<[1], [0], [0], [1], [0, 0, 1, 1], [], []>} : vector<64x128xbf16>, vector<128x512xbf16>, vector<64x512xf32> -> vector<64x512xf32>
    %c0_4 = arith.constant 0 : index
    %c0_5 = arith.constant 0 : index
    %6 = vector.load %arg3[%c0_4, %c0_5] : memref<64x128xbf16, #tpu.memory_space<vmem>>, vector<64x128xbf16>
    %c0_6 = arith.constant 0 : index
    %c0_7 = arith.constant 0 : index
    %7 = vector.load %arg7[%c0_6, %c0_7] : memref<128x512xbf16, #tpu.memory_space<vmem>>, vector<128x512xbf16>
    %cst_8 = arith.constant dense<0.000000e+00> : vector<64x512xf32>
    %8 = tpu.matmul %6, %7, %cst_8 {dimension_numbers = #tpu.dot_dimension_numbers<[1], [0], [0], [1], [0, 0, 1, 1], [], []>} : vector<64x128xbf16>, vector<128x512xbf16>, vector<64x512xf32> -> vector<64x512xf32>
    %c0_9 = arith.constant 0 : index
    %c0_10 = arith.constant 0 : index
    %9 = vector.load %arg2[%c0_9, %c0_10] : memref<64x128xbf16, #tpu.memory_space<vmem>>, vector<64x128xbf16>
    %c0_11 = arith.constant 0 : index
    %c0_12 = arith.constant 0 : index
    %10 = vector.load %arg6[%c0_11, %c0_12] : memref<128x512xbf16, #tpu.memory_space<vmem>>, vector<128x512xbf16>
    %cst_13 = arith.constant dense<0.000000e+00> : vector<64x512xf32>
    %11 = tpu.matmul %9, %10, %cst_13 {dimension_numbers = #tpu.dot_dimension_numbers<[1], [0], [0], [1], [0, 0, 1, 1], [], []>} : vector<64x128xbf16>, vector<128x512xbf16>, vector<64x512xf32> -> vector<64x512xf32>
    %12 = arith.addf %5, %11 : vector<64x512xf32>
    %c0_14 = arith.constant 0 : index
    %c0_15 = arith.constant 0 : index
    %13 = vector.load %arg4[%c0_14, %c0_15] : memref<64x128xbf16, #tpu.memory_space<vmem>>, vector<64x128xbf16>
    %c0_16 = arith.constant 0 : index
    %c0_17 = arith.constant 0 : index
    %14 = vector.load %arg8[%c0_16, %c0_17] : memref<128x512xbf16, #tpu.memory_space<vmem>>, vector<128x512xbf16>
    %cst_18 = arith.constant dense<0.000000e+00> : vector<64x512xf32>
    %15 = tpu.matmul %13, %14, %cst_18 {dimension_numbers = #tpu.dot_dimension_numbers<[1], [0], [0], [1], [0, 0, 1, 1], [], []>} : vector<64x128xbf16>, vector<128x512xbf16>, vector<64x512xf32> -> vector<64x512xf32>
    %16 = arith.addf %8, %15 : vector<64x512xf32>
    %c0_19 = arith.constant 0 : index
    %c0_20 = arith.constant 0 : index
    %17 = vector.load %arg11[%c0_19, %c0_20] : memref<1x512xf32, #tpu.memory_space<vmem>>, vector<1x512xf32>
    %18 = vector.broadcast %17 : vector<1x512xf32> to vector<64x512xf32>
    %19 = arith.addf %12, %18 : vector<64x512xf32>
    %c0_21 = arith.constant 0 : index
    %c0_22 = arith.constant 0 : index
    %20 = vector.load %arg17[%c0_21, %c0_22] : memref<64x512xf32, #tpu.memory_space<vmem>>, vector<64x512xf32>
    tpu.vector_store %arg17[%c0_21, %c0_22], %19 {strides = array<i32>} : memref<64x512xf32, #tpu.memory_space<vmem>>, vector<64x512xf32>,
    %c0_23 = arith.constant 0 : index
    %c0_24 = arith.constant 0 : index
    %21 = vector.load %arg12[%c0_23, %c0_24] : memref<1x512xf32, #tpu.memory_space<vmem>>, vector<1x512xf32>
    %22 = vector.broadcast %21 : vector<1x512xf32> to vector<64x512xf32>
    %23 = arith.addf %16, %22 : vector<64x512xf32>
    %c0_25 = arith.constant 0 : index
    %c0_26 = arith.constant 0 : index
    %24 = vector.load %arg18[%c0_25, %c0_26] : memref<64x512xf32, #tpu.memory_space<vmem>>, vector<64x512xf32>
    tpu.vector_store %arg18[%c0_25, %c0_26], %23 {strides = array<i32>} : memref<64x512xf32, #tpu.memory_space<vmem>>, vector<64x512xf32>,
    %c0_i32_27 = arith.constant 0 : i32
    %c2_i32 = arith.constant 2 : i32
    %25 = arith.addi %c0_i32_27, %c2_i32 : i32
    %c1_i32 = arith.constant 1 : i32
    scf.for %arg23 = %c0_i32_27 to %25 step %c1_i32  : i32 {
      %c2_i32_31 = arith.constant 2 : i32
      %29 = arith.muli %arg23, %c2_i32_31 : i32
      %c16_i32 = arith.constant 16 : i32
      %30 = arith.muli %29, %c16_i32 : i32
      %31 = tpu.assume_multiple %30, 16 : i32
      %c3_i32 = arith.constant 3 : i32
      %32 = arith.subi %c3_i32, %29 : i32
      %c16_i32_32 = arith.constant 16 : i32
      %33 = arith.muli %32, %c16_i32_32 : i32
      %34 = tpu.assume_multiple %33, 16 : i32
      %c0_33 = arith.constant 0 : index
      %c0_34 = arith.constant 0 : index
      %35 = vector.load %arg19[%c0_33, %c0_34] : memref<16x128xbf16, #tpu.memory_space<vmem>>, vector<16x128xbf16>
      %c0_35 = arith.constant 0 : index
      %c0_36 = arith.constant 0 : index
      %36 = vector.load %arg9[%c0_35, %c0_36] : memref<128x512xbf16, #tpu.memory_space<vmem>>, vector<128x512xbf16>
      %cst_37 = arith.constant dense<0.000000e+00> : vector<16x512xf32>
      %37 = tpu.matmul %35, %36, %cst_37 {dimension_numbers = #tpu.dot_dimension_numbers<[1], [0], [0], [1], [0, 0, 1, 1], [], []>} : vector<16x128xbf16>, vector<128x512xbf16>, vector<16x512xf32> -> vector<16x512xf32>
      %c0_38 = arith.constant 0 : index
      %c0_39 = arith.constant 0 : index
      %38 = vector.load %arg21[%c0_38, %c0_39] : memref<16x128xbf16, #tpu.memory_space<vmem>>, vector<16x128xbf16>
      %c0_40 = arith.constant 0 : index
      %c0_41 = arith.constant 0 : index
      %39 = vector.load %arg10[%c0_40, %c0_41] : memref<128x512xbf16, #tpu.memory_space<vmem>>, vector<128x512xbf16>
      %cst_42 = arith.constant dense<0.000000e+00> : vector<16x512xf32>
      %40 = tpu.matmul %38, %39, %cst_42 {dimension_numbers = #tpu.dot_dimension_numbers<[1], [0], [0], [1], [0, 0, 1, 1], [], []>} : vector<16x128xbf16>, vector<128x512xbf16>, vector<16x512xf32> -> vector<16x512xf32>
      %41 = arith.index_cast %31 : i32 to index
      %c0_43 = arith.constant 0 : index
      %42 = vector.load %arg17[%41, %c0_43] : memref<64x512xf32, #tpu.memory_space<vmem>>, vector<16x512xf32>
      %43 = arith.addf %42, %37 : vector<16x512xf32>
      %44 = arith.index_cast %34 : i32 to index
      %c0_44 = arith.constant 0 : index
      %45 = vector.load %arg18[%44, %c0_44] : memref<64x512xf32, #tpu.memory_space<vmem>>, vector<16x512xf32>
      %46 = arith.addf %45, %40 : vector<16x512xf32>
      %47 = vector.extract_strided_slice %43 {offsets = [0, 0], sizes = [16, 128], strides = [1, 1]} : vector<16x512xf32> to vector<16x128xf32>
      %48 = arith.negf %47 : vector<16x128xf32>
      %49 = math.exp %48 : vector<16x128xf32>
      %cst_45 = arith.constant 1.000000e+00 : f32
      %50 = vector.broadcast %cst_45 : f32 to vector<16x128xf32>
      %51 = arith.addf %50, %49 : vector<16x128xf32>
      %52 = arith.divf %50, %51 : vector<16x128xf32>
      %53 = vector.extract_strided_slice %43 {offsets = [0, 128], sizes = [16, 128], strides = [1, 1]} : vector<16x512xf32> to vector<16x128xf32>
      %54 = arith.negf %53 : vector<16x128xf32>
      %55 = math.exp %54 : vector<16x128xf32>
      %cst_46 = arith.constant 1.000000e+00 : f32
      %56 = vector.broadcast %cst_46 : f32 to vector<16x128xf32>
      %57 = arith.addf %56, %55 : vector<16x128xf32>
      %58 = arith.divf %56, %57 : vector<16x128xf32>
      %59 = vector.extract_strided_slice %43 {offsets = [0, 256], sizes = [16, 128], strides = [1, 1]} : vector<16x512xf32> to vector<16x128xf32>
      %60 = math.tanh %59 : vector<16x128xf32>
      %61 = vector.extract_strided_slice %43 {offsets = [0, 384], sizes = [16, 128], strides = [1, 1]} : vector<16x512xf32> to vector<16x128xf32>
      %62 = arith.negf %61 : vector<16x128xf32>
      %63 = math.exp %62 : vector<16x128xf32>
      %cst_47 = arith.constant 1.000000e+00 : f32
      %64 = vector.broadcast %cst_47 : f32 to vector<16x128xf32>
      %65 = arith.addf %64, %63 : vector<16x128xf32>
      %66 = arith.divf %64, %65 : vector<16x128xf32>
      %c0_48 = arith.constant 0 : index
      %c0_49 = arith.constant 0 : index
      %67 = vector.load %arg20[%c0_48, %c0_49] : memref<16x128xf32, #tpu.memory_space<vmem>>, vector<16x128xf32>
      %68 = arith.mulf %58, %67 : vector<16x128xf32>
      %69 = arith.mulf %52, %60 : vector<16x128xf32>
      %70 = arith.addf %68, %69 : vector<16x128xf32>
      %71 = math.tanh %70 : vector<16x128xf32>
      %72 = arith.mulf %66, %71 : vector<16x128xf32>
      %73 = vector.extract_strided_slice %46 {offsets = [0, 0], sizes = [16, 128], strides = [1, 1]} : vector<16x512xf32> to vector<16x128xf32>
      %74 = arith.negf %73 : vector<16x128xf32>
      %75 = math.exp %74 : vector<16x128xf32>
      %cst_50 = arith.constant 1.000000e+00 : f32
      %76 = vector.broadcast %cst_50 : f32 to vector<16x128xf32>
      %77 = arith.addf %76, %75 : vector<16x128xf32>
      %78 = arith.divf %76, %77 : vector<16x128xf32>
      %79 = vector.extract_strided_slice %46 {offsets = [0, 128], sizes = [16, 128], strides = [1, 1]} : vector<16x512xf32> to vector<16x128xf32>
      %80 = arith.negf %79 : vector<16x128xf32>
      %81 = math.exp %80 : vector<16x128xf32>
      %cst_51 = arith.constant 1.000000e+00 : f32
      %82 = vector.broadcast %cst_51 : f32 to vector<16x128xf32>
      %83 = arith.addf %82, %81 : vector<16x128xf32>
      %84 = arith.divf %82, %83 : vector<16x128xf32>
      %85 = vector.extract_strided_slice %46 {offsets = [0, 256], sizes = [16, 128], strides = [1, 1]} : vector<16x512xf32> to vector<16x128xf32>
      %86 = math.tanh %85 : vector<16x128xf32>
      %87 = vector.extract_strided_slice %46 {offsets = [0, 384], sizes = [16, 128], strides = [1, 1]} : vector<16x512xf32> to vector<16x128xf32>
      %88 = arith.negf %87 : vector<16x128xf32>
      %89 = math.exp %88 : vector<16x128xf32>
      %cst_52 = arith.constant 1.000000e+00 : f32
      %90 = vector.broadcast %cst_52 : f32 to vector<16x128xf32>
      %91 = arith.addf %90, %89 : vector<16x128xf32>
      %92 = arith.divf %90, %91 : vector<16x128xf32>
      %c0_53 = arith.constant 0 : index
      %c0_54 = arith.constant 0 : index
      %93 = vector.load %arg22[%c0_53, %c0_54] : memref<16x128xf32, #tpu.memory_space<vmem>>, vector<16x128xf32>
      %94 = arith.mulf %84, %93 : vector<16x128xf32>
      %95 = arith.mulf %78, %86 : vector<16x128xf32>
      %96 = arith.addf %94, %95 : vector<16x128xf32>
      %97 = math.tanh %96 : vector<16x128xf32>
      %98 = arith.mulf %92, %97 : vector<16x128xf32>
      %c0_55 = arith.constant 0 : index
      %c0_56 = arith.constant 0 : index
      %99 = vector.load %arg20[%c0_55, %c0_56] : memref<16x128xf32, #tpu.memory_space<vmem>>, vector<16x128xf32>
      tpu.vector_store %arg20[%c0_55, %c0_56], %70 {strides = array<i32>} : memref<16x128xf32, #tpu.memory_space<vmem>>, vector<16x128xf32>,
      %c0_57 = arith.constant 0 : index
      %c0_58 = arith.constant 0 : index
      %100 = vector.load %arg22[%c0_57, %c0_58] : memref<16x128xf32, #tpu.memory_space<vmem>>, vector<16x128xf32>
      tpu.vector_store %arg22[%c0_57, %c0_58], %96 {strides = array<i32>} : memref<16x128xf32, #tpu.memory_space<vmem>>, vector<16x128xf32>,
      %101 = arith.truncf %72 : vector<16x128xf32> to vector<16x128xbf16>
      %c0_59 = arith.constant 0 : index
      %c0_60 = arith.constant 0 : index
      %102 = vector.load %arg19[%c0_59, %c0_60] : memref<16x128xbf16, #tpu.memory_space<vmem>>, vector<16x128xbf16>
      tpu.vector_store %arg19[%c0_59, %c0_60], %101 {strides = array<i32>} : memref<16x128xbf16, #tpu.memory_space<vmem>>, vector<16x128xbf16>,
      %103 = arith.truncf %98 : vector<16x128xf32> to vector<16x128xbf16>
      %c0_61 = arith.constant 0 : index
      %c0_62 = arith.constant 0 : index
      %104 = vector.load %arg21[%c0_61, %c0_62] : memref<16x128xbf16, #tpu.memory_space<vmem>>, vector<16x128xbf16>
      tpu.vector_store %arg21[%c0_61, %c0_62], %103 {strides = array<i32>} : memref<16x128xbf16, #tpu.memory_space<vmem>>, vector<16x128xbf16>,
      %105 = arith.index_cast %31 : i32 to index
      %c0_63 = arith.constant 0 : index
      %106 = vector.load %arg13[%105, %c0_63] : memref<64x128xf32, #tpu.memory_space<vmem>>, vector<16x128xf32>
      tpu.vector_store %arg13[%105, %c0_63], %72 {strides = array<i32>} : memref<64x128xf32, #tpu.memory_space<vmem>>, vector<16x128xf32>,
      %107 = arith.index_cast %34 : i32 to index
      %c0_64 = arith.constant 0 : index
      %108 = vector.load %arg14[%107, %c0_64] : memref<64x128xf32, #tpu.memory_space<vmem>>, vector<16x128xf32>
      tpu.vector_store %arg14[%107, %c0_64], %98 {strides = array<i32>} : memref<64x128xf32, #tpu.memory_space<vmem>>, vector<16x128xf32>,
      %c1_i32_65 = arith.constant 1 : i32
      %109 = arith.addi %29, %c1_i32_65 : i32
      %c16_i32_66 = arith.constant 16 : i32
      %110 = arith.muli %109, %c16_i32_66 : i32
      %111 = tpu.assume_multiple %110, 16 : i32
      %c3_i32_67 = arith.constant 3 : i32
      %112 = arith.subi %c3_i32_67, %109 : i32
      %c16_i32_68 = arith.constant 16 : i32
      %113 = arith.muli %112, %c16_i32_68 : i32
      %114 = tpu.assume_multiple %113, 16 : i32
      %c0_69 = arith.constant 0 : index
      %c0_70 = arith.constant 0 : index
      %115 = vector.load %arg19[%c0_69, %c0_70] : memref<16x128xbf16, #tpu.memory_space<vmem>>, vector<16x128xbf16>
      %c0_71 = arith.constant 0 : index
      %c0_72 = arith.constant 0 : index
      %116 = vector.load %arg9[%c0_71, %c0_72] : memref<128x512xbf16, #tpu.memory_space<vmem>>, vector<128x512xbf16>
      %cst_73 = arith.constant dense<0.000000e+00> : vector<16x512xf32>
      %117 = tpu.matmul %115, %116, %cst_73 {dimension_numbers = #tpu.dot_dimension_numbers<[1], [0], [0], [1], [0, 0, 1, 1], [], []>} : vector<16x128xbf16>, vector<128x512xbf16>, vector<16x512xf32> -> vector<16x512xf32>
      %c0_74 = arith.constant 0 : index
      %c0_75 = arith.constant 0 : index
      %118 = vector.load %arg21[%c0_74, %c0_75] : memref<16x128xbf16, #tpu.memory_space<vmem>>, vector<16x128xbf16>
      %c0_76 = arith.constant 0 : index
      %c0_77 = arith.constant 0 : index
      %119 = vector.load %arg10[%c0_76, %c0_77] : memref<128x512xbf16, #tpu.memory_space<vmem>>, vector<128x512xbf16>
      %cst_78 = arith.constant dense<0.000000e+00> : vector<16x512xf32>
      %120 = tpu.matmul %118, %119, %cst_78 {dimension_numbers = #tpu.dot_dimension_numbers<[1], [0], [0], [1], [0, 0, 1, 1], [], []>} : vector<16x128xbf16>, vector<128x512xbf16>, vector<16x512xf32> -> vector<16x512xf32>
      %121 = arith.index_cast %111 : i32 to index
      %c0_79 = arith.constant 0 : index
      %122 = vector.load %arg17[%121, %c0_79] : memref<64x512xf32, #tpu.memory_space<vmem>>, vector<16x512xf32>
      %123 = arith.addf %122, %117 : vector<16x512xf32>
      %124 = arith.index_cast %114 : i32 to index
      %c0_80 = arith.constant 0 : index
      %125 = vector.load %arg18[%124, %c0_80] : memref<64x512xf32, #tpu.memory_space<vmem>>, vector<16x512xf32>
      %126 = arith.addf %125, %120 : vector<16x512xf32>
      %127 = vector.extract_strided_slice %123 {offsets = [0, 0], sizes = [16, 128], strides = [1, 1]} : vector<16x512xf32> to vector<16x128xf32>
      %128 = arith.negf %127 : vector<16x128xf32>
      %129 = math.exp %128 : vector<16x128xf32>
      %cst_81 = arith.constant 1.000000e+00 : f32
      %130 = vector.broadcast %cst_81 : f32 to vector<16x128xf32>
      %131 = arith.addf %130, %129 : vector<16x128xf32>
      %132 = arith.divf %130, %131 : vector<16x128xf32>
      %133 = vector.extract_strided_slice %123 {offsets = [0, 128], sizes = [16, 128], strides = [1, 1]} : vector<16x512xf32> to vector<16x128xf32>
      %134 = arith.negf %133 : vector<16x128xf32>
      %135 = math.exp %134 : vector<16x128xf32>
      %cst_82 = arith.constant 1.000000e+00 : f32
      %136 = vector.broadcast %cst_82 : f32 to vector<16x128xf32>
      %137 = arith.addf %136, %135 : vector<16x128xf32>
      %138 = arith.divf %136, %137 : vector<16x128xf32>
      %139 = vector.extract_strided_slice %123 {offsets = [0, 256], sizes = [16, 128], strides = [1, 1]} : vector<16x512xf32> to vector<16x128xf32>
      %140 = math.tanh %139 : vector<16x128xf32>
      %141 = vector.extract_strided_slice %123 {offsets = [0, 384], sizes = [16, 128], strides = [1, 1]} : vector<16x512xf32> to vector<16x128xf32>
      %142 = arith.negf %141 : vector<16x128xf32>
      %143 = math.exp %142 : vector<16x128xf32>
      %cst_83 = arith.constant 1.000000e+00 : f32
      %144 = vector.broadcast %cst_83 : f32 to vector<16x128xf32>
      %145 = arith.addf %144, %143 : vector<16x128xf32>
      %146 = arith.divf %144, %145 : vector<16x128xf32>
      %c0_84 = arith.constant 0 : index
      %c0_85 = arith.constant 0 : index
      %147 = vector.load %arg20[%c0_84, %c0_85] : memref<16x128xf32, #tpu.memory_space<vmem>>, vector<16x128xf32>
      %148 = arith.mulf %138, %147 : vector<16x128xf32>
      %149 = arith.mulf %132, %140 : vector<16x128xf32>
      %150 = arith.addf %148, %149 : vector<16x128xf32>
      %151 = math.tanh %150 : vector<16x128xf32>
      %152 = arith.mulf %146, %151 : vector<16x128xf32>
      %153 = vector.extract_strided_slice %126 {offsets = [0, 0], sizes = [16, 128], strides = [1, 1]} : vector<16x512xf32> to vector<16x128xf32>
      %154 = arith.negf %153 : vector<16x128xf32>
      %155 = math.exp %154 : vector<16x128xf32>
      %cst_86 = arith.constant 1.000000e+00 : f32
      %156 = vector.broadcast %cst_86 : f32 to vector<16x128xf32>
      %157 = arith.addf %156, %155 : vector<16x128xf32>
      %158 = arith.divf %156, %157 : vector<16x128xf32>
      %159 = vector.extract_strided_slice %126 {offsets = [0, 128], sizes = [16, 128], strides = [1, 1]} : vector<16x512xf32> to vector<16x128xf32>
      %160 = arith.negf %159 : vector<16x128xf32>
      %161 = math.exp %160 : vector<16x128xf32>
      %cst_87 = arith.constant 1.000000e+00 : f32
      %162 = vector.broadcast %cst_87 : f32 to vector<16x128xf32>
      %163 = arith.addf %162, %161 : vector<16x128xf32>
      %164 = arith.divf %162, %163 : vector<16x128xf32>
      %165 = vector.extract_strided_slice %126 {offsets = [0, 256], sizes = [16, 128], strides = [1, 1]} : vector<16x512xf32> to vector<16x128xf32>
      %166 = math.tanh %165 : vector<16x128xf32>
      %167 = vector.extract_strided_slice %126 {offsets = [0, 384], sizes = [16, 128], strides = [1, 1]} : vector<16x512xf32> to vector<16x128xf32>
      %168 = arith.negf %167 : vector<16x128xf32>
      %169 = math.exp %168 : vector<16x128xf32>
      %cst_88 = arith.constant 1.000000e+00 : f32
      %170 = vector.broadcast %cst_88 : f32 to vector<16x128xf32>
      %171 = arith.addf %170, %169 : vector<16x128xf32>
      %172 = arith.divf %170, %171 : vector<16x128xf32>
      %c0_89 = arith.constant 0 : index
      %c0_90 = arith.constant 0 : index
      %173 = vector.load %arg22[%c0_89, %c0_90] : memref<16x128xf32, #tpu.memory_space<vmem>>, vector<16x128xf32>
      %174 = arith.mulf %164, %173 : vector<16x128xf32>
      %175 = arith.mulf %158, %166 : vector<16x128xf32>
      %176 = arith.addf %174, %175 : vector<16x128xf32>
      %177 = math.tanh %176 : vector<16x128xf32>
      %178 = arith.mulf %172, %177 : vector<16x128xf32>
      %c0_91 = arith.constant 0 : index
      %c0_92 = arith.constant 0 : index
      %179 = vector.load %arg20[%c0_91, %c0_92] : memref<16x128xf32, #tpu.memory_space<vmem>>, vector<16x128xf32>
      tpu.vector_store %arg20[%c0_91, %c0_92], %150 {strides = array<i32>} : memref<16x128xf32, #tpu.memory_space<vmem>>, vector<16x128xf32>,
      %c0_93 = arith.constant 0 : index
      %c0_94 = arith.constant 0 : index
      %180 = vector.load %arg22[%c0_93, %c0_94] : memref<16x128xf32, #tpu.memory_space<vmem>>, vector<16x128xf32>
      tpu.vector_store %arg22[%c0_93, %c0_94], %176 {strides = array<i32>} : memref<16x128xf32, #tpu.memory_space<vmem>>, vector<16x128xf32>,
      %181 = arith.truncf %152 : vector<16x128xf32> to vector<16x128xbf16>
      %c0_95 = arith.constant 0 : index
      %c0_96 = arith.constant 0 : index
      %182 = vector.load %arg19[%c0_95, %c0_96] : memref<16x128xbf16, #tpu.memory_space<vmem>>, vector<16x128xbf16>
      tpu.vector_store %arg19[%c0_95, %c0_96], %181 {strides = array<i32>} : memref<16x128xbf16, #tpu.memory_space<vmem>>, vector<16x128xbf16>,
      %183 = arith.truncf %178 : vector<16x128xf32> to vector<16x128xbf16>
      %c0_97 = arith.constant 0 : index
      %c0_98 = arith.constant 0 : index
      %184 = vector.load %arg21[%c0_97, %c0_98] : memref<16x128xbf16, #tpu.memory_space<vmem>>, vector<16x128xbf16>
      tpu.vector_store %arg21[%c0_97, %c0_98], %183 {strides = array<i32>} : memref<16x128xbf16, #tpu.memory_space<vmem>>, vector<16x128xbf16>,
      %185 = arith.index_cast %111 : i32 to index
      %c0_99 = arith.constant 0 : index
      %186 = vector.load %arg13[%185, %c0_99] : memref<64x128xf32, #tpu.memory_space<vmem>>, vector<16x128xf32>
      tpu.vector_store %arg13[%185, %c0_99], %152 {strides = array<i32>} : memref<64x128xf32, #tpu.memory_space<vmem>>, vector<16x128xf32>,
      %187 = arith.index_cast %114 : i32 to index
      %c0_100 = arith.constant 0 : index
      %188 = vector.load %arg14[%187, %c0_100] : memref<64x128xf32, #tpu.memory_space<vmem>>, vector<16x128xf32>
      tpu.vector_store %arg14[%187, %c0_100], %178 {strides = array<i32>} : memref<64x128xf32, #tpu.memory_space<vmem>>, vector<16x128xf32>,
    }
    %c2_i32_28 = arith.constant 2 : i32
    %c1_i32_29 = arith.constant 1 : i32
    %26 = arith.cmpi eq, %arg0, %c1_i32_29 : i32
    %27 = arith.extui %26 : i1 to i32
    %c0_i32_30 = arith.constant 0 : i32
    %28 = arith.cmpi ne, %27, %c0_i32_30 : i32
    scf.if %28 {
      %c0_31 = arith.constant 0 : index
      %c0_32 = arith.constant 0 : index
      %29 = vector.load %arg19[%c0_31, %c0_32] : memref<16x128xbf16, #tpu.memory_space<vmem>>, vector<16x128xbf16>
      %30 = arith.extf %29 : vector<16x128xbf16> to vector<16x128xf32>
      %c0_33 = arith.constant 0 : index
      %c0_34 = arith.constant 0 : index
      %c0_35 = arith.constant 0 : index
      %31 = vector.load %arg15[%c0_33, %c0_34, %c0_35] : memref<2x16x128xf32, #tpu.memory_space<vmem>>, vector<1x16x128xf32>
      %32 = vector.shape_cast %31 : vector<1x16x128xf32> to vector<16x128xf32>
      %33 = vector.shape_cast %30 : vector<16x128xf32> to vector<1x16x128xf32>
      tpu.vector_store %arg15[%c0_33, %c0_34, %c0_35], %33 {strides = array<i32>} : memref<2x16x128xf32, #tpu.memory_space<vmem>>, vector<1x16x128xf32>,
      %c0_36 = arith.constant 0 : index
      %c0_37 = arith.constant 0 : index
      %34 = vector.load %arg21[%c0_36, %c0_37] : memref<16x128xbf16, #tpu.memory_space<vmem>>, vector<16x128xbf16>
      %35 = arith.extf %34 : vector<16x128xbf16> to vector<16x128xf32>
      %c1 = arith.constant 1 : index
      %c0_38 = arith.constant 0 : index
      %c0_39 = arith.constant 0 : index
      %36 = vector.load %arg15[%c1, %c0_38, %c0_39] : memref<2x16x128xf32, #tpu.memory_space<vmem>>, vector<1x16x128xf32>
      %37 = vector.shape_cast %36 : vector<1x16x128xf32> to vector<16x128xf32>
      %38 = vector.shape_cast %35 : vector<16x128xf32> to vector<1x16x128xf32>
      tpu.vector_store %arg15[%c1, %c0_38, %c0_39], %38 {strides = array<i32>} : memref<2x16x128xf32, #tpu.memory_space<vmem>>, vector<1x16x128xf32>,
      %c0_40 = arith.constant 0 : index
      %c0_41 = arith.constant 0 : index
      %39 = vector.load %arg20[%c0_40, %c0_41] : memref<16x128xf32, #tpu.memory_space<vmem>>, vector<16x128xf32>
      %c0_42 = arith.constant 0 : index
      %c0_43 = arith.constant 0 : index
      %c0_44 = arith.constant 0 : index
      %40 = vector.load %arg16[%c0_42, %c0_43, %c0_44] : memref<2x16x128xf32, #tpu.memory_space<vmem>>, vector<1x16x128xf32>
      %41 = vector.shape_cast %40 : vector<1x16x128xf32> to vector<16x128xf32>
      %42 = vector.shape_cast %39 : vector<16x128xf32> to vector<1x16x128xf32>
      tpu.vector_store %arg16[%c0_42, %c0_43, %c0_44], %42 {strides = array<i32>} : memref<2x16x128xf32, #tpu.memory_space<vmem>>, vector<1x16x128xf32>,
      %c0_45 = arith.constant 0 : index
      %c0_46 = arith.constant 0 : index
      %43 = vector.load %arg22[%c0_45, %c0_46] : memref<16x128xf32, #tpu.memory_space<vmem>>, vector<16x128xf32>
      %c1_47 = arith.constant 1 : index
      %c0_48 = arith.constant 0 : index
      %c0_49 = arith.constant 0 : index
      %44 = vector.load %arg16[%c1_47, %c0_48, %c0_49] : memref<2x16x128xf32, #tpu.memory_space<vmem>>, vector<1x16x128xf32>
      %45 = vector.shape_cast %44 : vector<1x16x128xf32> to vector<16x128xf32>
      %46 = vector.shape_cast %43 : vector<16x128xf32> to vector<1x16x128xf32>
      tpu.vector_store %arg16[%c1_47, %c0_48, %c0_49], %46 {strides = array<i32>} : memref<2x16x128xf32, #tpu.memory_space<vmem>>, vector<1x16x128xf32>,
    } else {
    }
    return
  }
  func.func @transform_0(%arg0: i32) -> (i32, i32) {
    %c0_i32 = arith.constant 0 : i32
    %c0_i32_0 = arith.constant 0 : i32
    return %arg0, %c0_i32 : i32, i32
  }
  func.func @transform_1(%arg0: i32) -> (i32, i32) {
    %c0_i32 = arith.constant 0 : i32
    %c0_i32_0 = arith.constant 0 : i32
    return %arg0, %c0_i32 : i32, i32
  }
  func.func @transform_2(%arg0: i32) -> (i32, i32) {
    %c1_i32 = arith.constant 1 : i32
    %0 = arith.subi %c1_i32, %arg0 : i32
    %c0_i32 = arith.constant 0 : i32
    %c0_i32_0 = arith.constant 0 : i32
    return %0, %c0_i32 : i32, i32
  }
  func.func @transform_3(%arg0: i32) -> (i32, i32) {
    %c1_i32 = arith.constant 1 : i32
    %0 = arith.subi %c1_i32, %arg0 : i32
    %c0_i32 = arith.constant 0 : i32
    %c0_i32_0 = arith.constant 0 : i32
    return %0, %c0_i32 : i32, i32
  }
  func.func @transform_4(%arg0: i32) -> (i32, i32) {
    %c0_i32 = arith.constant 0 : i32
    %c0_i32_0 = arith.constant 0 : i32
    %c0_i32_1 = arith.constant 0 : i32
    return %c0_i32, %c0_i32_0 : i32, i32
  }
  func.func @transform_5(%arg0: i32) -> (i32, i32) {
    %c0_i32 = arith.constant 0 : i32
    %c0_i32_0 = arith.constant 0 : i32
    %c0_i32_1 = arith.constant 0 : i32
    return %c0_i32, %c0_i32_0 : i32, i32
  }
  func.func @transform_6(%arg0: i32) -> (i32, i32) {
    %c0_i32 = arith.constant 0 : i32
    %c0_i32_0 = arith.constant 0 : i32
    %c0_i32_1 = arith.constant 0 : i32
    return %c0_i32, %c0_i32_0 : i32, i32
  }
  func.func @transform_7(%arg0: i32) -> (i32, i32) {
    %c0_i32 = arith.constant 0 : i32
    %c0_i32_0 = arith.constant 0 : i32
    %c0_i32_1 = arith.constant 0 : i32
    return %c0_i32, %c0_i32_0 : i32, i32
  }
  func.func @transform_8(%arg0: i32) -> (i32, i32) {
    %c0_i32 = arith.constant 0 : i32
    %c0_i32_0 = arith.constant 0 : i32
    %c0_i32_1 = arith.constant 0 : i32
    return %c0_i32, %c0_i32_0 : i32, i32
  }
  func.func @transform_9(%arg0: i32) -> (i32, i32) {
    %c0_i32 = arith.constant 0 : i32
    %c0_i32_0 = arith.constant 0 : i32
    %c0_i32_1 = arith.constant 0 : i32
    return %c0_i32, %c0_i32_0 : i32, i32
  }
  func.func @transform_10(%arg0: i32) -> (i32, i32) {
    %c0_i32 = arith.constant 0 : i32
    %c0_i32_0 = arith.constant 0 : i32
    %c0_i32_1 = arith.constant 0 : i32
    return %c0_i32, %c0_i32_0 : i32, i32
  }
  func.func @transform_11(%arg0: i32) -> (i32, i32) {
    %c0_i32 = arith.constant 0 : i32
    %c0_i32_0 = arith.constant 0 : i32
    %c0_i32_1 = arith.constant 0 : i32
    return %c0_i32, %c0_i32_0 : i32, i32
  }
  func.func @transform_12(%arg0: i32) -> (i32, i32) {
    %c0_i32 = arith.constant 0 : i32
    %c0_i32_0 = arith.constant 0 : i32
    return %arg0, %c0_i32 : i32, i32
  }
  func.func @transform_13(%arg0: i32) -> (i32, i32) {
    %c1_i32 = arith.constant 1 : i32
    %0 = arith.subi %c1_i32, %arg0 : i32
    %c0_i32 = arith.constant 0 : i32
    %c0_i32_0 = arith.constant 0 : i32
    return %0, %c0_i32 : i32, i32
  }
  func.func @transform_14(%arg0: i32) -> (i32, i32, i32) {
    %c0_i32 = arith.constant 0 : i32
    %c0_i32_0 = arith.constant 0 : i32
    %c0_i32_1 = arith.constant 0 : i32
    %c0_i32_2 = arith.constant 0 : i32
    return %c0_i32, %c0_i32_0, %c0_i32_1 : i32, i32, i32
  }
  func.func @transform_15(%arg0: i32) -> (i32, i32, i32) {
    %c0_i32 = arith.constant 0 : i32
    %c0_i32_0 = arith.constant 0 : i32
    %c0_i32_1 = arith.constant 0 : i32
    %c0_i32_2 = arith.constant 0 : i32
    return %c0_i32, %c0_i32_0, %c0_i32_1 : i32, i32, i32
  }
}

</mosaic_0001>

<bundles_post_ra>
// kernel: _bidi_lstm_forward.3
= control target key start
LH: loop header
LB: loop body
LE: loop exit
PB: predicated region body
PF: predicated region fallthrough
CT: control target
= control target key end

     0   :  { %s6032_s0 = inlined_call_operand.vmem [shape: bf16[128,128], index: 0, kind: input, shape index: {}, may-alias: {0,2}]   ;;  %s6033_s1 = inlined_call_operand.vmem [shape: bf16[128,128], index: 1, kind: input, shape index: {}, may-alias: {1,3}]   ;;  %s6034_s2 = inlined_call_operand.vmem [shape: bf16[128,128], index: 2, kind: input, shape index: {}, may-alias: {0,2}]   ;;  %s6035_s3 = inlined_call_operand.vmem [shape: bf16[128,128], index: 3, kind: input, shape index: {}, may-alias: {1,3}]   ;;  %s6036_s4 = inlined_call_operand.vmem [shape: bf16[128,512], index: 4, kind: input, shape index: {}]   ;;  %s6037_s5 = inlined_call_operand.vmem [shape: bf16[128,512], index: 5, kind: input, shape index: {}]   ;;  %s6038_s6 = inlined_call_operand.vmem [shape: bf16[128,512], index: 6, kind: input, shape index: {}]   ;;  %s6039_s7 = inlined_call_operand.hbm [shape: bf16[128,512], index: 7, kind: input, shape index: {}]   ;;  %s6040_s8 = inlined_call_operand.hbm [shape: bf16[128,512], index: 8, kind: input, shape index: {}]   ;;  %s6041_s9 = inlined_call_operand.hbm [shape: bf16[128,512], index: 9, kind: input, shape index: {}]   ;;  %s6042_s10 = inlined_call_operand.vmem [shape: f32[1,512], index: 10, kind: input, shape index: {}]   ;;  %s6043_s11 = inlined_call_operand.vmem [shape: f32[1,512], index: 11, kind: input, shape index: {}]   ;;  %s6044_s12 = inlined_call_operand.vmem [shape: f32[128,128], index: 12, kind: output, shape index: {0}]   ;;  %s6045_s13 = inlined_call_operand.vmem [shape: f32[128,128], index: 13, kind: output, shape index: {1}]   ;;  %s6046_s14 = inlined_call_operand.vmem [shape: f32[2,16,128], index: 14, kind: output, shape index: {2}]   ;;  %s6047_s15 = inlined_call_operand.vmem [shape: f32[2,16,128], index: 15, kind: output, shape index: {3}]  }
   0x1   :  { %6057 = sst [smem:[#allocation18_spill]] %s6032_s0 }
   0x2   :  { %6058 = sst [smem:[#allocation19_spill]] %s6043_s11 }
   0x3   :  { %6059 = sst [smem:[#allocation20_spill]] %s6046_s14 }
   0x4   :  { %6060 = sst [smem:[#allocation21_spill]] %s6047_s15 }
   0x5   :  { %21 = vsyncpa [#allocation9], 0 }
   0x6   :  { %22 = vsyncpa [#allocation11], 0  ;;  %s5057_s18 = smov 0  }
   0x7 LB: > { %6061 = sst [smem:[#allocation15_spill]] %s4962_s18  ;;  %s5063_s19 = sadd.s32 4294967295, %s4962_s18   ;;  %s4962_s18 = sphi %s5057_s18, %s28_s18  }
   0x8   : > { %p3961_p0 = scmp.ge.s32.totalorder %s4962_s18, 1  ;;  %p405_p1 = scmp.lt.s32.totalorder %s4962_s18, 3 }
   0x9   : > { %p6048_p3 = scmp.eq.s32.totalorder %s5063_s19, 0  ;;  %s4968_s21 = smov [#allocation10]  }
   0xa   : > { %p5069_p4 = pnand %p3961_p0, %p405_p1  ;;  %s439_s22 = sshll.u32 %s4968_s21, 4  ;;  %s440_s22 = int_to_ptr.vmem [resolvable:$true] %s439_s22 }
   0xb   : > { %s4969_s23 = smov [#allocation8]   ;;  %s4970_s26 = smov [#allocation12]  }
   0xc   : > { %s6062_s20 = scalar_select %p5069_p4, 1, 0 }
   0xd   : > { %p4387_p5 = pneg %p5069_p4  ;;  %s426_s24 = sshll.u32 %s4969_s23, 4  ;;  %s5081_s24 = int_to_ptr.vmem [resolvable:$true] %s426_s24 }
   0xe   : > { %s452_s27 = sshll.u32 %s4970_s26, 4  ;;  %s4860_s30 = scalar_lea.hbm %s6040_s8, 4096  ;;  %s5083_s27 = int_to_ptr.vmem [resolvable:$true] %s452_s27 }
   0xf   : > { %p5077_p6 = pnand %p6048_p3, %p4387_p5  ;;  %p4861_p7 = scmp.ne.s32.totalorder %s6040_s8, %s4860_s30 }
  0x10   : > { %p4867_p11 = scmp.lt.u32.totalorder %s4860_s30, %s6040_s8 }
  0x11   : > { %p5093_p8 = pneg %p5077_p6 }
  0x13   : > { %p4863_p9 = pnand %p5093_p8, %p4861_p7 }
  0x15   : > { %p4864_p10 = pneg %p4863_p9 }
  0x17   : > { %p4869_p12 = pnand %p4867_p11, %p4864_p10 }
  0x19   : > { %4872 = shalt.err (!%p4869_p12)
}
  0x1a   : > { %s4873_s28 = scalar_lea.vmem %s440_s22, 4096  ;;  %p4881_p5 = scmp.lt.s32.totalorder %s440_s22, %s440_s22 }
  0x1b   : > { %p4874_p13 = scmp.ne.s32.totalorder %s440_s22, %s4873_s28  ;;  %p4882_p2 = scmp.lt.s32.totalorder %s4873_s28, %s4873_s28 }
  0x1d   : > { %p4876_p0 = pnand %p4874_p13, %p5093_p8  ;;  %p4883_p3 = por %p4882_p2, %p4881_p5 }
  0x1f   : > { %p4877_p1 = pneg %p4876_p0 }
  0x21   : > { %p4884_p4 = pnand %p4883_p3, %p4877_p1 }
  0x23   : > { %4887 = shalt.err (!%p4884_p4)
}
  0x24   : > { %s4971_s29 = smov 256   ;;  %s4972_s16 = smov 16  }
  0x25   : > { %4393 = dma.hbm_to_vmem [thread:$0]  (!%p5077_p6), %s6040_s8, 4096, %s440_s22, [#allocation11], %s4971_s29, %s4971_s29, %s4972_s16  }
  0x26   : > { %s4888_s18 = scalar_lea.hbm %s6039_s7, 4096 }
  0x27   : > { %p4889_p2 = scmp.ne.s32.totalorder %s6039_s7, %s4888_s18  ;;  %p4895_p7 = scmp.lt.u32.totalorder %s4888_s18, %s6039_s7 }
  0x29   : > { %p4891_p3 = pnand %p4889_p2, %p5093_p8 }
  0x2b   : > { %p4892_p4 = pneg %p4891_p3 }
  0x2d   : > { %p4897_p9 = pnand %p4895_p7, %p4892_p4 }
  0x2f   : > { %4900 = shalt.err (!%p4897_p9)
}
  0x30   : > { %s4901_s22 = scalar_lea.vmem %s5081_s24, 4096  ;;  %p4909_p13 = scmp.lt.s32.totalorder %s5081_s24, %s5081_s24 }
  0x31   : > { %p4902_p10 = scmp.ne.s32.totalorder %s5081_s24, %s4901_s22  ;;  %p4910_p0 = scmp.lt.s32.totalorder %s4901_s22, %s4901_s22 }
  0x33   : > { %p4904_p11 = pnand %p4902_p10, %p5093_p8  ;;  %p4911_p1 = por %p4910_p0, %p4909_p13 }
  0x35   : > { %p4905_p12 = pneg %p4904_p11 }
  0x37   : > { %p4912_p5 = pnand %p4911_p1, %p4905_p12 }
  0x39   : > { %4915 = shalt.err (!%p4912_p5)
}
  0x3a   : > { %4390 = dma.hbm_to_vmem [thread:$0]  (!%p5077_p6), %s6039_s7, 4096, %s5081_s24, [#allocation9], %s4971_s29, %s4971_s29, %s4972_s16  }
  0x3b   : > { %s4916_s30 = scalar_lea.hbm %s6041_s9, 4096 }
  0x3c   : > { %p4917_p2 = scmp.ne.s32.totalorder %s6041_s9, %s4916_s30  ;;  %p4923_p7 = scmp.lt.u32.totalorder %s4916_s30, %s6041_s9 }
  0x3e   : > { %p4919_p3 = pnand %p4917_p2, %p5093_p8 }
  0x40   : > { %p4920_p4 = pneg %p4919_p3 }
  0x42   : > { %p4925_p9 = pnand %p4923_p7, %p4920_p4 }
  0x44   : > { %4928 = shalt.err (!%p4925_p9)
}
  0x45   : > { %s4929_s24 = scalar_lea.vmem %s5083_s27, 4096  ;;  %p4937_p13 = scmp.lt.s32.totalorder %s5083_s27, %s5083_s27 }
  0x46   : > { %p4930_p10 = scmp.ne.s32.totalorder %s5083_s27, %s4929_s24  ;;  %p4938_p0 = scmp.lt.s32.totalorder %s4929_s24, %s4929_s24 }
  0x48   : > { %p4932_p11 = pnand %p4930_p10, %p5093_p8  ;;  %p4939_p1 = por %p4938_p0, %p4937_p13 }
  0x4a   : > { %p4933_p12 = pneg %p4932_p11 }
  0x4c   : > { %p4940_p5 = pnand %p4939_p1, %p4933_p12 }
  0x4e   : > { %4943 = shalt.err (!%p4940_p5)
}
  0x4f   : > { %4396 = dma.hbm_to_vmem [thread:$0]  (!%p5077_p6), %s6041_s9, 4096, %s5083_s27, [#allocation11], %s4971_s29, %s4971_s29, %s4972_s16  }
  0x50   : > { %p6065_p2 = scmp.ne.s32.totalorder %s6062_s20, 0 }
  0x51   : > { %p6066_p8 = scmp.eq.s32.totalorder (!%p6065_p2), %s5063_s19, 0 }
  0x52   : > { %514 = sbr.rel (%p6065_p2) target bundleno = 1085 (0x43d), region = 68 }
  0x59   : > { %4953 = dma.done.wait (%p6066_p8), [#allocation9], 4096   ;;  %p6067_p3 = pmov %p6066_p8 }
  0x5b   : > { %4955 = vsyncadd (%p6067_p3), [#allocation9], 4294963200  ;;  %p6068_p4 = pmov %p6067_p3 }
  0x5c   : > { %p6069_p7 = pmov %p6067_p3 }
  0x5d   : > { %4957 = dma.done.wait (%p6068_p4), [#allocation11], 8192  }
  0x5e   : > { %4959 = vsyncadd (%p6069_p7), [#allocation11], 4294959104  ;;  %s3970_s25 = sshll.u32 %s5063_s19, 3  ;;  %s605_s21 = ssub.s32 1, %s5063_s19 }
  0x5f   : > { %p594_p6 = scmp.lt.s32.totalorder %s3970_s25, 15  ;;  %s3974_s27 = sshll.u32 %s605_s21, 3 }
  0x60   : > { %p607_p9 = scmp.lt.s32.totalorder %s3974_s27, 15  ;;  %s6070_s0 = sld [smem:[#allocation18_spill]] }
  0x61   : > { %s6082_s25 = smov (!%p594_p6, %s3970_s25), 15  ;;  %p6071_p10 = scmp.ne.s32.totalorder %s5063_s19, 0 }
  0x62   : > { %s6084_s27 = smov (!%p607_p9, %s3974_s27), 15  ;;  %s3971_s20 = sshll.u32 %s6082_s25, 2  ;;  %v4973_v0 = vmov (!%p6071_p10), 0   ;;  %v4974_v1 = vmov (!%p6071_p10), 0.0  }
  0x63   : > { %s3979_s29 = sshll.u32 %s6082_s25, 3  ;;  %s5184_s17 = scalar_lea.vmem %s6033_s1, %s3971_s20  ;;  %640 = vst [vmem:[#allocation4] sm:$0xff] (!%p6071_p10), %v4973_v0  ;;  %641 = vst [vmem:[#allocation6] sm:$0xff] (!%p6071_p10), %v4973_v0 }
  0x64   : > { %s3975_s23 = sshll.u32 %s6084_s27, 2  ;;  %s5189_s24 = scalar_lea.vmem %s6044_s12, %s3979_s29  ;;  %642 = vst [vmem:[#allocation5] sm:$0xff] (!%p6071_p10), %v4974_v1  ;;  %643 = vst [vmem:[#allocation5 + $0x8] sm:$0xff] (!%p6071_p10), %v4974_v1 }
  0x65   : > { %s5194_s25 = scalar_lea.vmem %s6034_s2, %s3975_s23  ;;  %s5199_s14 = scalar_lea.vmem %s6035_s3, %s3975_s23  ;;  %644 = vst [vmem:[#allocation7] sm:$0xff] (!%p6071_p10), %v4974_v1  ;;  %645 = vst [vmem:[#allocation7 + $0x8] sm:$0xff] (!%p6071_p10), %v4974_v1 }
  0x66   : > { %s5179_s15 = scalar_lea.vmem %s6070_s0, %s3971_s20  ;;  %s3981_s0 = sshll.u32 %s6084_s27, 3 }
  0x67   : > { %s5204_s30 = scalar_lea.vmem %s6045_s13, %s3981_s0  ;;  %639 = sbr.rel (%p6071_p10) target bundleno = 110 (0x6e), region = 84 }
  0x6e PF: > { %v4428_v2 = vld [vmem:[%s6037_s5 + $0x4] ss:$16 sps:$4 sm:$0xff]   ;;  %v4430_v3 = vld [vmem:[%s6037_s5 + $0xc] ss:$16 sps:$4 sm:$0xff]   ;;  %v4975_v4 = vmov 0   ;;  %s5652_s0 = smov 0  }
  0x6f   : > { %982 = vmatprep.mubr.bf16.mxu0 %v4975_v4  ;;  %1055 = vmatprep.mubr.bf16.mxu1 %v4975_v4  ;;  %v4432_v5 = vld [vmem:[%s6037_s5] ss:$16 sps:$4 sm:$0xff]   ;;  %v4433_v6 = vld [vmem:[%s6037_s5 + $0x8] ss:$16 sps:$4 sm:$0xff]   ;;  %v4434_v7 = vld [vmem:[%s6037_s5 + $0x24] ss:$16 sps:$4 sm:$0xff]  }
  0x70   : > { %950 = vmatprep.subr.bf16.mxu0 %v4428_v2  ;;  %1023 = vmatprep.subr.bf16.mxu1 %v4430_v3  ;;  %v4436_v8 = vld [vmem:[%s6037_s5 + $0x2c] ss:$16 sps:$4 sm:$0xff]   ;;  %v4438_v9 = vld [vmem:[%s6037_s5 + $0x20] ss:$16 sps:$4 sm:$0xff]   ;;  %v4439_v10 = vld [vmem:[%s6037_s5 + $0x28] ss:$16 sps:$4 sm:$0xff]  }
  0x71   : > { %951 = vmatpush1.bf16.msra.mxu0 %v4432_v5  ;;  %1024 = vmatpush1.bf16.msra.mxu1 %v4433_v6  ;;  %v4440_v11 = vld [vmem:[%s6037_s5 + $0x44] ss:$16 sps:$4 sm:$0xff]   ;;  %v4442_v12 = vld [vmem:[%s6037_s5 + $0x4c] ss:$16 sps:$4 sm:$0xff]   ;;  %v4444_v13 = vld [vmem:[%s6037_s5 + $0x40] ss:$16 sps:$4 sm:$0xff]  }
  0x72   : > { %952 = vmatprep.subr.bf16.mxu0 %v4434_v7  ;;  %1025 = vmatprep.subr.bf16.mxu1 %v4436_v8  ;;  %v4445_v14 = vld [vmem:[%s6037_s5 + $0x48] ss:$16 sps:$4 sm:$0xff]   ;;  %v4446_v15 = vld [vmem:[%s6037_s5 + $0x64] ss:$16 sps:$4 sm:$0xff]   ;;  %v4448_v16 = vld [vmem:[%s6037_s5 + $0x6c] ss:$16 sps:$4 sm:$0xff]  }
  0x73   : > { %v4450_v17 = vld [vmem:[%s6037_s5 + $0x60] ss:$16 sps:$4 sm:$0xff]   ;;  %v4451_v18 = vld [vmem:[%s6037_s5 + $0x68] ss:$16 sps:$4 sm:$0xff]   ;;  %v4452_v19 = vld [vmem:[%s6037_s5 + $0x84] ss:$16 sps:$4 sm:$0xff]  }
  0x74   : > { %v4454_v20 = vld [vmem:[%s6037_s5 + $0x8c] ss:$16 sps:$4 sm:$0xff]   ;;  %v4456_v21 = vld [vmem:[%s6037_s5 + $0x80] ss:$16 sps:$4 sm:$0xff]   ;;  %v4457_v22 = vld [vmem:[%s6037_s5 + $0x88] ss:$16 sps:$4 sm:$0xff]  }
  0x75   : > { %953 = vmatpush1.bf16.msra.mxu0 %v4438_v9  ;;  %1026 = vmatpush1.bf16.msra.mxu1 %v4439_v10  ;;  %v4458_v23 = vld [vmem:[%s6037_s5 + $0xa4] ss:$16 sps:$4 sm:$0xff]   ;;  %v4460_v24 = vld [vmem:[%s6037_s5 + $0xac] ss:$16 sps:$4 sm:$0xff]   ;;  %v4462_v25 = vld [vmem:[%s6037_s5 + $0xa0] ss:$16 sps:$4 sm:$0xff]  }
  0x76   : > { %954 = vmatprep.subr.bf16.mxu0 %v4440_v11  ;;  %1027 = vmatprep.subr.bf16.mxu1 %v4442_v12  ;;  %v4463_v26 = vld [vmem:[%s6037_s5 + $0xa8] ss:$16 sps:$4 sm:$0xff]   ;;  %v4464_v27 = vld [vmem:[%s6037_s5 + $0xc4] ss:$16 sps:$4 sm:$0xff]   ;;  %v4466_v28 = vld [vmem:[%s6037_s5 + $0xcc] ss:$16 sps:$4 sm:$0xff]  }
  0x77   : > { %v4468_v29 = vld [vmem:[%s6037_s5 + $0xc0] ss:$16 sps:$4 sm:$0xff]   ;;  %v4469_v30 = vld [vmem:[%s6037_s5 + $0xc8] ss:$16 sps:$4 sm:$0xff]   ;;  %v4470_v31 = vld [vmem:[%s6037_s5 + $0xe4] ss:$16 sps:$4 sm:$0xff]  }
  0x78   : > { %v4472_v32 = vld [vmem:[%s6037_s5 + $0xec] ss:$16 sps:$4 sm:$0xff]   ;;  %v4474_v33 = vld [vmem:[%s6037_s5 + $0xe0] ss:$16 sps:$4 sm:$0xff]   ;;  %v4475_v34 = vld [vmem:[%s6037_s5 + $0xe8] ss:$16 sps:$4 sm:$0xff]  }
  0x79   : > { %955 = vmatpush1.bf16.msra.mxu0 %v4444_v13  ;;  %1028 = vmatpush1.bf16.msra.mxu1 %v4445_v14  ;;  %v4479_v35 = vld [vmem:[%s6036_s4 + $0x4] ss:$16 sps:$4 sm:$0xff]   ;;  %v4482_v36 = vld [vmem:[%s6036_s4 + $0xc] ss:$16 sps:$4 sm:$0xff]   ;;  %v4477_v38 = vld [vmem:[%s6036_s4] ss:$16 sps:$4 sm:$0xff]  }
  0x7a   : > { %956 = vmatprep.subr.bf16.mxu0 %v4446_v15  ;;  %1029 = vmatprep.subr.bf16.mxu1 %v4448_v16  ;;  %v4476_v37 = vld [vmem:[%s5184_s17] sm:$0xff]   ;;  %v4480_v39 = vld [vmem:[%s6036_s4 + $0x8] ss:$16 sps:$4 sm:$0xff]   ;;  %v4488_v41 = vld [vmem:[%s6036_s4 + $0x2c] ss:$16 sps:$4 sm:$0xff]  }
  0x7b   : > { %v4485_v40 = vld [vmem:[%s6036_s4 + $0x24] ss:$16 sps:$4 sm:$0xff]   ;;  %v4483_v42 = vld [vmem:[%s6036_s4 + $0x20] ss:$16 sps:$4 sm:$0xff]   ;;  %v4486_v43 = vld [vmem:[%s6036_s4 + $0x28] ss:$16 sps:$4 sm:$0xff]  }
  0x7c   : > { %v4492_v44 = vld [vmem:[%s6036_s4 + $0x44] ss:$16 sps:$4 sm:$0xff]   ;;  %v4495_v45 = vld [vmem:[%s6036_s4 + $0x4c] ss:$16 sps:$4 sm:$0xff]   ;;  %v4490_v47 = vld [vmem:[%s6036_s4 + $0x40] ss:$16 sps:$4 sm:$0xff]  }
  0x7d   : > { %957 = vmatpush1.bf16.msra.mxu0 %v4450_v17  ;;  %1030 = vmatpush1.bf16.msra.mxu1 %v4451_v18  ;;  %v4489_v46 = vld [vmem:[%s5184_s17 + $0x8] sm:$0xff]   ;;  %v4498_v49 = vld [vmem:[%s6036_s4 + $0x64] ss:$16 sps:$4 sm:$0xff]   ;;  %v4496_v51 = vld [vmem:[%s6036_s4 + $0x60] ss:$16 sps:$4 sm:$0xff]  }
  0x7e   : > { %958 = vmatprep.subr.bf16.mxu0 %v4452_v19  ;;  %1031 = vmatprep.subr.bf16.mxu1 %v4454_v20  ;;  %v4493_v48 = vld [vmem:[%s6036_s4 + $0x48] ss:$16 sps:$4 sm:$0xff]   ;;  %v4501_v50 = vld [vmem:[%s6036_s4 + $0x6c] ss:$16 sps:$4 sm:$0xff]   ;;  %v4505_v53 = vld [vmem:[%s6036_s4 + $0x84] ss:$16 sps:$4 sm:$0xff]  }
  0x7f   : > { %v4499_v52 = vld [vmem:[%s6036_s4 + $0x68] ss:$16 sps:$4 sm:$0xff]   ;;  %v4508_v54 = vld [vmem:[%s6036_s4 + $0x8c] ss:$16 sps:$4 sm:$0xff]   ;;  %v4502_v55 = vld [vmem:[%s5184_s17 + $0x10] sm:$0xff]  }
  0x80   : > { %v4503_v56 = vld [vmem:[%s6036_s4 + $0x80] ss:$16 sps:$4 sm:$0xff]   ;;  %v4506_v57 = vld [vmem:[%s6036_s4 + $0x88] ss:$16 sps:$4 sm:$0xff]   ;;  %v4511_v58 = vld [vmem:[%s6036_s4 + $0xa4] ss:$16 sps:$4 sm:$0xff]  }
  0x81   : > { %959 = vmatpush1.bf16.msra.mxu0 %v4456_v21  ;;  %1032 = vmatpush1.bf16.msra.mxu1 %v4457_v22  ;;  %v4514_v59 = vld [vmem:[%s6036_s4 + $0xac] ss:$16 sps:$4 sm:$0xff]   ;;  %v4509_v60 = vld [vmem:[%s6036_s4 + $0xa0] ss:$16 sps:$4 sm:$0xff]   ;;  %v4512_v61 = vld [vmem:[%s6036_s4 + $0xa8] ss:$16 sps:$4 sm:$0xff]  }
  0x82   : > { %960 = vmatprep.subr.bf16.mxu0 %v4458_v23  ;;  %1033 = vmatprep.subr.bf16.mxu1 %v4460_v24  ;;  %v4518_v62 = vld [vmem:[%s6036_s4 + $0xc4] ss:$16 sps:$4 sm:$0xff]   ;;  %v4521_v63 = vld [vmem:[%s6036_s4 + $0xcc] ss:$16 sps:$4 sm:$0xff]   ;;  %v4516_v1 = vld [vmem:[%s6036_s4 + $0xc0] ss:$16 sps:$4 sm:$0xff]  }
  0x83   : > { %v4515_v0 = vld [vmem:[%s5184_s17 + $0x18] sm:$0xff]   ;;  %v4524_v3 = vld [vmem:[%s6036_s4 + $0xe4] ss:$16 sps:$4 sm:$0xff]   ;;  %v4522_v6 = vld [vmem:[%s6036_s4 + $0xe0] ss:$16 sps:$4 sm:$0xff]   ;;  %s6072_s17 = sld [smem:[#allocation19_spill]] }
  0x84   : > { %v4519_v2 = vld [vmem:[%s6036_s4 + $0xc8] ss:$16 sps:$4 sm:$0xff]   ;;  %v4527_v5 = vld [vmem:[%s6036_s4 + $0xec] ss:$16 sps:$4 sm:$0xff]   ;;  %v4531_v8 = vld [vmem:[#allocation8 + $0x4] ss:$16 sps:$4 sm:$0xff]  }
  0x85   : > { %961 = vmatpush1.bf16.msra.mxu0 %v4462_v25  ;;  %1034 = vmatpush1.bf16.msra.mxu1 %v4463_v26  ;;  %v4525_v7 = vld [vmem:[%s6036_s4 + $0xe8] ss:$16 sps:$4 sm:$0xff]   ;;  %v4534_v9 = vld [vmem:[#allocation8 + $0xc] ss:$16 sps:$4 sm:$0xff]   ;;  %v4528_v10 = vld [vmem:[%s5179_s15] sm:$0xff]  }
  0x86   : > { %962 = vmatprep.subr.bf16.mxu0 %v4464_v27  ;;  %1035 = vmatprep.subr.bf16.mxu1 %v4466_v28  ;;  %v4529_v11 = vld [vmem:[#allocation8] ss:$16 sps:$4 sm:$0xff]   ;;  %v4532_v12 = vld [vmem:[#allocation8 + $0x8] ss:$16 sps:$4 sm:$0xff]   ;;  %v4537_v13 = vld [vmem:[#allocation8 + $0x24] ss:$16 sps:$4 sm:$0xff]  }
  0x87   : > { %v4540_v14 = vld [vmem:[#allocation8 + $0x2c] ss:$16 sps:$4 sm:$0xff]   ;;  %v4535_v15 = vld [vmem:[#allocation8 + $0x20] ss:$16 sps:$4 sm:$0xff]   ;;  %v4538_v16 = vld [vmem:[#allocation8 + $0x28] ss:$16 sps:$4 sm:$0xff]  }
  0x88   : > { %v4544_v17 = vld [vmem:[#allocation8 + $0x44] ss:$16 sps:$4 sm:$0xff]   ;;  %v4547_v18 = vld [vmem:[#allocation8 + $0x4c] ss:$16 sps:$4 sm:$0xff]   ;;  %v4542_v20 = vld [vmem:[#allocation8 + $0x40] ss:$16 sps:$4 sm:$0xff]  }
  0x89   : > { %963 = vmatpush1.bf16.msra.mxu0 %v4468_v29  ;;  %1036 = vmatpush1.bf16.msra.mxu1 %v4469_v30  ;;  %v4541_v19 = vld [vmem:[%s5179_s15 + $0x8] sm:$0xff]   ;;  %v4550_v22 = vld [vmem:[#allocation8 + $0x64] ss:$16 sps:$4 sm:$0xff]   ;;  %v4548_v24 = vld [vmem:[#allocation8 + $0x60] ss:$16 sps:$4 sm:$0xff]  }
  0x8a   : > { %964 = vmatprep.subr.bf16.mxu0 %v4470_v31  ;;  %1037 = vmatprep.subr.bf16.mxu1 %v4472_v32  ;;  %v4545_v21 = vld [vmem:[#allocation8 + $0x48] ss:$16 sps:$4 sm:$0xff]   ;;  %v4553_v23 = vld [vmem:[#allocation8 + $0x6c] ss:$16 sps:$4 sm:$0xff]   ;;  %v4557_v26 = vld [vmem:[#allocation8 + $0x84] ss:$16 sps:$4 sm:$0xff]  }
  0x8b   : > { %v4551_v25 = vld [vmem:[#allocation8 + $0x68] ss:$16 sps:$4 sm:$0xff]   ;;  %v4560_v27 = vld [vmem:[#allocation8 + $0x8c] ss:$16 sps:$4 sm:$0xff]   ;;  %v4554_v28 = vld [vmem:[%s5179_s15 + $0x10] sm:$0xff]  }
  0x8c   : > { %v4555_v29 = vld [vmem:[#allocation8 + $0x80] ss:$16 sps:$4 sm:$0xff]   ;;  %v4558_v30 = vld [vmem:[#allocation8 + $0x88] ss:$16 sps:$4 sm:$0xff]   ;;  %v4563_v31 = vld [vmem:[#allocation8 + $0xa4] ss:$16 sps:$4 sm:$0xff]  }
  0x8d   : > { %965 = vmatpush1.bf16.msra.mxu0 %v4474_v33  ;;  %1038 = vmatpush1.bf16.msra.mxu1 %v4475_v34  ;;  %v4566_v32 = vld [vmem:[#allocation8 + $0xac] ss:$16 sps:$4 sm:$0xff]   ;;  %v4561_v33 = vld [vmem:[#allocation8 + $0xa0] ss:$16 sps:$4 sm:$0xff]   ;;  %v4564_v34 = vld [vmem:[#allocation8 + $0xa8] ss:$16 sps:$4 sm:$0xff]  }
  0x8e   : > { %1280 = vmatprep.subr.bf16.mxu0 %v4479_v35  ;;  %1353 = vmatprep.subr.bf16.mxu1 %v4482_v36  ;;  %v4570_v35 = vld [vmem:[#allocation8 + $0xc4] ss:$16 sps:$4 sm:$0xff]   ;;  %v4573_v36 = vld [vmem:[#allocation8 + $0xcc] ss:$16 sps:$4 sm:$0xff]  }
  0x90   : > { %983 = vmatmul.mubr.bf16.vlgmr.msra.gmra.mrb[0].mxu0 %v4476_v37  ;;  %1056 = vmatmul.mubr.bf16.vlgmr.msra.gmra.mrb[0].mxu1 %v4476_v37  ;;  %v4567_v37 = vld [vmem:[%s5179_s15 + $0x18] sm:$0xff]  }
  0x91   : > { %1281 = vmatpush1.bf16.msra.mxu0 %v4477_v38  ;;  %1354 = vmatpush1.bf16.msra.mxu1 %v4480_v39  ;;  %v4568_v38 = vld [vmem:[#allocation8 + $0xc0] ss:$16 sps:$4 sm:$0xff]   ;;  %v4571_v39 = vld [vmem:[#allocation8 + $0xc8] ss:$16 sps:$4 sm:$0xff]  }
  0x92   : > { %1282 = vmatprep.subr.bf16.mxu0 %v4485_v40  ;;  %1355 = vmatprep.subr.bf16.mxu1 %v4488_v41  ;;  %v4576_v40 = vld [vmem:[#allocation8 + $0xe4] ss:$16 sps:$4 sm:$0xff]   ;;  %v4579_v41 = vld [vmem:[#allocation8 + $0xec] ss:$16 sps:$4 sm:$0xff]  }
  0x93   : > { %992 = vmatprep.mubr.bf16.mxu0 %v4975_v4  ;;  %1065 = vmatprep.mubr.bf16.mxu1 %v4975_v4 }
  0x95   : > { %1283 = vmatpush1.bf16.msra.mxu0 %v4483_v42  ;;  %1356 = vmatpush1.bf16.msra.mxu1 %v4486_v43  ;;  %v4574_v42 = vld [vmem:[#allocation8 + $0xe0] ss:$16 sps:$4 sm:$0xff]   ;;  %v4577_v43 = vld [vmem:[#allocation8 + $0xe8] ss:$16 sps:$4 sm:$0xff]  }
  0x96   : > { %1284 = vmatprep.subr.bf16.mxu0 %v4492_v44  ;;  %1357 = vmatprep.subr.bf16.mxu1 %v4495_v45  ;;  %v4583_v44 = vld [vmem:[%s6038_s6 + $0x4] ss:$16 sps:$4 sm:$0xff]   ;;  %v4586_v45 = vld [vmem:[%s6038_s6 + $0xc] ss:$16 sps:$4 sm:$0xff]  }
  0x98   : > { %993 = vmatmul.mubr.bf16.gmra.mrb[4].mxu0 %v4489_v46  ;;  %1066 = vmatmul.mubr.bf16.gmra.mrb[4].mxu1 %v4489_v46  ;;  %v4580_v46 = vld [vmem:[%s5199_s14] sm:$0xff]  }
  0x99   : > { %1285 = vmatpush1.bf16.msra.mxu0 %v4490_v47  ;;  %1358 = vmatpush1.bf16.msra.mxu1 %v4493_v48  ;;  %v4581_v47 = vld [vmem:[%s6038_s6] ss:$16 sps:$4 sm:$0xff]   ;;  %v4584_v48 = vld [vmem:[%s6038_s6 + $0x8] ss:$16 sps:$4 sm:$0xff]  }
  0x9a   : > { %1286 = vmatprep.subr.bf16.mxu0 %v4498_v49  ;;  %1359 = vmatprep.subr.bf16.mxu1 %v4501_v50  ;;  %v4589_v49 = vld [vmem:[%s6038_s6 + $0x24] ss:$16 sps:$4 sm:$0xff]   ;;  %v4592_v50 = vld [vmem:[%s6038_s6 + $0x2c] ss:$16 sps:$4 sm:$0xff]  }
  0x9b   : > { %1002 = vmatprep.mubr.bf16.mxu0 %v4975_v4  ;;  %1075 = vmatprep.mubr.bf16.mxu1 %v4975_v4 }
  0x9d   : > { %1287 = vmatpush1.bf16.msra.mxu0 %v4496_v51  ;;  %1360 = vmatpush1.bf16.msra.mxu1 %v4499_v52  ;;  %v4587_v51 = vld [vmem:[%s6038_s6 + $0x20] ss:$16 sps:$4 sm:$0xff]   ;;  %v4590_v52 = vld [vmem:[%s6038_s6 + $0x28] ss:$16 sps:$4 sm:$0xff]  }
  0x9e   : > { %1288 = vmatprep.subr.bf16.mxu0 %v4505_v53  ;;  %1361 = vmatprep.subr.bf16.mxu1 %v4508_v54  ;;  %v4596_v53 = vld [vmem:[%s6038_s6 + $0x44] ss:$16 sps:$4 sm:$0xff]   ;;  %v4599_v54 = vld [vmem:[%s6038_s6 + $0x4c] ss:$16 sps:$4 sm:$0xff]  }
  0xa0   : > { %1003 = vmatmul.mubr.bf16.gmra.mrb[8].mxu0 %v4502_v55  ;;  %1076 = vmatmul.mubr.bf16.gmra.mrb[8].mxu1 %v4502_v55  ;;  %v4593_v55 = vld [vmem:[%s5199_s14 + $0x8] sm:$0xff]  }
  0xa1   : > { %1289 = vmatpush1.bf16.msra.mxu0 %v4503_v56  ;;  %1362 = vmatpush1.bf16.msra.mxu1 %v4506_v57  ;;  %v4594_v56 = vld [vmem:[%s6038_s6 + $0x40] ss:$16 sps:$4 sm:$0xff]   ;;  %v4597_v57 = vld [vmem:[%s6038_s6 + $0x48] ss:$16 sps:$4 sm:$0xff]  }
  0xa2   : > { %1290 = vmatprep.subr.bf16.mxu0 %v4511_v58  ;;  %1363 = vmatprep.subr.bf16.mxu1 %v4514_v59  ;;  %v4602_v58 = vld [vmem:[%s6038_s6 + $0x64] ss:$16 sps:$4 sm:$0xff]   ;;  %v4605_v59 = vld [vmem:[%s6038_s6 + $0x6c] ss:$16 sps:$4 sm:$0xff]  }
  0xa3   : > { %1012 = vmatprep.mubr.bf16.mxu0 %v4975_v4  ;;  %1085 = vmatprep.mubr.bf16.mxu1 %v4975_v4 }
  0xa5   : > { %1291 = vmatpush1.bf16.msra.mxu0 %v4509_v60  ;;  %1364 = vmatpush1.bf16.msra.mxu1 %v4512_v61  ;;  %v4600_v60 = vld [vmem:[%s6038_s6 + $0x60] ss:$16 sps:$4 sm:$0xff]   ;;  %v4603_v61 = vld [vmem:[%s6038_s6 + $0x68] ss:$16 sps:$4 sm:$0xff]  }
  0xa6   : > { %1292 = vmatprep.subr.bf16.mxu0 %v4518_v62  ;;  %1365 = vmatprep.subr.bf16.mxu1 %v4521_v63  ;;  %v4609_v62 = vld [vmem:[%s6038_s6 + $0x84] ss:$16 sps:$4 sm:$0xff]   ;;  %v4612_v63 = vld [vmem:[%s6038_s6 + $0x8c] ss:$16 sps:$4 sm:$0xff]  }
  0xa8   : > { %1013 = vmatmul.mubr.bf16.gmra.mrb[12].mxu0 %v4515_v0  ;;  %1086 = vmatmul.mubr.bf16.gmra.mrb[12].mxu1 %v4515_v0  ;;  %v4606_v0 = vld [vmem:[%s5199_s14 + $0x10] sm:$0xff]  }
  0xa9   : > { %1293 = vmatpush1.bf16.msra.mxu0 %v4516_v1  ;;  %1366 = vmatpush1.bf16.msra.mxu1 %v4519_v2  ;;  %v4607_v1 = vld [vmem:[%s6038_s6 + $0x80] ss:$16 sps:$4 sm:$0xff]   ;;  %v4610_v2 = vld [vmem:[%s6038_s6 + $0x88] ss:$16 sps:$4 sm:$0xff]  }
  0xaa   : > { %1294 = vmatprep.subr.bf16.mxu0 %v4524_v3  ;;  %1367 = vmatprep.subr.bf16.mxu1 %v4527_v5  ;;  %v4615_v3 = vld [vmem:[%s6038_s6 + $0xa4] ss:$16 sps:$4 sm:$0xff]   ;;  %v4618_v5 = vld [vmem:[%s6038_s6 + $0xac] ss:$16 sps:$4 sm:$0xff]  }
  0xab   : > { %1312 = vmatprep.mubr.bf16.mxu0 %v4975_v4  ;;  %1385 = vmatprep.mubr.bf16.mxu1 %v4975_v4 }
  0xad   : > { %1295 = vmatpush1.bf16.msra.mxu0 %v4522_v6  ;;  %1368 = vmatpush1.bf16.msra.mxu1 %v4525_v7  ;;  %v4613_v6 = vld [vmem:[%s6038_s6 + $0xa0] ss:$16 sps:$4 sm:$0xff]   ;;  %v4616_v7 = vld [vmem:[%s6038_s6 + $0xa8] ss:$16 sps:$4 sm:$0xff]  }
  0xae   : > { %1650 = vmatprep.subr.bf16.mxu0 %v4531_v8  ;;  %1723 = vmatprep.subr.bf16.mxu1 %v4534_v9  ;;  %v4622_v8 = vld [vmem:[%s6038_s6 + $0xc4] ss:$16 sps:$4 sm:$0xff]   ;;  %v4625_v9 = vld [vmem:[%s6038_s6 + $0xcc] ss:$16 sps:$4 sm:$0xff]  }
  0xb0   : > { %1313 = vmatmul.mubr.bf16.vlgmr.msra.gmra.mrb[0].mxu0 %v4528_v10  ;;  %1386 = vmatmul.mubr.bf16.vlgmr.msra.gmra.mrb[0].mxu1 %v4528_v10  ;;  %v4619_v10 = vld [vmem:[%s5199_s14 + $0x18] sm:$0xff]  }
  0xb1   : > { %1651 = vmatpush1.bf16.msra.mxu0 %v4529_v11  ;;  %1724 = vmatpush1.bf16.msra.mxu1 %v4532_v12  ;;  %v4620_v11 = vld [vmem:[%s6038_s6 + $0xc0] ss:$16 sps:$4 sm:$0xff]   ;;  %v4623_v12 = vld [vmem:[%s6038_s6 + $0xc8] ss:$16 sps:$4 sm:$0xff]  }
  0xb2   : > { %1652 = vmatprep.subr.bf16.mxu0 %v4537_v13  ;;  %1725 = vmatprep.subr.bf16.mxu1 %v4540_v14  ;;  %v4628_v13 = vld [vmem:[%s6038_s6 + $0xe4] ss:$16 sps:$4 sm:$0xff]   ;;  %v4631_v14 = vld [vmem:[%s6038_s6 + $0xec] ss:$16 sps:$4 sm:$0xff]  }
  0xb3   : > { %1322 = vmatprep.mubr.bf16.mxu0 %v4975_v4  ;;  %1395 = vmatprep.mubr.bf16.mxu1 %v4975_v4 }
  0xb5   : > { %1653 = vmatpush1.bf16.msra.mxu0 %v4535_v15  ;;  %1726 = vmatpush1.bf16.msra.mxu1 %v4538_v16  ;;  %v4626_v15 = vld [vmem:[%s6038_s6 + $0xe0] ss:$16 sps:$4 sm:$0xff]   ;;  %v4629_v16 = vld [vmem:[%s6038_s6 + $0xe8] ss:$16 sps:$4 sm:$0xff]  }
  0xb6   : > { %1654 = vmatprep.subr.bf16.mxu0 %v4544_v17  ;;  %1727 = vmatprep.subr.bf16.mxu1 %v4547_v18  ;;  %v4632_v17 = vld [vmem:[%s5194_s25] sm:$0xff]   ;;  %v4633_v18 = vld [vmem:[%s5194_s25 + $0x8] sm:$0xff]  }
  0xb8   : > { %1323 = vmatmul.mubr.bf16.gmra.mrb[4].mxu0 %v4541_v19  ;;  %1396 = vmatmul.mubr.bf16.gmra.mrb[4].mxu1 %v4541_v19  ;;  %v4634_v19 = vld [vmem:[%s5194_s25 + $0x10] sm:$0xff]  }
  0xb9   : > { %1655 = vmatpush1.bf16.msra.mxu0 %v4542_v20  ;;  %1728 = vmatpush1.bf16.msra.mxu1 %v4545_v21  ;;  %v4635_v20 = vld [vmem:[%s5194_s25 + $0x18] sm:$0xff]   ;;  %v2128_v21 = vlaneseq }
  0xba   : > { %1656 = vmatprep.subr.bf16.mxu0 %v4550_v22  ;;  %1729 = vmatprep.subr.bf16.mxu1 %v4553_v23 }
  0xbb   : > { %1332 = vmatprep.mubr.bf16.mxu0 %v4975_v4  ;;  %1405 = vmatprep.mubr.bf16.mxu1 %v4975_v4  ;;  %v5544_v22 = vshrl.u32 %v2128_v21, 7 }
  0xbd   : > { %1657 = vmatpush1.bf16.msra.mxu0 %v4548_v24  ;;  %1730 = vmatpush1.bf16.msra.mxu1 %v4551_v25  ;;  %v2130_v23 = vsub.s32 0, %v5544_v22  ;;  %v2138_v24 = vsub.s32 2, %v5544_v22  ;;  %v2126_v25 = vld [vmem:[%s6042_s10] sm:$0xf] }
  0xbe   : > { %1658 = vmatprep.subr.bf16.mxu0 %v4557_v26  ;;  %1731 = vmatprep.subr.bf16.mxu1 %v4560_v27  ;;  %v2134_v26 = vsub.s32 1, %v5544_v22  ;;  %v2142_v27 = vsub.s32 3, %v5544_v22 }
  0xc0   : > { %1333 = vmatmul.mubr.bf16.gmra.mrb[8].mxu0 %v4554_v28  ;;  %1406 = vmatmul.mubr.bf16.gmra.mrb[8].mxu1 %v4554_v28  ;;  %v5559_v28 = vrot.slane %v2126_v25, %v2138_v24 }
  0xc1   : > { %1659 = vmatpush1.bf16.msra.mxu0 %v4555_v29  ;;  %1732 = vmatpush1.bf16.msra.mxu1 %v4558_v30  ;;  %v5563_v29 = vrot.slane %v2126_v25, %v2134_v26  ;;  %v5567_v30 = vrot.slane %v2126_v25, %v2142_v27 }
  0xc2   : > { %1660 = vmatprep.subr.bf16.mxu0 %v4563_v31  ;;  %1733 = vmatprep.subr.bf16.mxu1 %v4566_v32 }
  0xc3   : > { %1342 = vmatprep.mubr.bf16.mxu0 %v4975_v4  ;;  %1415 = vmatprep.mubr.bf16.mxu1 %v4975_v4 }
  0xc5   : > { %1661 = vmatpush1.bf16.msra.mxu0 %v4561_v33  ;;  %1734 = vmatpush1.bf16.msra.mxu1 %v4564_v34 }
  0xc6   : > { %1662 = vmatprep.subr.bf16.mxu0 %v4570_v35  ;;  %1735 = vmatprep.subr.bf16.mxu1 %v4573_v36 }
  0xc8   : > { %1343 = vmatmul.mubr.bf16.gmra.mrb[12].mxu0 %v4567_v37  ;;  %1416 = vmatmul.mubr.bf16.gmra.mrb[12].mxu1 %v4567_v37 }
  0xc9   : > { %1663 = vmatpush1.bf16.msra.mxu0 %v4568_v38  ;;  %1736 = vmatpush1.bf16.msra.mxu1 %v4571_v39 }
  0xca   : > { %1664 = vmatprep.subr.bf16.mxu0 %v4576_v40  ;;  %1737 = vmatprep.subr.bf16.mxu1 %v4579_v41 }
  0xcb   : > { %1682 = vmatprep.mubr.bf16.mxu0 %v4975_v4  ;;  %1755 = vmatprep.mubr.bf16.mxu1 %v4975_v4 }
  0xcd   : > { %1665 = vmatpush1.bf16.msra.mxu0 %v4574_v42  ;;  %1738 = vmatpush1.bf16.msra.mxu1 %v4577_v43 }
  0xce   : > { %1980 = vmatprep.subr.bf16.mxu0 %v4583_v44  ;;  %2053 = vmatprep.subr.bf16.mxu1 %v4586_v45 }
  0xd0   : > { %1683 = vmatmul.mubr.bf16.vlgmr.msra.gmra.mrb[16].mxu0 %v4580_v46  ;;  %1756 = vmatmul.mubr.bf16.vlgmr.msra.gmra.mrb[16].mxu1 %v4580_v46 }
  0xd1   : > { %1981 = vmatpush1.bf16.msra.mxu0 %v4581_v47  ;;  %2054 = vmatpush1.bf16.msra.mxu1 %v4584_v48 }
  0xd2   : > { %1982 = vmatprep.subr.bf16.mxu0 %v4589_v49  ;;  %2055 = vmatprep.subr.bf16.mxu1 %v4592_v50 }
  0xd3   : > { %1692 = vmatprep.mubr.bf16.mxu0 %v4975_v4  ;;  %1765 = vmatprep.mubr.bf16.mxu1 %v4975_v4 }
  0xd5   : > { %1983 = vmatpush1.bf16.msra.mxu0 %v4587_v51  ;;  %2056 = vmatpush1.bf16.msra.mxu1 %v4590_v52 }
  0xd6   : > { %1984 = vmatprep.subr.bf16.mxu0 %v4596_v53  ;;  %2057 = vmatprep.subr.bf16.mxu1 %v4599_v54 }
  0xd8   : > { %1693 = vmatmul.mubr.bf16.gmra.mrb[20].mxu0 %v4593_v55  ;;  %1766 = vmatmul.mubr.bf16.gmra.mrb[20].mxu1 %v4593_v55 }
  0xd9   : > { %1985 = vmatpush1.bf16.msra.mxu0 %v4594_v56  ;;  %2058 = vmatpush1.bf16.msra.mxu1 %v4597_v57 }
  0xda   : > { %1986 = vmatprep.subr.bf16.mxu0 %v4602_v58  ;;  %2059 = vmatprep.subr.bf16.mxu1 %v4605_v59 }
  0xdb   : > { %1702 = vmatprep.mubr.bf16.mxu0 %v4975_v4  ;;  %1775 = vmatprep.mubr.bf16.mxu1 %v4975_v4 }
  0xdd   : > { %1987 = vmatpush1.bf16.msra.mxu0 %v4600_v60  ;;  %2060 = vmatpush1.bf16.msra.mxu1 %v4603_v61 }
  0xde   : > { %1988 = vmatprep.subr.bf16.mxu0 %v4609_v62  ;;  %2061 = vmatprep.subr.bf16.mxu1 %v4612_v63 }
  0xe0   : > { %1703 = vmatmul.mubr.bf16.gmra.mrb[24].mxu0 %v4606_v0  ;;  %1776 = vmatmul.mubr.bf16.gmra.mrb[24].mxu1 %v4606_v0 }
  0xe1   : > { %1989 = vmatpush1.bf16.msra.mxu0 %v4607_v1  ;;  %2062 = vmatpush1.bf16.msra.mxu1 %v4610_v2 }
  0xe2   : > { %1990 = vmatprep.subr.bf16.mxu0 %v4615_v3  ;;  %2063 = vmatprep.subr.bf16.mxu1 %v4618_v5 }
  0xe3   : > { %1712 = vmatprep.mubr.bf16.mxu0 %v4975_v4  ;;  %1785 = vmatprep.mubr.bf16.mxu1 %v4975_v4 }
  0xe5   : > { %1991 = vmatpush1.bf16.msra.mxu0 %v4613_v6  ;;  %2064 = vmatpush1.bf16.msra.mxu1 %v4616_v7 }
  0xe6   : > { %1992 = vmatprep.subr.bf16.mxu0 %v4622_v8  ;;  %2065 = vmatprep.subr.bf16.mxu1 %v4625_v9 }
  0xe8   : > { %1713 = vmatmul.mubr.bf16.gmra.mrb[28].mxu0 %v4619_v10  ;;  %1786 = vmatmul.mubr.bf16.gmra.mrb[28].mxu1 %v4619_v10 }
  0xe9   : > { %1993 = vmatpush1.bf16.msra.mxu0 %v4620_v11  ;;  %2066 = vmatpush1.bf16.msra.mxu1 %v4623_v12 }
  0xea   : > { %1994 = vmatprep.subr.bf16.mxu0 %v4628_v13  ;;  %2067 = vmatprep.subr.bf16.mxu1 %v4631_v14 }
  0xeb   : > { %2012 = vmatprep.mubr.bf16.mxu0 %v4975_v4  ;;  %2085 = vmatprep.mubr.bf16.mxu1 %v4975_v4 }
  0xed   : > { %1995 = vmatpush1.bf16.msra.mxu0 %v4626_v15  ;;  %2068 = vmatpush1.bf16.msra.mxu1 %v4629_v16 }
  0xf0   : > { %2013 = vmatmul.mubr.bf16.vlgmr.msra.gmra.mrb[16].mxu0 %v4632_v17  ;;  %2086 = vmatmul.mubr.bf16.vlgmr.msra.gmra.mrb[16].mxu1 %v4632_v17 }
  0xf1   : > { %2022 = vmatprep.mubr.bf16.mxu0 %v4975_v4  ;;  %2095 = vmatprep.mubr.bf16.mxu1 %v4975_v4 }
  0xf8   : > { %2023 = vmatmul.mubr.bf16.gmra.mrb[20].mxu0 %v4633_v18  ;;  %2096 = vmatmul.mubr.bf16.gmra.mrb[20].mxu1 %v4633_v18 }
  0xf9   : > { %2032 = vmatprep.mubr.bf16.mxu0 %v4975_v4  ;;  %2105 = vmatprep.mubr.bf16.mxu1 %v4975_v4 }
 0x100   : > { %2033 = vmatmul.mubr.bf16.gmra.mrb[24].mxu0 %v4634_v19  ;;  %2106 = vmatmul.mubr.bf16.gmra.mrb[24].mxu1 %v4634_v19 }
 0x101   : > { %2042 = vmatprep.mubr.bf16.mxu0 %v4975_v4  ;;  %2115 = vmatprep.mubr.bf16.mxu1 %v4975_v4  ;;  %v5555_v4 = vrot.slane %v2126_v25, %v2130_v23 }
 0x108   : > { %2043 = vmatmul.mubr.bf16.gmra.mrb[28].mxu0 %v4635_v20  ;;  %2116 = vmatmul.mubr.bf16.gmra.mrb[28].mxu1 %v4635_v20 }
 0x183   : > { %v1314_v31 = vpop.f32.mrb[0].mxu0  ;;  %v1387_v32 = vpop.f32.mrb[0].mxu1 }
 0x184   : > { %v2148_v33 = vadd.f32 %v5555_v4, %v1314_v31  ;;  %v2150_v34 = vadd.f32 %v5559_v28, %v1387_v32  ;;  %v1316_v35 = vpop.f32.mrb[1].mxu0  ;;  %v1389_v36 = vpop.f32.mrb[1].mxu1 }
 0x185   : > { %v2149_v37 = vadd.f32 %v5563_v29, %v1316_v35  ;;  %v2151_v38 = vadd.f32 %v5567_v30, %v1389_v36  ;;  %v1318_v39 = vpop.f32.mrb[2].mxu0  ;;  %v1391_v40 = vpop.f32.mrb[2].mxu1 }
 0x186   : > { %2180 = vst [vmem:[#allocation2] sm:$0xff] %v2148_v33  ;;  %2182 = vst [vmem:[#allocation2 + $0x10] sm:$0xff] %v2150_v34  ;;  %v2152_v41 = vadd.f32 %v5555_v4, %v1318_v39  ;;  %v2154_v42 = vadd.f32 %v5559_v28, %v1391_v40  ;;  %v1320_v43 = vpop.f32.mrb[3].mxu0  ;;  %v1393_v44 = vpop.f32.mrb[3].mxu1  ;;  %v2212_v40 = vld [vmem:[%s6072_s17] sm:$0xf] }
 0x187   : > { %2181 = vst [vmem:[#allocation2 + $0x8] sm:$0xff] %v2149_v37  ;;  %2183 = vst [vmem:[#allocation2 + $0x18] sm:$0xff] %v2151_v38  ;;  %v2153_v45 = vadd.f32 %v5563_v29, %v1320_v43  ;;  %v2155_v46 = vadd.f32 %v5567_v30, %v1393_v44 }
 0x188   : > { %2184 = vst [vmem:[#allocation2 + $0x20] sm:$0xff] %v2152_v41  ;;  %2186 = vst [vmem:[#allocation2 + $0x30] sm:$0xff] %v2154_v42 }
 0x189   : > { %2185 = vst [vmem:[#allocation2 + $0x28] sm:$0xff] %v2153_v45  ;;  %2187 = vst [vmem:[#allocation2 + $0x38] sm:$0xff] %v2155_v46 }
 0x18b   : > { %v1324_v47 = vpop.f32.mrb[4].mxu0  ;;  %v1397_v48 = vpop.f32.mrb[4].mxu1 }
 0x18c   : > { %v2156_v49 = vadd.f32 %v5555_v4, %v1324_v47  ;;  %v2158_v50 = vadd.f32 %v5559_v28, %v1397_v48  ;;  %v1326_v51 = vpop.f32.mrb[5].mxu0  ;;  %v1399_v52 = vpop.f32.mrb[5].mxu1 }
 0x18d   : > { %v2157_v53 = vadd.f32 %v5563_v29, %v1326_v51  ;;  %v2159_v54 = vadd.f32 %v5567_v30, %v1399_v52  ;;  %v1328_v55 = vpop.f32.mrb[6].mxu0  ;;  %v1401_v56 = vpop.f32.mrb[6].mxu1 }
 0x18e   : > { %2188 = vst [vmem:[#allocation2 + $0x40] sm:$0xff] %v2156_v49  ;;  %2190 = vst [vmem:[#allocation2 + $0x50] sm:$0xff] %v2158_v50  ;;  %v2160_v57 = vadd.f32 %v5555_v4, %v1328_v55  ;;  %v2162_v58 = vadd.f32 %v5559_v28, %v1401_v56  ;;  %v1330_v59 = vpop.f32.mrb[7].mxu0  ;;  %v1403_v60 = vpop.f32.mrb[7].mxu1 }
 0x18f   : > { %2189 = vst [vmem:[#allocation2 + $0x48] sm:$0xff] %v2157_v53  ;;  %2191 = vst [vmem:[#allocation2 + $0x58] sm:$0xff] %v2159_v54  ;;  %v2161_v61 = vadd.f32 %v5563_v29, %v1330_v59  ;;  %v2163_v62 = vadd.f32 %v5567_v30, %v1403_v60 }
 0x190   : > { %2192 = vst [vmem:[#allocation2 + $0x60] sm:$0xff] %v2160_v57  ;;  %2194 = vst [vmem:[#allocation2 + $0x70] sm:$0xff] %v2162_v58 }
 0x191   : > { %2193 = vst [vmem:[#allocation2 + $0x68] sm:$0xff] %v2161_v61  ;;  %2195 = vst [vmem:[#allocation2 + $0x78] sm:$0xff] %v2163_v62 }
 0x193   : > { %v1334_v63 = vpop.f32.mrb[8].mxu0  ;;  %v1407_v0 = vpop.f32.mrb[8].mxu1 }
 0x194   : > { %v2164_v1 = vadd.f32 %v5555_v4, %v1334_v63  ;;  %v2166_v2 = vadd.f32 %v5559_v28, %v1407_v0  ;;  %v1336_v3 = vpop.f32.mrb[9].mxu0  ;;  %v1409_v5 = vpop.f32.mrb[9].mxu1 }
 0x195   : > { %v2165_v6 = vadd.f32 %v5563_v29, %v1336_v3  ;;  %v2167_v7 = vadd.f32 %v5567_v30, %v1409_v5  ;;  %v1338_v8 = vpop.f32.mrb[10].mxu0  ;;  %v1411_v9 = vpop.f32.mrb[10].mxu1 }
 0x196   : > { %2196 = vst [vmem:[#allocation2 + $0x80] sm:$0xff] %v2164_v1  ;;  %2198 = vst [vmem:[#allocation2 + $0x90] sm:$0xff] %v2166_v2  ;;  %v2168_v10 = vadd.f32 %v5555_v4, %v1338_v8  ;;  %v2170_v11 = vadd.f32 %v5559_v28, %v1411_v9  ;;  %v1340_v12 = vpop.f32.mrb[11].mxu0  ;;  %v1413_v13 = vpop.f32.mrb[11].mxu1 }
 0x197   : > { %2197 = vst [vmem:[#allocation2 + $0x88] sm:$0xff] %v2165_v6  ;;  %2199 = vst [vmem:[#allocation2 + $0x98] sm:$0xff] %v2167_v7  ;;  %v2169_v14 = vadd.f32 %v5563_v29, %v1340_v12  ;;  %v2171_v15 = vadd.f32 %v5567_v30, %v1413_v13 }
 0x198   : > { %2200 = vst [vmem:[#allocation2 + $0xa0] sm:$0xff] %v2168_v10  ;;  %2202 = vst [vmem:[#allocation2 + $0xb0] sm:$0xff] %v2170_v11 }
 0x199   : > { %2201 = vst [vmem:[#allocation2 + $0xa8] sm:$0xff] %v2169_v14  ;;  %2203 = vst [vmem:[#allocation2 + $0xb8] sm:$0xff] %v2171_v15 }
 0x19b   : > { %v1344_v16 = vpop.f32.mrb[12].mxu0  ;;  %v1417_v17 = vpop.f32.mrb[12].mxu1 }
 0x19c   : > { %v2172_v18 = vadd.f32 %v5555_v4, %v1344_v16  ;;  %v2174_v19 = vadd.f32 %v5559_v28, %v1417_v17  ;;  %v1346_v20 = vpop.f32.mrb[13].mxu0  ;;  %v1419_v21 = vpop.f32.mrb[13].mxu1 }
 0x19d   : > { %v2173_v25 = vadd.f32 %v5563_v29, %v1346_v20  ;;  %v2175_v31 = vadd.f32 %v5567_v30, %v1419_v21  ;;  %v1348_v32 = vpop.f32.mrb[14].mxu0  ;;  %v1421_v33 = vpop.f32.mrb[14].mxu1 }
 0x19e   : > { %2204 = vst [vmem:[#allocation2 + $0xc0] sm:$0xff] %v2172_v18  ;;  %2206 = vst [vmem:[#allocation2 + $0xd0] sm:$0xff] %v2174_v19  ;;  %v2176_v34 = vadd.f32 %v5555_v4, %v1348_v32  ;;  %v2178_v35 = vadd.f32 %v5559_v28, %v1421_v33  ;;  %v1350_v36 = vpop.f32.mrb[15].mxu0  ;;  %v1423_v37 = vpop.f32.mrb[15].mxu1  ;;  %v5606_v4 = vrot.slane %v2212_v40, %v2130_v23 }
 0x19f   : > { %2205 = vst [vmem:[#allocation2 + $0xc8] sm:$0xff] %v2173_v25  ;;  %2207 = vst [vmem:[#allocation2 + $0xd8] sm:$0xff] %v2175_v31  ;;  %v2177_v38 = vadd.f32 %v5563_v29, %v1350_v36  ;;  %v2179_v39 = vadd.f32 %v5567_v30, %v1423_v37  ;;  %v5610_v28 = vrot.slane %v2212_v40, %v2138_v24 }
 0x1a0   : > { %2208 = vst [vmem:[#allocation2 + $0xe0] sm:$0xff] %v2176_v34  ;;  %2210 = vst [vmem:[#allocation2 + $0xf0] sm:$0xff] %v2178_v35  ;;  %v5614_v29 = vrot.slane %v2212_v40, %v2134_v26  ;;  %v5618_v30 = vrot.slane %v2212_v40, %v2142_v27 }
 0x1a1   : > { %2209 = vst [vmem:[#allocation2 + $0xe8] sm:$0xff] %v2177_v38  ;;  %2211 = vst [vmem:[#allocation2 + $0xf8] sm:$0xff] %v2179_v39 }
 0x1c3   : > { %v2014_v41 = vpop.f32.mrb[16].mxu0  ;;  %v2087_v42 = vpop.f32.mrb[16].mxu1 }
 0x1c4   : > { %v2234_v43 = vadd.f32 %v5606_v4, %v2014_v41  ;;  %v2236_v44 = vadd.f32 %v5610_v28, %v2087_v42  ;;  %v2016_v23 = vpop.f32.mrb[17].mxu0  ;;  %v2089_v45 = vpop.f32.mrb[17].mxu1 }
 0x1c5   : > { %v2235_v46 = vadd.f32 %v5614_v29, %v2016_v23  ;;  %v2237_v24 = vadd.f32 %v5618_v30, %v2089_v45  ;;  %v2018_v47 = vpop.f32.mrb[18].mxu0  ;;  %v2091_v48 = vpop.f32.mrb[18].mxu1 }
 0x1c6   : > { %2266 = vst [vmem:[#allocation3] sm:$0xff] %v2234_v43  ;;  %2268 = vst [vmem:[#allocation3 + $0x10] sm:$0xff] %v2236_v44  ;;  %v2238_v22 = vadd.f32 %v5606_v4, %v2018_v47  ;;  %v2240_v26 = vadd.f32 %v5610_v28, %v2091_v48  ;;  %v2020_v27 = vpop.f32.mrb[19].mxu0  ;;  %v2093_v49 = vpop.f32.mrb[19].mxu1 }
 0x1c7   : > { %2267 = vst [vmem:[#allocation3 + $0x8] sm:$0xff] %v2235_v46  ;;  %2269 = vst [vmem:[#allocation3 + $0x18] sm:$0xff] %v2237_v24  ;;  %v2239_v50 = vadd.f32 %v5614_v29, %v2020_v27  ;;  %v2241_v51 = vadd.f32 %v5618_v30, %v2093_v49 }
 0x1c8   : > { %2270 = vst [vmem:[#allocation3 + $0x20] sm:$0xff] %v2238_v22  ;;  %2272 = vst [vmem:[#allocation3 + $0x30] sm:$0xff] %v2240_v26 }
 0x1c9   : > { %2271 = vst [vmem:[#allocation3 + $0x28] sm:$0xff] %v2239_v50  ;;  %2273 = vst [vmem:[#allocation3 + $0x38] sm:$0xff] %v2241_v51 }
 0x1cb   : > { %v2024_v52 = vpop.f32.mrb[20].mxu0  ;;  %v2097_v53 = vpop.f32.mrb[20].mxu1 }
 0x1cc   : > { %v2242_v54 = vadd.f32 %v5606_v4, %v2024_v52  ;;  %v2244_v55 = vadd.f32 %v5610_v28, %v2097_v53  ;;  %v2026_v56 = vpop.f32.mrb[21].mxu0  ;;  %v2099_v57 = vpop.f32.mrb[21].mxu1 }
 0x1cd   : > { %v2243_v58 = vadd.f32 %v5614_v29, %v2026_v56  ;;  %v2245_v59 = vadd.f32 %v5618_v30, %v2099_v57  ;;  %v2028_v60 = vpop.f32.mrb[22].mxu0  ;;  %v2101_v61 = vpop.f32.mrb[22].mxu1 }
 0x1ce   : > { %2274 = vst [vmem:[#allocation3 + $0x40] sm:$0xff] %v2242_v54  ;;  %2276 = vst [vmem:[#allocation3 + $0x50] sm:$0xff] %v2244_v55  ;;  %v2246_v62 = vadd.f32 %v5606_v4, %v2028_v60  ;;  %v2248_v63 = vadd.f32 %v5610_v28, %v2101_v61  ;;  %v2030_v0 = vpop.f32.mrb[23].mxu0  ;;  %v2103_v1 = vpop.f32.mrb[23].mxu1 }
 0x1cf   : > { %2275 = vst [vmem:[#allocation3 + $0x48] sm:$0xff] %v2243_v58  ;;  %2277 = vst [vmem:[#allocation3 + $0x58] sm:$0xff] %v2245_v59  ;;  %v2247_v2 = vadd.f32 %v5614_v29, %v2030_v0  ;;  %v2249_v3 = vadd.f32 %v5618_v30, %v2103_v1 }
 0x1d0   : > { %2278 = vst [vmem:[#allocation3 + $0x60] sm:$0xff] %v2246_v62  ;;  %2280 = vst [vmem:[#allocation3 + $0x70] sm:$0xff] %v2248_v63 }
 0x1d1   : > { %2279 = vst [vmem:[#allocation3 + $0x68] sm:$0xff] %v2247_v2  ;;  %2281 = vst [vmem:[#allocation3 + $0x78] sm:$0xff] %v2249_v3 }
 0x1d3   : > { %v2034_v5 = vpop.f32.mrb[24].mxu0  ;;  %v2107_v6 = vpop.f32.mrb[24].mxu1 }
 0x1d4   : > { %v2250_v7 = vadd.f32 %v5606_v4, %v2034_v5  ;;  %v2252_v8 = vadd.f32 %v5610_v28, %v2107_v6  ;;  %v2036_v9 = vpop.f32.mrb[25].mxu0  ;;  %v2109_v10 = vpop.f32.mrb[25].mxu1 }
 0x1d5   : > { %v2251_v11 = vadd.f32 %v5614_v29, %v2036_v9  ;;  %v2253_v12 = vadd.f32 %v5618_v30, %v2109_v10  ;;  %v2038_v13 = vpop.f32.mrb[26].mxu0  ;;  %v2111_v14 = vpop.f32.mrb[26].mxu1 }
 0x1d6   : > { %2282 = vst [vmem:[#allocation3 + $0x80] sm:$0xff] %v2250_v7  ;;  %2284 = vst [vmem:[#allocation3 + $0x90] sm:$0xff] %v2252_v8  ;;  %v2254_v15 = vadd.f32 %v5606_v4, %v2038_v13  ;;  %v2256_v16 = vadd.f32 %v5610_v28, %v2111_v14  ;;  %v2040_v17 = vpop.f32.mrb[27].mxu0  ;;  %v2113_v18 = vpop.f32.mrb[27].mxu1 }
 0x1d7   : > { %2283 = vst [vmem:[#allocation3 + $0x88] sm:$0xff] %v2251_v11  ;;  %2285 = vst [vmem:[#allocation3 + $0x98] sm:$0xff] %v2253_v12  ;;  %v2255_v19 = vadd.f32 %v5614_v29, %v2040_v17  ;;  %v2257_v20 = vadd.f32 %v5618_v30, %v2113_v18 }
 0x1d8   : > { %2286 = vst [vmem:[#allocation3 + $0xa0] sm:$0xff] %v2254_v15  ;;  %2288 = vst [vmem:[#allocation3 + $0xb0] sm:$0xff] %v2256_v16 }
 0x1d9   : > { %2287 = vst [vmem:[#allocation3 + $0xa8] sm:$0xff] %v2255_v19  ;;  %2289 = vst [vmem:[#allocation3 + $0xb8] sm:$0xff] %v2257_v20 }
 0x1db   : > { %v2044_v21 = vpop.f32.mrb[28].mxu0  ;;  %v2117_v25 = vpop.f32.mrb[28].mxu1 }
 0x1dc   : > { %v2258_v31 = vadd.f32 %v5606_v4, %v2044_v21  ;;  %v2260_v32 = vadd.f32 %v5610_v28, %v2117_v25  ;;  %v2046_v33 = vpop.f32.mrb[29].mxu0  ;;  %v2119_v34 = vpop.f32.mrb[29].mxu1 }
 0x1dd   : > { %v2259_v35 = vadd.f32 %v5614_v29, %v2046_v33  ;;  %v2261_v36 = vadd.f32 %v5618_v30, %v2119_v34  ;;  %v2048_v37 = vpop.f32.mrb[30].mxu0  ;;  %v2121_v38 = vpop.f32.mrb[30].mxu1 }
 0x1de   : > { %2290 = vst [vmem:[#allocation3 + $0xc0] sm:$0xff] %v2258_v31  ;;  %2292 = vst [vmem:[#allocation3 + $0xd0] sm:$0xff] %v2260_v32  ;;  %v2262_v39 = vadd.f32 %v5606_v4, %v2048_v37  ;;  %v2264_v40 = vadd.f32 %v5610_v28, %v2121_v38  ;;  %v2050_v41 = vpop.f32.mrb[31].mxu0  ;;  %v2123_v42 = vpop.f32.mrb[31].mxu1 }
 0x1df   : > { %2291 = vst [vmem:[#allocation3 + $0xc8] sm:$0xff] %v2259_v35  ;;  %2293 = vst [vmem:[#allocation3 + $0xd8] sm:$0xff] %v2261_v36  ;;  %v2263_v43 = vadd.f32 %v5614_v29, %v2050_v41  ;;  %v2265_v44 = vadd.f32 %v5618_v30, %v2123_v42 }
 0x1e0   : > { %2294 = vst [vmem:[#allocation3 + $0xe0] sm:$0xff] %v2262_v39  ;;  %2296 = vst [vmem:[#allocation3 + $0xf0] sm:$0xff] %v2264_v40 }
 0x1e1   : > { %2295 = vst [vmem:[#allocation3 + $0xe8] sm:$0xff] %v2263_v43  ;;  %2297 = vst [vmem:[#allocation3 + $0xf8] sm:$0xff] %v2265_v44 }
 0x1e2 LB: >> { %v5657_v4 = vld [vmem:[#allocation10 + $0x4] ss:$16 sps:$4 sm:$0xff]   ;;  %v5659_v28 = vld [vmem:[#allocation10] ss:$16 sps:$4 sm:$0xff]   ;;  %v6053_v23 = vmov 0   ;;  %s5890_s28 = sshll.u32 %s4966_s0, 5  ;;  %s4966_s0 = sphi %s5652_s0, %s2303_s0  }
 0x1e3   : >> { %2533 = vmatprep.mubr.bf16.mxu0 %v6053_v23  ;;  %2576 = vmatprep.mubr.bf16.mxu1 %v6053_v23  ;;  %v5664_v29 = vld [vmem:[#allocation10 + $0x24] ss:$16 sps:$4 sm:$0xff]   ;;  %v5667_v30 = vld [vmem:[#allocation10 + $0x20] ss:$16 sps:$4 sm:$0xff]   ;;  %v5672_v46 = vld [vmem:[#allocation10 + $0xc] ss:$16 sps:$4 sm:$0xff]   ;;  %s5919_s23 = scalar_lea.vmem %s5189_s24, %s5890_s28 }
 0x1e4   : >> { %2501 = vmatprep.subr.bf16.mxu0 %v5657_v4  ;;  %v5670_v45 = vld [vmem:[#allocation10 + $0x44] ss:$16 sps:$4 sm:$0xff]   ;;  %v5674_v24 = vld [vmem:[#allocation10 + $0x8] ss:$16 sps:$4 sm:$0xff]   ;;  %v5677_v47 = vld [vmem:[#allocation10 + $0x40] ss:$16 sps:$4 sm:$0xff]   ;;  %2544 = vmatprep.subr.bf16.mxu1 %v5672_v46 }
 0x1e5   : >> { %2502 = vmatpush1.bf16.msra.mxu0 %v5659_v28  ;;  %v5681_v48 = vld [vmem:[#allocation10 + $0x64] ss:$16 sps:$4 sm:$0xff]   ;;  %2545 = vmatpush1.bf16.msra.mxu1 %v5674_v24  ;;  %v5684_v22 = vld [vmem:[#allocation10 + $0x2c] ss:$16 sps:$4 sm:$0xff]   ;;  %v5686_v26 = vld [vmem:[#allocation10 + $0x28] ss:$16 sps:$4 sm:$0xff]  }
 0x1e6   : >> { %2503 = vmatprep.subr.bf16.mxu0 %v5664_v29  ;;  %2546 = vmatprep.subr.bf16.mxu1 %v5684_v22  ;;  %v5690_v27 = vld [vmem:[#allocation10 + $0x60] ss:$16 sps:$4 sm:$0xff]   ;;  %v5692_v49 = vld [vmem:[#allocation10 + $0x84] ss:$16 sps:$4 sm:$0xff]   ;;  %v5694_v50 = vld [vmem:[#allocation10 + $0x4c] ss:$16 sps:$4 sm:$0xff]  }
 0x1e7   : >> { %v5698_v51 = vld [vmem:[#allocation10 + $0x48] ss:$16 sps:$4 sm:$0xff]   ;;  %v5701_v52 = vld [vmem:[#allocation10 + $0x6c] ss:$16 sps:$4 sm:$0xff]   ;;  %v5704_v53 = vld [vmem:[#allocation10 + $0x80] ss:$16 sps:$4 sm:$0xff]  }
 0x1e8   : >> { %v5707_v54 = vld [vmem:[#allocation10 + $0xa4] ss:$16 sps:$4 sm:$0xff]   ;;  %v5710_v55 = vld [vmem:[#allocation10 + $0x68] ss:$16 sps:$4 sm:$0xff]   ;;  %v5713_v56 = vld [vmem:[#allocation10 + $0x8c] ss:$16 sps:$4 sm:$0xff]  }
 0x1e9   : >> { %2504 = vmatpush1.bf16.msra.mxu0 %v5667_v30  ;;  %2547 = vmatpush1.bf16.msra.mxu1 %v5686_v26  ;;  %v5716_v57 = vld [vmem:[#allocation10 + $0xa0] ss:$16 sps:$4 sm:$0xff]   ;;  %v5718_v58 = vld [vmem:[#allocation10 + $0xc4] ss:$16 sps:$4 sm:$0xff]   ;;  %v5722_v59 = vld [vmem:[#allocation10 + $0x88] ss:$16 sps:$4 sm:$0xff]  }
 0x1ea   : >> { %2505 = vmatprep.subr.bf16.mxu0 %v5670_v45  ;;  %2548 = vmatprep.subr.bf16.mxu1 %v5694_v50  ;;  %v5725_v60 = vld [vmem:[#allocation10 + $0xac] ss:$16 sps:$4 sm:$0xff]   ;;  %v5727_v61 = vld [vmem:[#allocation10 + $0xc0] ss:$16 sps:$4 sm:$0xff]   ;;  %v5730_v62 = vld [vmem:[#allocation10 + $0xe4] ss:$16 sps:$4 sm:$0xff]  }
 0x1eb   : >> { %v5734_v63 = vld [vmem:[#allocation10 + $0xa8] ss:$16 sps:$4 sm:$0xff]   ;;  %v5737_v0 = vld [vmem:[#allocation10 + $0xcc] ss:$16 sps:$4 sm:$0xff]   ;;  %v5739_v1 = vld [vmem:[#allocation10 + $0xe0] ss:$16 sps:$4 sm:$0xff]  }
 0x1ec   : >> { %v5742_v2 = vld [vmem:[#allocation12 + $0x4] ss:$16 sps:$4 sm:$0xff]   ;;  %v5746_v3 = vld [vmem:[#allocation10 + $0xc8] ss:$16 sps:$4 sm:$0xff]   ;;  %v5749_v5 = vld [vmem:[#allocation10 + $0xec] ss:$16 sps:$4 sm:$0xff]  }
 0x1ed   : >> { %2506 = vmatpush1.bf16.msra.mxu0 %v5677_v47  ;;  %2549 = vmatpush1.bf16.msra.mxu1 %v5698_v51  ;;  %v2308_v6 = vld [vmem:[#allocation4] sm:$0xff]  ;;  %v5758_v9 = vld [vmem:[#allocation10 + $0xe8] ss:$16 sps:$4 sm:$0xff]   ;;  %v5761_v10 = vld [vmem:[#allocation12 + $0xc] ss:$16 sps:$4 sm:$0xff]   ;;  %s2866_s22 = sshra.s32 %s5890_s28, 3 }
 0x1ee   : >> { %2507 = vmatprep.subr.bf16.mxu0 %v5681_v48  ;;  %2550 = vmatprep.subr.bf16.mxu1 %v5701_v52  ;;  %v5751_v7 = vld [vmem:[#allocation12] ss:$16 sps:$4 sm:$0xff]   ;;  %v5754_v8 = vld [vmem:[#allocation12 + $0x24] ss:$16 sps:$4 sm:$0xff]   ;;  %v5771_v13 = vld [vmem:[#allocation12 + $0x8] ss:$16 sps:$4 sm:$0xff]  }
 0x1ef   : >> { %v5763_v11 = vld [vmem:[#allocation12 + $0x20] ss:$16 sps:$4 sm:$0xff]   ;;  %v5766_v12 = vld [vmem:[#allocation12 + $0x44] ss:$16 sps:$4 sm:$0xff]   ;;  %v5774_v14 = vld [vmem:[#allocation12 + $0x2c] ss:$16 sps:$4 sm:$0xff]  }
 0x1f0   : >> { %v5777_v15 = vld [vmem:[#allocation12 + $0x40] ss:$16 sps:$4 sm:$0xff]   ;;  %v5780_v16 = vld [vmem:[#allocation12 + $0x64] ss:$16 sps:$4 sm:$0xff]   ;;  %v5783_v17 = vld [vmem:[#allocation12 + $0x28] ss:$16 sps:$4 sm:$0xff]  }
 0x1f1   : >> { %2508 = vmatpush1.bf16.msra.mxu0 %v5690_v27  ;;  %2551 = vmatpush1.bf16.msra.mxu1 %v5710_v55  ;;  %v5786_v18 = vld [vmem:[#allocation12 + $0x4c] ss:$16 sps:$4 sm:$0xff]   ;;  %v5790_v19 = vld [vmem:[#allocation12 + $0x60] ss:$16 sps:$4 sm:$0xff]   ;;  %v5793_v20 = vld [vmem:[#allocation12 + $0x84] ss:$16 sps:$4 sm:$0xff]  }
 0x1f2   : >> { %2509 = vmatprep.subr.bf16.mxu0 %v5692_v49  ;;  %2552 = vmatprep.subr.bf16.mxu1 %v5713_v56  ;;  %v5796_v21 = vld [vmem:[#allocation12 + $0x48] ss:$16 sps:$4 sm:$0xff]   ;;  %v5799_v25 = vld [vmem:[#allocation12 + $0x6c] ss:$16 sps:$4 sm:$0xff]   ;;  %v5802_v31 = vld [vmem:[#allocation12 + $0x80] ss:$16 sps:$4 sm:$0xff]  }
 0x1f3   : >> { %v5805_v32 = vld [vmem:[#allocation12 + $0xa4] ss:$16 sps:$4 sm:$0xff]   ;;  %v5808_v33 = vld [vmem:[#allocation12 + $0x68] ss:$16 sps:$4 sm:$0xff]   ;;  %v5811_v34 = vld [vmem:[#allocation12 + $0x8c] ss:$16 sps:$4 sm:$0xff]  }
 0x1f4   : >> { %v5814_v35 = vld [vmem:[#allocation12 + $0xa0] ss:$16 sps:$4 sm:$0xff]   ;;  %v5817_v36 = vld [vmem:[#allocation12 + $0xc4] ss:$16 sps:$4 sm:$0xff]   ;;  %v5820_v37 = vld [vmem:[#allocation12 + $0x88] ss:$16 sps:$4 sm:$0xff]  }
 0x1f5   : >> { %2510 = vmatpush1.bf16.msra.mxu0 %v5704_v53  ;;  %2553 = vmatpush1.bf16.msra.mxu1 %v5722_v59  ;;  %6073 = vst [vmem:[#allocation16_spill] sm:$0xff] %v5817_v36  ;;  %v5823_v38 = vld [vmem:[#allocation12 + $0xac] ss:$16 sps:$4 sm:$0xff]   ;;  %v5826_v39 = vld [vmem:[#allocation12 + $0xc0] ss:$16 sps:$4 sm:$0xff]   ;;  %s4303_s11 = sshll.u32 %s2866_s22, 5 }
 0x1f6   : >> { %2511 = vmatprep.subr.bf16.mxu0 %v5707_v54  ;;  %2554 = vmatprep.subr.bf16.mxu1 %v5725_v60  ;;  %v5829_v40 = vld [vmem:[#allocation12 + $0xe4] ss:$16 sps:$4 sm:$0xff]   ;;  %v5832_v41 = vld [vmem:[#allocation12 + $0xa8] ss:$16 sps:$4 sm:$0xff]   ;;  %v5835_v42 = vld [vmem:[#allocation12 + $0xcc] ss:$16 sps:$4 sm:$0xff]  }
 0x1f7   : >> { %6074 = vst [vmem:[#allocation17_spill] sm:$0xff] %v5829_v40  ;;  %v5838_v43 = vld [vmem:[#allocation12 + $0xe0] ss:$16 sps:$4 sm:$0xff]   ;;  %v5842_v44 = vld [vmem:[#allocation12 + $0xc8] ss:$16 sps:$4 sm:$0xff]   ;;  %s2870_s21 = scalar_lea.vmem [#allocation2], %s4303_s11 }
 0x1f8   : >> { %s4127_s15 = sshll.u32 %s4966_s0, 1  ;;  %s4306_s25 = sadd.s32 16, %s5890_s28 }
 0x1f9   : >> { %2512 = vmatpush1.bf16.msra.mxu0 %v5716_v57  ;;  %2555 = vmatpush1.bf16.msra.mxu1 %v5734_v63  ;;  %s5896_s16 = ssub.s32 3, %s4127_s15  ;;  %s3584_s26 = sshra.s32 %s4306_s25, 3 }
 0x1fa   : >> { %2513 = vmatprep.subr.bf16.mxu0 %v5718_v58  ;;  %2556 = vmatprep.subr.bf16.mxu1 %v5737_v0  ;;  %s4129_s14 = sshll.u32 %s5896_s16, 4  ;;  %s4307_s17 = sshll.u32 %s3584_s26, 5 }
 0x1fb   : >> { %s2887_s18 = sshra.s32 %s4129_s14, 3  ;;  %s3019_s27 = scalar_lea.vmem %s5204_s30, %s4129_s14 }
 0x1fc   : >> { %s4304_s20 = sshll.u32 %s2887_s18, 5  ;;  %s5965_s22 = scalar_lea.vmem [#allocation2], %s4307_s17 }
 0x1fd   : >> { %2514 = vmatpush1.bf16.msra.mxu0 %v5727_v61  ;;  %2557 = vmatpush1.bf16.msra.mxu1 %v5746_v3  ;;  %s5901_s29 = scalar_lea.vmem [#allocation3], %s4304_s20  ;;  %s5977_s28 = ssub.s32 2, %s4127_s15 }
 0x1fe   : >> { %2515 = vmatprep.subr.bf16.mxu0 %v5730_v62  ;;  %2558 = vmatprep.subr.bf16.mxu1 %v5749_v5  ;;  %s4211_s11 = sshll.u32 %s5977_s28, 4  ;;  %s2303_s0 = sadd.s32 1, %s4966_s0  }
 0x1ff   : >> { %s3737_s14 = scalar_lea.vmem %s5204_s30, %s4211_s11  ;;  %p2300_p11 = scmp.ge.s32.totalorder %s2303_s0, 2  }
 0x200   : > { %p4296_p12 = scmp.ne.s32.totalorder (%p2300_p11), %s5063_s19, 1 }
 0x201   : >> { %2516 = vmatpush1.bf16.msra.mxu0 %v5739_v1  ;;  %2559 = vmatpush1.bf16.msra.mxu1 %v5758_v9 }
 0x202   : >> { %2780 = vmatprep.subr.bf16.mxu0 %v5742_v2  ;;  %2823 = vmatprep.subr.bf16.mxu1 %v5761_v10 }
 0x204   : >> { %2534 = vmatmul.mubr.bf16.vlgmr.msra.gmra.mrb[0].mxu0 %v2308_v6  ;;  %2577 = vmatmul.mubr.bf16.vlgmr.msra.gmra.mrb[0].mxu1 %v2308_v6  ;;  %v5845_v6 = vld [vmem:[#allocation12 + $0xec] ss:$16 sps:$4 sm:$0xff]  }
 0x205   : >> { %2781 = vmatpush1.bf16.msra.mxu0 %v5751_v7  ;;  %2812 = vmatprep.mubr.bf16.mxu0 %v6053_v23 }
 0x206   : >> { %2782 = vmatprep.subr.bf16.mxu0 %v5754_v8  ;;  %2824 = vmatpush1.bf16.msra.mxu1 %v5771_v13 }
 0x207   : >> { %2825 = vmatprep.subr.bf16.mxu1 %v5774_v14  ;;  %2855 = vmatprep.mubr.bf16.mxu1 %v6053_v23  ;;  %v2587_v23 = vld [vmem:[#allocation6] sm:$0xff] }
 0x209   : >> { %2783 = vmatpush1.bf16.msra.mxu0 %v5763_v11 }
 0x20a   : >> { %2784 = vmatprep.subr.bf16.mxu0 %v5766_v12  ;;  %2826 = vmatpush1.bf16.msra.mxu1 %v5783_v17 }
 0x20b   : >> { %2827 = vmatprep.subr.bf16.mxu1 %v5786_v18 }
 0x20d   : >> { %2785 = vmatpush1.bf16.msra.mxu0 %v5777_v15 }
 0x20e   : >> { %2786 = vmatprep.subr.bf16.mxu0 %v5780_v16  ;;  %2828 = vmatpush1.bf16.msra.mxu1 %v5796_v21 }
 0x20f   : >> { %2829 = vmatprep.subr.bf16.mxu1 %v5799_v25 }
 0x211   : >> { %2787 = vmatpush1.bf16.msra.mxu0 %v5790_v19 }
 0x212   : >> { %2788 = vmatprep.subr.bf16.mxu0 %v5793_v20  ;;  %2830 = vmatpush1.bf16.msra.mxu1 %v5808_v33 }
 0x213   : >> { %2831 = vmatprep.subr.bf16.mxu1 %v5811_v34 }
 0x215   : >> { %2789 = vmatpush1.bf16.msra.mxu0 %v5802_v31 }
 0x216   : >> { %2790 = vmatprep.subr.bf16.mxu0 %v5805_v32  ;;  %2832 = vmatpush1.bf16.msra.mxu1 %v5820_v37 }
 0x217   : >> { %2833 = vmatprep.subr.bf16.mxu1 %v5823_v38 }
 0x219   : >> { %2791 = vmatpush1.bf16.msra.mxu0 %v5814_v35 }
 0x21a   : >> { %2792 = vmatprep.subr.bf16.mxu0 %v5817_v36  ;;  %2834 = vmatpush1.bf16.msra.mxu1 %v5832_v41  ;;  %v5849_v36 = vld [vmem:[#allocation12 + $0xe8] ss:$16 sps:$4 sm:$0xff]  }
 0x21b   : >> { %2835 = vmatprep.subr.bf16.mxu1 %v5835_v42 }
 0x21d   : >> { %2793 = vmatpush1.bf16.msra.mxu0 %v5826_v39 }
 0x21e   : >> { %2794 = vmatprep.subr.bf16.mxu0 %v5829_v40  ;;  %2836 = vmatpush1.bf16.msra.mxu1 %v5842_v44  ;;  %v6075_v40 = vmov 0  }
 0x21f   : >> { %2837 = vmatprep.subr.bf16.mxu1 %v5845_v6 }
 0x221   : >> { %2795 = vmatpush1.bf16.msra.mxu0 %v5838_v43 }
 0x222   : >> { %3219 = vmatprep.subr.bf16.mxu0 %v5657_v4  ;;  %2838 = vmatpush1.bf16.msra.mxu1 %v5849_v36  ;;  %v2871_v4 = vld [vmem:[%s2870_s21] sm:$0xff] }
 0x223   : >> { %3262 = vmatprep.subr.bf16.mxu1 %v5672_v46  ;;  %v2876_v46 = vld [vmem:[%s2870_s21 + $0x28] sm:$0xff] }
 0x224   : >> { %2813 = vmatmul.mubr.bf16.vlgmr.msra.gmra.mrb[4].mxu0 %v2587_v23 }
 0x225   : >> { %3220 = vmatpush1.bf16.msra.mxu0 %v5659_v28  ;;  %3251 = vmatprep.mubr.bf16.mxu0 %v6075_v40  ;;  %v2872_v28 = vld [vmem:[%s2870_s21 + $0x8] sm:$0xff] }
 0x226   : >> { %3221 = vmatprep.subr.bf16.mxu0 %v5664_v29  ;;  %2856 = vmatmul.mubr.bf16.vlgmr.msra.gmra.mrb[4].mxu1 %v2587_v23  ;;  %v2875_v29 = vld [vmem:[%s2870_s21 + $0x20] sm:$0xff] }
 0x227   : >> { %3263 = vmatpush1.bf16.msra.mxu1 %v5674_v24  ;;  %3294 = vmatprep.mubr.bf16.mxu1 %v6075_v40 }
 0x228   : >> { %3264 = vmatprep.subr.bf16.mxu1 %v5684_v22 }
 0x229   : >> { %3222 = vmatpush1.bf16.msra.mxu0 %v5667_v30 }
 0x22a   : >> { %3223 = vmatprep.subr.bf16.mxu0 %v5670_v45 }
 0x22b   : >> { %3265 = vmatpush1.bf16.msra.mxu1 %v5686_v26 }
 0x22c   : >> { %3266 = vmatprep.subr.bf16.mxu1 %v5694_v50  ;;  %v2874_v50 = vld [vmem:[%s2870_s21 + $0x18] sm:$0xff] }
 0x22d   : >> { %3224 = vmatpush1.bf16.msra.mxu0 %v5677_v47 }
 0x22e   : >> { %3225 = vmatprep.subr.bf16.mxu0 %v5681_v48 }
 0x22f   : >> { %3267 = vmatpush1.bf16.msra.mxu1 %v5698_v51 }
 0x230   : >> { %3268 = vmatprep.subr.bf16.mxu1 %v5701_v52 }
 0x231   : >> { %3226 = vmatpush1.bf16.msra.mxu0 %v5690_v27 }
 0x232   : >> { %3227 = vmatprep.subr.bf16.mxu0 %v5692_v49 }
 0x233   : >> { %3269 = vmatpush1.bf16.msra.mxu1 %v5710_v55  ;;  %v2878_v55 = vld [vmem:[%s2870_s21 + $0x38] sm:$0xff] }
 0x234   : >> { %3270 = vmatprep.subr.bf16.mxu1 %v5713_v56  ;;  %v2873_v56 = vld [vmem:[%s2870_s21 + $0x10] sm:$0xff] }
 0x235   : >> { %3228 = vmatpush1.bf16.msra.mxu0 %v5704_v53 }
 0x236   : >> { %3229 = vmatprep.subr.bf16.mxu0 %v5707_v54 }
 0x237   : >> { %3271 = vmatpush1.bf16.msra.mxu1 %v5722_v59 }
 0x238   : >> { %3272 = vmatprep.subr.bf16.mxu1 %v5725_v60  ;;  %v2877_v60 = vld [vmem:[%s2870_s21 + $0x30] sm:$0xff]  ;;  %s3605_s21 = sshra.s32 %s4211_s11, 3 }
 0x239   : >> { %3230 = vmatpush1.bf16.msra.mxu0 %v5716_v57  ;;  %s4308_s15 = sshll.u32 %s3605_s21, 5 }
 0x23a   : >> { %3231 = vmatprep.subr.bf16.mxu0 %v5718_v58  ;;  %s5983_s16 = scalar_lea.vmem [#allocation3], %s4308_s15 }
 0x23b   : >> { %3273 = vmatpush1.bf16.msra.mxu1 %v5734_v63 }
 0x23c   : >> { %3274 = vmatprep.subr.bf16.mxu1 %v5737_v0 }
 0x23d   : >> { %3232 = vmatpush1.bf16.msra.mxu0 %v5727_v61 }
 0x23e   : >> { %3233 = vmatprep.subr.bf16.mxu0 %v5730_v62 }
 0x23f   : >> { %3275 = vmatpush1.bf16.msra.mxu1 %v5746_v3 }
 0x240   : >> { %3276 = vmatprep.subr.bf16.mxu1 %v5749_v5 }
 0x241   : >> { %3234 = vmatpush1.bf16.msra.mxu0 %v5739_v1 }
 0x242   : >> { %3498 = vmatprep.subr.bf16.mxu0 %v5742_v2 }
 0x243   : >> { %3277 = vmatpush1.bf16.msra.mxu1 %v5758_v9 }
 0x244   : >> { %3541 = vmatprep.subr.bf16.mxu1 %v5761_v10 }
 0x2d7   : >> { %v2535_v23 = vpop.f32.mrb[0].mxu0  ;;  %v2578_v52 = vpop.f32.mrb[0].mxu1 }
 0x2d8   : >> { %v2879_v30 = vadd.f32 %v2871_v4, %v2535_v23  ;;  %v2537_v45 = vpop.f32.mrb[1].mxu0  ;;  %v2580_v54 = vpop.f32.mrb[1].mxu1  ;;  %v2881_v62 = vadd.f32 %v2873_v56, %v2578_v52 }
 0x2d9   : >> { %v2880_v24 = vadd.f32 %v2872_v28, %v2537_v45  ;;  %v2539_v47 = vpop.f32.mrb[2].mxu0  ;;  %v2882_v57 = vadd.f32 %v2874_v50, %v2580_v54  ;;  %v2582_v58 = vpop.f32.mrb[2].mxu1 }
 0x2da   : >> { %v4198_v48 = vmul.f32 -1.442695, %v2879_v30  ;;  %v2883_v22 = vadd.f32 %v2875_v29, %v2539_v47  ;;  %v2541_v26 = vpop.f32.mrb[3].mxu0  ;;  %v2584_v59 = vpop.f32.mrb[3].mxu1  ;;  %v2885_v0 = vadd.f32 %v2877_v60, %v2582_v58 }
 0x2db   : >> { %v4200_v27 = vmul.f32 -1.442695, %v2880_v24  ;;  %v2884_v49 = vadd.f32 %v2876_v46, %v2541_v26  ;;  %v2886_v61 = vadd.f32 %v2878_v55, %v2584_v59  ;;  %v4202_v63 = vmul.f32 -1.442695, %v2882_v57  ;;  %v2946_v24 = vld [vmem:[#allocation5] sm:$0xff]  ;;  %v2947_v26 = vld [vmem:[#allocation5 + $0x8] sm:$0xff] }
 0x2dc   : >> { %4732 = vpow2.f32 %v4198_v48  ;;  %v4199_v51 = vmul.f32 -1.442695, %v2883_v22  ;;  %v2893_v55 = vld [vmem:[%s5901_s29 + $0x8] sm:$0xff]  ;;  %v2896_v59 = vld [vmem:[%s5901_s29 + $0x20] sm:$0xff] }
 0x2dd   : >> { %4734 = vpow2.f32 %v4200_v27  ;;  %v4201_v53 = vmul.f32 -1.442695, %v2884_v49  ;;  %v4203_v1 = vmul.f32 -1.442695, %v2886_v61 }
 0x2de   : >> { %4736 = vpow2.f32 %v4199_v51  ;;  %v2892_v51 = vld [vmem:[%s5901_s29] sm:$0xff] }
 0x2df   : >> { %4738 = vpow2.f32 %v4201_v53 }
 0x2e0   : >> { %4740 = vtanh.f32 %v2881_v62  ;;  %v2897_v62 = vld [vmem:[%s5901_s29 + $0x28] sm:$0xff] }
 0x2e1   : >> { %4742 = vpow2.f32 %v4202_v63 }
 0x2e2   : >> { %4744 = vtanh.f32 %v2885_v0 }
 0x2e3   : >> { %4746 = vpow2.f32 %v4203_v1 }
 0x2e6   : >> { %v4733_v2 = vpop.eup %4732 }
 0x2e7   : >> { %v4735_v3 = vpop.eup %4734  ;;  %v2914_v5 = vadd.f32 1.0, %v4733_v2 }
 0x2e8   : >> { %v4737_v9 = vpop.eup %4736  ;;  %v2926_v10 = vadd.f32 1.0, %v4735_v3 }
 0x2e9   : >> { %v4739_v4 = vpop.eup %4738  ;;  %4748 = vrcp.f32 %v2914_v5  ;;  %v2915_v28 = vadd.f32 1.0, %v4737_v9 }
 0x2ea   : >> { %4750 = vrcp.f32 %v2926_v10  ;;  %v2927_v23 = vadd.f32 1.0, %v4739_v4  ;;  %v4741_v29 = vpop.eup %4740  ;;  %v2895_v4 = vld [vmem:[%s5901_s29 + $0x18] sm:$0xff] }
 0x2eb   : >> { %4752 = vrcp.f32 %v2915_v28  ;;  %v4743_v30 = vpop.eup %4742 }
 0x2ec   : >> { %4754 = vrcp.f32 %v2927_v23  ;;  %v4745_v45 = vpop.eup %4744  ;;  %v2940_v48 = vadd.f32 1.0, %v4743_v30 }
 0x2ed   : >> { %v4747_v46 = vpop.eup %4746 }
 0x2ee   : >> { %v2941_v54 = vadd.f32 1.0, %v4747_v46  ;;  %4756 = vrcp.f32 %v2940_v48  ;;  %v2894_v46 = vld [vmem:[%s5901_s29 + $0x10] sm:$0xff] }
 0x2f3   : >> { %v4749_v47 = vpop.eup %4748 }
 0x2f4   : >> { %v4751_v22 = vpop.eup %4750  ;;  %v2950_v27 = vmul.f32 %v4749_v47, %v4741_v29 }
 0x2f5   : >> { %v4753_v49 = vpop.eup %4752  ;;  %v2948_v50 = vmul.f32 %v4751_v22, %v2946_v24  ;;  %v2898_v22 = vld [vmem:[%s5901_s29 + $0x30] sm:$0xff] }
 0x2f6   : >> { %v4755_v52 = vpop.eup %4754  ;;  %v2951_v53 = vmul.f32 %v4753_v49, %v4745_v45  ;;  %v2899_v45 = vld [vmem:[%s5901_s29 + $0x38] sm:$0xff] }
 0x2f7   : >> { %v2949_v56 = vmul.f32 %v4755_v52, %v2947_v26  ;;  %v5905_v57 = vadd.f32 %v2950_v27, %v2948_v50  ;;  %v2814_v58 = vpop.f32.mrb[4].mxu0 }
 0x2f8   : >> { %v2900_v60 = vadd.f32 %v2892_v51, %v2814_v58  ;;  %v2816_v61 = vpop.f32.mrb[5].mxu0  ;;  %v4757_v27 = vpop.eup %4756 }
 0x2f9   : >> { %4758 = vtanh.f32 %v5905_v57  ;;  %v5910_v63 = vadd.f32 %v2951_v53, %v2949_v56  ;;  %v2901_v0 = vadd.f32 %v2893_v55, %v2816_v61  ;;  %v2818_v1 = vpop.f32.mrb[6].mxu0  ;;  %v2857_v23 = vpop.f32.mrb[4].mxu1 }
 0x2fa   : >> { %4760 = vrcp.f32 %v2941_v54  ;;  %v4204_v2 = vmul.f32 -1.442695, %v2900_v60  ;;  %v2904_v3 = vadd.f32 %v2896_v59, %v2818_v1  ;;  %v2820_v5 = vpop.f32.mrb[7].mxu0  ;;  %v2859_v30 = vpop.f32.mrb[5].mxu1  ;;  %v2902_v49 = vadd.f32 %v2894_v46, %v2857_v23 }
 0x2fb   : >> { %4762 = vtanh.f32 %v5910_v63  ;;  %v4206_v9 = vmul.f32 -1.442695, %v2901_v0  ;;  %v2905_v10 = vadd.f32 %v2897_v62, %v2820_v5  ;;  %v2903_v24 = vadd.f32 %v2895_v4, %v2859_v30  ;;  %v2861_v47 = vpop.f32.mrb[6].mxu1  ;;  %v2996_v4 = vld [vmem:[#allocation7] sm:$0xff] }
 0x2fc   : >> { %4764 = vpow2.f32 %v4204_v2  ;;  %v4205_v28 = vmul.f32 -1.442695, %v2904_v3  ;;  %v2863_v48 = vpop.f32.mrb[7].mxu1  ;;  %v2906_v52 = vadd.f32 %v2898_v22, %v2861_v47 }
 0x2fd   : >> { %4766 = vpow2.f32 %v4206_v9  ;;  %v4207_v29 = vmul.f32 -1.442695, %v2905_v10  ;;  %v2907_v26 = vadd.f32 %v2899_v45, %v2863_v48  ;;  %v4208_v50 = vmul.f32 -1.442695, %v2903_v24 }
 0x2fe   : >> { %4768 = vpow2.f32 %v4205_v28 }
 0x2ff   : >> { %4770 = vpow2.f32 %v4207_v29  ;;  %v4209_v55 = vmul.f32 -1.442695, %v2907_v26 }
 0x300   : >> { %4772 = vtanh.f32 %v2902_v49 }
 0x301   : >> { %4774 = vpow2.f32 %v4208_v50  ;;  %v3592_v50 = vld [vmem:[%s5965_s22 + $0x18] sm:$0xff] }
 0x302   : >> { %4776 = vtanh.f32 %v2906_v52 }
 0x303   : >> { %v4759_v51 = vpop.eup %4758  ;;  %4778 = vpow2.f32 %v4209_v55 }
 0x304   : >> { %v4761_v53 = vpop.eup %4760  ;;  %v2956_v54 = vmul.f32 %v4759_v51, %v4757_v27 }
 0x305   : >> { %v4763_v56 = vpop.eup %4762 }
 0x306   : >> { %v4765_v58 = vpop.eup %4764  ;;  %3017 = vst [vmem:[%s5919_s23] sm:$0xff] %v2956_v54  ;;  %v2957_v59 = vmul.f32 %v4763_v56, %v4761_v53  ;;  %v3596_v53 = vld [vmem:[%s5965_s22 + $0x38] sm:$0xff] }
 0x307   : >> { %v4767_v60 = vpop.eup %4766  ;;  %v2964_v61 = vadd.f32 1.0, %v4765_v58 }
 0x308   : >> { %v4769_v62 = vpop.eup %4768  ;;  %v3012_v0 = vpack.c.bf16 %v2957_v59, %v2956_v54  ;;  %3018 = vst [vmem:[%s5919_s23 + $0x8] sm:$0xff] %v2957_v59  ;;  %v2976_v1 = vadd.f32 1.0, %v4767_v60  ;;  %v3591_v54 = vld [vmem:[%s5965_s22 + $0x10] sm:$0xff] }
 0x309   : >> { %v4771_v2 = vpop.eup %4770  ;;  %4780 = vrcp.f32 %v2964_v61  ;;  %v2965_v3 = vadd.f32 1.0, %v4769_v62  ;;  %v3595_v60 = vld [vmem:[%s5965_s22 + $0x30] sm:$0xff] }
 0x30a   : >> { %4782 = vrcp.f32 %v2976_v1  ;;  %v2977_v5 = vadd.f32 1.0, %v4771_v2  ;;  %3252 = vmatmul.mubr.bf16.vlgmr.msra.gmra.mrb[8].mxu0 %v3012_v0  ;;  %3295 = vmatmul.mubr.bf16.vlgmr.msra.gmra.mrb[8].mxu1 %v3012_v0  ;;  %v4773_v9 = vpop.eup %4772 }
 0x30b   : >> { %4784 = vrcp.f32 %v2965_v3  ;;  %3499 = vmatpush1.bf16.msra.mxu0 %v5751_v7  ;;  %3542 = vmatpush1.bf16.msra.mxu1 %v5771_v13  ;;  %v4775_v10 = vpop.eup %4774 }
 0x30c   : >> { %4786 = vrcp.f32 %v2977_v5  ;;  %3500 = vmatprep.subr.bf16.mxu0 %v5754_v8  ;;  %3543 = vmatprep.subr.bf16.mxu1 %v5774_v14  ;;  %v4777_v7 = vpop.eup %4776  ;;  %v2990_v28 = vadd.f32 1.0, %v4775_v10 }
 0x30d   : >> { %3530 = vmatprep.mubr.bf16.mxu0 %v6075_v40  ;;  %3573 = vmatprep.mubr.bf16.mxu1 %v6075_v40  ;;  %v4779_v13 = vpop.eup %4778  ;;  %v2997_v40 = vld [vmem:[#allocation7 + $0x8] sm:$0xff] }
 0x30e   : >> { %v2991_v29 = vadd.f32 1.0, %v4779_v13  ;;  %4788 = vrcp.f32 %v2990_v28 }
 0x30f   : >> { %3501 = vmatpush1.bf16.msra.mxu0 %v5763_v11  ;;  %3544 = vmatpush1.bf16.msra.mxu1 %v5783_v17 }
 0x310   : >> { %3502 = vmatprep.subr.bf16.mxu0 %v5766_v12  ;;  %3545 = vmatprep.subr.bf16.mxu1 %v5786_v18 }
 0x313   : >> { %v4781_v8 = vpop.eup %4780  ;;  %3503 = vmatpush1.bf16.msra.mxu0 %v5777_v15  ;;  %3546 = vmatpush1.bf16.msra.mxu1 %v5796_v21 }
 0x314   : >> { %v4783_v14 = vpop.eup %4782  ;;  %v3000_v23 = vmul.f32 %v4781_v8, %v4773_v9  ;;  %3504 = vmatprep.subr.bf16.mxu0 %v5780_v16  ;;  %3547 = vmatprep.subr.bf16.mxu1 %v5799_v25  ;;  %v6076_v16 = vld [vmem:[#allocation16_spill] sm:$0xff] }
 0x315   : >> { %v4785_v11 = vpop.eup %4784  ;;  %v2998_v12 = vmul.f32 %v4783_v14, %v2996_v4 }
 0x316   : >> { %v4787_v17 = vpop.eup %4786  ;;  %v3001_v18 = vmul.f32 %v4785_v11, %v4777_v7 }
 0x317   : >> { %v2999_v30 = vmul.f32 %v4787_v17, %v2997_v40  ;;  %v5937_v45 = vadd.f32 %v3000_v23, %v2998_v12  ;;  %3505 = vmatpush1.bf16.msra.mxu0 %v5790_v19  ;;  %3548 = vmatpush1.bf16.msra.mxu1 %v5808_v33  ;;  %v3610_v17 = vld [vmem:[%s5983_s16] sm:$0xff] }
 0x318   : >> { %3506 = vmatprep.subr.bf16.mxu0 %v5793_v20  ;;  %3549 = vmatprep.subr.bf16.mxu1 %v5811_v34  ;;  %v4789_v19 = vpop.eup %4788 }
 0x319   : >> { %4790 = vtanh.f32 %v5937_v45  ;;  %v5944_v15 = vadd.f32 %v3001_v18, %v2999_v30 }
 0x31a   : >> { %4792 = vrcp.f32 %v2991_v29  ;;  %v3611_v29 = vld [vmem:[%s5983_s16 + $0x8] sm:$0xff] }
 0x31b   : >> { %4794 = vtanh.f32 %v5944_v15  ;;  %3507 = vmatpush1.bf16.msra.mxu0 %v5802_v31  ;;  %3550 = vmatpush1.bf16.msra.mxu1 %v5820_v37  ;;  %v6077_v31 = vld [vmem:[#allocation17_spill] sm:$0xff]  ;;  %v3590_v37 = vld [vmem:[%s5965_s22 + $0x8] sm:$0xff] }
 0x31c   : >> { %3508 = vmatprep.subr.bf16.mxu0 %v5805_v32  ;;  %3551 = vmatprep.subr.bf16.mxu1 %v5823_v38 }
 0x31f   : >> { %3509 = vmatpush1.bf16.msra.mxu0 %v5814_v35  ;;  %3552 = vmatpush1.bf16.msra.mxu1 %v5832_v41  ;;  %v3589_v35 = vld [vmem:[%s5965_s22] sm:$0xff] }
 0x320   : >> { %3510 = vmatprep.subr.bf16.mxu0 %v6076_v16  ;;  %3553 = vmatprep.subr.bf16.mxu1 %v5835_v42  ;;  %v3593_v41 = vld [vmem:[%s5965_s22 + $0x20] sm:$0xff] }
 0x323   : >> { %v4791_v20 = vpop.eup %4790  ;;  %3511 = vmatpush1.bf16.msra.mxu0 %v5826_v39  ;;  %3554 = vmatpush1.bf16.msra.mxu1 %v5842_v44  ;;  %v3594_v44 = vld [vmem:[%s5965_s22 + $0x28] sm:$0xff] }
 0x324   : >> { %v4793_v21 = vpop.eup %4792  ;;  %v3006_v25 = vmul.f32 %v4791_v20, %v4789_v19  ;;  %3512 = vmatprep.subr.bf16.mxu0 %v6077_v31  ;;  %3555 = vmatprep.subr.bf16.mxu1 %v5845_v6 }
 0x325   : >> { %v4795_v32 = vpop.eup %4794 }
 0x326   : >> { %3020 = vst [vmem:[%s3019_s27] sm:$0xff] %v3006_v25  ;;  %v3007_v33 = vmul.f32 %v4795_v32, %v4793_v21 }
 0x327   : >> { %3513 = vmatpush1.bf16.msra.mxu0 %v5838_v43  ;;  %3556 = vmatpush1.bf16.msra.mxu1 %v5849_v36 }
 0x328   : >> { %v3014_v34 = vpack.c.bf16 %v3007_v33, %v3006_v25  ;;  %3021 = vst [vmem:[%s3019_s27 + $0x8] sm:$0xff] %v3007_v33  ;;  %v3614_v25 = vld [vmem:[%s5983_s16 + $0x20] sm:$0xff] }
 0x32a   : >> { %3531 = vmatmul.mubr.bf16.vlgmr.msra.gmra.mrb[12].mxu0 %v3014_v34  ;;  %3574 = vmatmul.mubr.bf16.vlgmr.msra.gmra.mrb[12].mxu1 %v3014_v34  ;;  %v3615_v34 = vld [vmem:[%s5983_s16 + $0x28] sm:$0xff] }
 0x3dd   : >> { %v3253_v38 = vpop.f32.mrb[8].mxu0  ;;  %v3296_v39 = vpop.f32.mrb[8].mxu1 }
 0x3de   : >> { %v3597_v36 = vadd.f32 %v3589_v35, %v3253_v38  ;;  %v3255_v42 = vpop.f32.mrb[9].mxu0  ;;  %v3298_v43 = vpop.f32.mrb[9].mxu1  ;;  %v3599_v58 = vadd.f32 %v3591_v54, %v3296_v39 }
 0x3df   : >> { %v3598_v6 = vadd.f32 %v3590_v37, %v3255_v42  ;;  %v3257_v46 = vpop.f32.mrb[10].mxu0  ;;  %v3300_v24 = vpop.f32.mrb[10].mxu1  ;;  %v3600_v55 = vadd.f32 %v3592_v50, %v3298_v43 }
 0x3e0   : >> { %v4280_v47 = vmul.f32 -1.442695, %v3597_v36  ;;  %v3601_v48 = vadd.f32 %v3593_v41, %v3257_v46  ;;  %v3259_v22 = vpop.f32.mrb[11].mxu0  ;;  %v3302_v26 = vpop.f32.mrb[11].mxu1  ;;  %v3603_v2 = vadd.f32 %v3595_v60, %v3300_v24 }
 0x3e1   : >> { %v4282_v27 = vmul.f32 -1.442695, %v3598_v6  ;;  %v3602_v49 = vadd.f32 %v3594_v44, %v3259_v22  ;;  %v3604_v56 = vadd.f32 %v3596_v53, %v3302_v26  ;;  %v4284_v59 = vmul.f32 -1.442695, %v3600_v55  ;;  %v3617_v26 = vld [vmem:[%s5983_s16 + $0x38] sm:$0xff] }
 0x3e2   : >> { %4796 = vpow2.f32 %v4280_v47  ;;  %v4281_v51 = vmul.f32 -1.442695, %v3601_v48  ;;  %v3612_v48 = vld [vmem:[%s5983_s16 + $0x10] sm:$0xff] }
 0x3e3   : >> { %4798 = vpow2.f32 %v4282_v27  ;;  %v4283_v52 = vmul.f32 -1.442695, %v3602_v49  ;;  %v4285_v61 = vmul.f32 -1.442695, %v3604_v56 }
 0x3e4   : >> { %4800 = vpow2.f32 %v4281_v51  ;;  %v3616_v51 = vld [vmem:[%s5983_s16 + $0x30] sm:$0xff] }
 0x3e5   : >> { %4802 = vpow2.f32 %v4283_v52 }
 0x3e6   : >> { %4804 = vtanh.f32 %v3599_v58 }
 0x3e7   : >> { %4806 = vpow2.f32 %v4284_v59 }
 0x3e8   : >> { %4808 = vpow2.f32 %v4285_v61 }
 0x3ec   : >> { %v4797_v62 = vpop.eup %4796 }
 0x3ed   : >> { %v4799_v0 = vpop.eup %4798  ;;  %v3632_v1 = vadd.f32 1.0, %v4797_v62 }
 0x3ee   : >> { %v3644_v3 = vadd.f32 1.0, %v4799_v0  ;;  %v4801_v5 = vpop.eup %4800 }
 0x3ef   : >> { %4810 = vrcp.f32 %v3632_v1  ;;  %v3633_v9 = vadd.f32 1.0, %v4801_v5  ;;  %v4803_v10 = vpop.eup %4802 }
 0x3f0   : >> { %4812 = vrcp.f32 %v3644_v3  ;;  %v3645_v7 = vadd.f32 1.0, %v4803_v10  ;;  %v4805_v13 = vpop.eup %4804 }
 0x3f1   : >> { %4814 = vtanh.f32 %v3603_v2  ;;  %v4807_v4 = vpop.eup %4806 }
 0x3f2   : >> { %4816 = vrcp.f32 %v3633_v9  ;;  %v4809_v8 = vpop.eup %4808  ;;  %v3658_v23 = vadd.f32 1.0, %v4807_v4 }
 0x3f3   : >> { %4818 = vrcp.f32 %v3645_v7  ;;  %v3659_v19 = vadd.f32 1.0, %v4809_v8 }
 0x3f4   : >> { %4820 = vrcp.f32 %v3658_v23 }
 0x3f9   : >> { %v4811_v28 = vpop.eup %4810 }
 0x3fa   : >> { %v4813_v14 = vpop.eup %4812  ;;  %v3668_v40 = vmul.f32 %v4811_v28, %v4805_v13 }
 0x3fb   : >> { %v4815_v11 = vpop.eup %4814  ;;  %v3666_v12 = vmul.f32 %v4813_v14, %v5905_v57 }
 0x3fc   : >> { %v4817_v18 = vpop.eup %4816 }
 0x3fd   : >> { %v3670_v30 = vadd.f32 %v3668_v40, %v3666_v12  ;;  %v3669_v16 = vmul.f32 %v4817_v18, %v4815_v11  ;;  %v3532_v20 = vpop.f32.mrb[12].mxu0  ;;  %v3575_v21 = vpop.f32.mrb[12].mxu1 }
 0x3fe   : >> { %v4819_v31 = vpop.eup %4818  ;;  %v3618_v32 = vadd.f32 %v3610_v17, %v3532_v20  ;;  %v3534_v33 = vpop.f32.mrb[13].mxu0  ;;  %v3620_v50 = vadd.f32 %v3612_v48, %v3575_v21 }
 0x3ff   : >> { %v3577_v57 = vpop.f32.mrb[13].mxu1  ;;  %4822 = vtanh.f32 %v3670_v30  ;;  %3726 = vst [vmem:[#allocation5] sm:$0xff] %v3670_v30  ;;  %v3667_v35 = vmul.f32 %v4819_v31, %v5910_v63  ;;  %v3619_v37 = vadd.f32 %v3611_v29, %v3534_v33  ;;  %v3536_v38 = vpop.f32.mrb[14].mxu0  ;;  %v3613_v63 = vld [vmem:[%s5983_s16 + $0x18] sm:$0xff] }
 0x400   : >> { %v3579_v39 = vpop.f32.mrb[14].mxu1  ;;  %v4286_v41 = vmul.f32 -1.442695, %v3618_v32  ;;  %v3622_v36 = vadd.f32 %v3614_v25, %v3536_v38  ;;  %v3538_v42 = vpop.f32.mrb[15].mxu0  ;;  %4824 = vrcp.f32 %v3659_v19  ;;  %v3621_v22 = vadd.f32 %v3613_v63, %v3577_v57 }
 0x401   : >> { %v3581_v43 = vpop.f32.mrb[15].mxu1  ;;  %v3671_v44 = vadd.f32 %v3669_v16, %v3667_v35  ;;  %v4288_v6 = vmul.f32 -1.442695, %v3619_v37  ;;  %v3623_v46 = vadd.f32 %v3615_v34, %v3538_v42  ;;  %v4821_v27 = vpop.eup %4820  ;;  %v3624_v58 = vadd.f32 %v3616_v51, %v3579_v39 }
 0x402   : >> { %4826 = vpow2.f32 %v4286_v41  ;;  %v4287_v24 = vmul.f32 -1.442695, %v3622_v36  ;;  %v4290_v53 = vmul.f32 -1.442695, %v3621_v22  ;;  %v3625_v54 = vadd.f32 %v3617_v26, %v3581_v43 }
 0x403   : >> { %4828 = vtanh.f32 %v3671_v44  ;;  %3727 = vst [vmem:[#allocation5 + $0x8] sm:$0xff] %v3671_v44  ;;  %v4289_v47 = vmul.f32 -1.442695, %v3623_v46 }
 0x404   : >> { %4830 = vpow2.f32 %v4288_v6  ;;  %v4291_v0 = vmul.f32 -1.442695, %v3625_v54 }
 0x405   : >> { %4832 = vpow2.f32 %v4287_v24 }
 0x406   : >> { %4834 = vpow2.f32 %v4289_v47 }
 0x407   : >> { %4836 = vtanh.f32 %v3620_v50 }
 0x408   : >> { %4838 = vpow2.f32 %v4290_v53 }
 0x409   : >> { %v4823_v49 = vpop.eup %4822 }
 0x40a   : >> { %v3674_v52 = vmul.f32 %v4823_v49, %v4821_v27  ;;  %v4825_v55 = vpop.eup %4824 }
 0x40c   : >> { %v4827_v56 = vpop.eup %4826  ;;  %4294 = vst [vmem:[%s5919_s23 + $0x10] sm:$0xff] %v3674_v52 }
 0x40d   : >> { %v4829_v59 = vpop.eup %4828  ;;  %v3682_v60 = vadd.f32 1.0, %v4827_v56 }
 0x40e   : >> { %v4831_v61 = vpop.eup %4830  ;;  %v3675_v62 = vmul.f32 %v4829_v59, %v4825_v55 }
 0x40f   : >> { %4840 = vrcp.f32 %v3682_v60  ;;  %v3694_v1 = vadd.f32 1.0, %v4831_v61  ;;  %v4833_v2 = vpop.eup %4832 }
 0x410   : >> { %v3730_v3 = vpack.c.bf16 %v3675_v62, %v3674_v52  ;;  %4295 = vst [vmem:[%s5919_s23 + $0x18] sm:$0xff] %v3675_v62  ;;  %4842 = vtanh.f32 %v3624_v58  ;;  %v3683_v5 = vadd.f32 1.0, %v4833_v2  ;;  %v4835_v9 = vpop.eup %4834 }
 0x411   : >> { %4844 = vrcp.f32 %v3694_v1  ;;  %v3695_v10 = vadd.f32 1.0, %v4835_v9  ;;  %v4837_v7 = vpop.eup %4836 }
 0x412   : >> { %3731 = vst [vmem:[#allocation4] sm:$0xff] %v3730_v3  ;;  %4846 = vpow2.f32 %v4291_v0  ;;  %v4839_v13 = vpop.eup %4838 }
 0x413   : >> { %4848 = vrcp.f32 %v3683_v5  ;;  %v3708_v40 = vadd.f32 1.0, %v4839_v13 }
 0x414   : >> { %4850 = vrcp.f32 %v3695_v10 }
 0x415   : >> { %4852 = vrcp.f32 %v3708_v40 }
 0x419   : >> { %v4841_v4 = vpop.eup %4840 }
 0x41a   : >> { %v4843_v8 = vpop.eup %4842  ;;  %v3718_v28 = vmul.f32 %v4841_v4, %v4837_v7 }
 0x41b   : >> { %v4845_v14 = vpop.eup %4844 }
 0x41c   : >> { %v4847_v23 = vpop.eup %4846  ;;  %v3716_v11 = vmul.f32 %v4845_v14, %v5937_v45 }
 0x41d   : >> { %v4849_v12 = vpop.eup %4848  ;;  %v3709_v30 = vadd.f32 1.0, %v4847_v23 }
 0x41e   : >> { %v3720_v17 = vadd.f32 %v3718_v28, %v3716_v11  ;;  %v3719_v18 = vmul.f32 %v4849_v12, %v4843_v8  ;;  %v4851_v29 = vpop.eup %4850 }
 0x41f   : >> { %v3717_v16 = vmul.f32 %v4851_v29, %v5944_v15  ;;  %v4853_v20 = vpop.eup %4852 }
 0x420   : >> { %4854 = vtanh.f32 %v3720_v17  ;;  %3728 = vst [vmem:[#allocation7] sm:$0xff] %v3720_v17 }
 0x421   : >> { %v3721_v19 = vadd.f32 %v3719_v18, %v3717_v16  ;;  %4856 = vrcp.f32 %v3709_v30 }
 0x423   : >> { %4858 = vtanh.f32 %v3721_v19  ;;  %3729 = vst [vmem:[#allocation7 + $0x8] sm:$0xff] %v3721_v19 }
 0x42a   : >> { %v4855_v21 = vpop.eup %4854 }
 0x42b   : >> { %v3724_v45 = vmul.f32 %v4855_v21, %v4853_v20  ;;  %v4857_v25 = vpop.eup %4856 }
 0x42c   : > { %2302 = sbr.rel (!%p2300_p11) target bundleno = 482 (0x1e2), region = 173 }
 0x42d   : >> { %3738 = vst [vmem:[%s3737_s14] sm:$0xff] %v3724_v45  ;;  %v4859_v31 = vpop.eup %4858 }
 0x42e   : >> { %v3725_v32 = vmul.f32 %v4859_v31, %v4857_v25 }
 0x430   : >> { %v3732_v33 = vpack.c.bf16 %v3725_v32, %v3724_v45  ;;  %3739 = vst [vmem:[%s3737_s14 + $0x8] sm:$0xff] %v3725_v32 }
 0x432   : >> { %3733 = vst [vmem:[#allocation6] sm:$0xff] %v3732_v33 }
 0x433   : > { %3743 = sbr.rel (%p4296_p12) target bundleno = 1085 (0x43d), region = 95  ;;  %v3744_v15 = vld [vmem:[#allocation4] sm:$0xff] (!%p4296_p12)  ;;  %v3755_v34 = vld [vmem:[#allocation5] sm:$0xff] (!%p4296_p12)  ;;  %s6078_s29 = sld [smem:[#allocation21_spill]] (!%p4296_p12)  ;;  %v3756_v41 = vld [vmem:[#allocation5 + $0x8] sm:$0xff] (!%p4296_p12) }
 0x434   : > { %v3745_v35 = vunpack.c.l.bf16 (!%p4296_p12), %v3744_v15  ;;  %v3746_v37 = vunpack.c.h.bf16 (!%p4296_p12), %v3744_v15  ;;  %v3759_v36 = vld [vmem:[#allocation7] sm:$0xff] (!%p4296_p12)  ;;  %v3760_v42 = vld [vmem:[#allocation7 + $0x8] sm:$0xff] (!%p4296_p12)  ;;  %s6079_s17 = sld [smem:[#allocation20_spill]] (!%p4296_p12) }
 0x439   : > { %v3749_v57 = vld [vmem:[#allocation6] sm:$0xff] (!%p4296_p12)  ;;  %3757 = vst [vmem:[%s6078_s29] sm:$0xff] (!%p4296_p12), %v3755_v34  ;;  %3758 = vst [vmem:[%s6078_s29 + $0x8] sm:$0xff] (!%p4296_p12), %v3756_v41 }
 0x43a   : > { %v3750_v38 = vunpack.c.l.bf16 %v3749_v57  ;;  %v3751_v39 = vunpack.c.h.bf16 %v3749_v57  ;;  %4299 = vst [vmem:[%s6078_s29 + $0x10] sm:$0xff] %v3759_v36  ;;  %4300 = vst [vmem:[%s6078_s29 + $0x18] sm:$0xff] %v3760_v42 }
 0x43b   : > { %3747 = vst [vmem:[%s6079_s17] sm:$0xff] %v3745_v35  ;;  %3748 = vst [vmem:[%s6079_s17 + $0x8] sm:$0xff] %v3746_v37 }
 0x43c   : > { %4297 = vst [vmem:[%s6079_s17 + $0x10] sm:$0xff] %v3750_v38  ;;  %4298 = vst [vmem:[%s6079_s17 + $0x18] sm:$0xff] %v3751_v39 }
 0x43d PF: > { %s6080_s14 = sld [smem:[#allocation15_spill]] }
 0x443   : > { %s28_s18 = sadd.s32 1, %s6080_s14  }
 0x444   : > { %p25_p13 = scmp.ge.s32.totalorder %s28_s18, 4  }
 0x446   :  { %27 = sbr.rel (!%p25_p13) target bundleno = 7 (0x7), region = 184 }
 0x44d   :  { %3818 = vsyncpa [#allocation9], 1 }
 0x44e   :  { %3820 = vsyncpa [#allocation9 + $0x1], 1 }
 0x44f   :  { %3821 = vsyncpa [#allocation11], 1 }

// kernel: _bidi_lstm_forward.2
= control target key start
LH: loop header
LB: loop body
LE: loop exit
PB: predicated region body
PF: predicated region fallthrough
CT: control target
= control target key end

     0   :  { %17 = vsyncpa [#allocation9], 0  ;;  %s4006_s0 = inlined_call_operand.vmem [shape: bf16[128,16], index: 0, kind: input, shape index: {}, may-alias: {0,1}]   ;;  %s4007_s1 = inlined_call_operand.vmem [shape: bf16[128,16], index: 1, kind: input, shape index: {}, may-alias: {0,1}]   ;;  %s4008_s2 = inlined_call_operand.vmem [shape: bf16[16,512], index: 2, kind: input, shape index: {}]   ;;  %s4009_s3 = inlined_call_operand.vmem [shape: bf16[16,512], index: 3, kind: input, shape index: {}]   ;;  %s4010_s4 = inlined_call_operand.hbm [shape: bf16[128,512], index: 4, kind: input, shape index: {}]   ;;  %s4011_s5 = inlined_call_operand.hbm [shape: bf16[128,512], index: 5, kind: input, shape index: {}]   ;;  %s4012_s6 = inlined_call_operand.vmem [shape: f32[1,512], index: 6, kind: input, shape index: {}]   ;;  %s4013_s7 = inlined_call_operand.vmem [shape: f32[1,512], index: 7, kind: input, shape index: {}]   ;;  %s4014_s8 = inlined_call_operand.vmem [shape: bf16[128,128], index: 8, kind: output, shape index: {0}]   ;;  %s4015_s9 = inlined_call_operand.vmem [shape: bf16[128,128], index: 9, kind: output, shape index: {1}]   ;;  %s4016_s10 = inlined_call_operand.vmem [shape: f32[2,16,128], index: 10, kind: output, shape index: {2}]   ;;  %s4017_s11 = inlined_call_operand.vmem [shape: f32[2,16,128], index: 11, kind: output, shape index: {3}]  }
   0x1   :  { %18 = vsyncpa [#allocation11], 0  ;;  %s3364_s17 = smov 0  }
   0x2 LB: > { %s3370_s18 = sadd.s32 4294967295, %s3290_s17   ;;  %p2662_p0 = scmp.ge.s32.totalorder %s3290_s17, 1  ;;  %s3290_s17 = sphi %s3364_s17, %s24_s17  }
   0x3   : > { %p305_p1 = scmp.lt.s32.totalorder %s3290_s17, 3  ;;  %s3296_s19 = smov [#allocation8]  }
   0x4   : > { %s323_s20 = sshll.u32 %s3296_s19, 4  ;;  %p4018_p4 = scmp.eq.s32.totalorder %s3370_s18, 0  ;;  %s324_s20 = int_to_ptr.vmem [resolvable:$true] %s323_s20 }
   0x5   : > { %p3375_p3 = pnand %p2662_p0, %p305_p1  ;;  %s3297_s22 = smov [#allocation10]  }
   0x6   : > { %s336_s23 = sshll.u32 %s3297_s22, 4  ;;  %s3216_s27 = scalar_lea.hbm %s4010_s4, 4096  ;;  %s3388_s23 = int_to_ptr.vmem [resolvable:$true] %s336_s23 }
   0x7   : > { %s4024_s21 = scalar_select %p3375_p3, 1, 0 }
   0x8   : > { %p2937_p5 = pneg %p3375_p3  ;;  %p3217_p7 = scmp.ne.s32.totalorder %s4010_s4, %s3216_s27 }
   0x9   : > { %p3223_p11 = scmp.lt.u32.totalorder %s3216_s27, %s4010_s4 }
   0xa   : > { %p3384_p6 = pnand %p4018_p4, %p2937_p5 }
   0xc   : > { %p3218_p8 = pneg %p3384_p6 }
   0xe   : > { %p3219_p9 = pnand %p3218_p8, %p3217_p7 }
  0x10   : > { %p3220_p10 = pneg %p3219_p9 }
  0x12   : > { %p3225_p12 = pnand %p3223_p11, %p3220_p10 }
  0x14   : > { %3228 = shalt.err (!%p3225_p12)
}
  0x15   : > { %s3229_s13 = scalar_lea.vmem %s324_s20, 4096  ;;  %p3237_p5 = scmp.lt.s32.totalorder %s324_s20, %s324_s20 }
  0x16   : > { %p3230_p13 = scmp.ne.s32.totalorder %s324_s20, %s3229_s13  ;;  %p3238_p2 = scmp.lt.s32.totalorder %s3229_s13, %s3229_s13 }
  0x18   : > { %p3232_p0 = pnand %p3230_p13, %p3218_p8  ;;  %p3239_p4 = por %p3238_p2, %p3237_p5 }
  0x1a   : > { %p3233_p1 = pneg %p3232_p0 }
  0x1c   : > { %p3240_p3 = pnand %p3239_p4, %p3233_p1 }
  0x1e   : > { %3243 = shalt.err (!%p3240_p3)
}
  0x1f   : > { %s3298_s14 = smov 256   ;;  %s3299_s15 = smov 16  }
  0x20   : > { %2940 = dma.hbm_to_vmem [thread:$0]  (!%p3384_p6), %s4010_s4, 4096, %s324_s20, [#allocation9], %s3298_s14, %s3298_s14, %s3299_s15  }
  0x21   : > { %s3244_s26 = scalar_lea.hbm %s4011_s5, 4096 }
  0x22   : > { %p3245_p7 = scmp.ne.s32.totalorder %s4011_s5, %s3244_s26  ;;  %p3251_p4 = scmp.lt.u32.totalorder %s3244_s26, %s4011_s5 }
  0x24   : > { %p3247_p2 = pnand %p3245_p7, %p3218_p8 }
  0x26   : > { %p3248_p3 = pneg %p3247_p2 }
  0x28   : > { %p3253_p9 = pnand %p3251_p4, %p3248_p3 }
  0x2a   : > { %3256 = shalt.err (!%p3253_p9)
}
  0x2b   : > { %s3257_s20 = scalar_lea.vmem %s3388_s23, 4096  ;;  %p3265_p13 = scmp.lt.s32.totalorder %s3388_s23, %s3388_s23 }
  0x2c   : > { %p3258_p10 = scmp.ne.s32.totalorder %s3388_s23, %s3257_s20  ;;  %p3266_p0 = scmp.lt.s32.totalorder %s3257_s20, %s3257_s20 }
  0x2e   : > { %p3260_p11 = pnand %p3258_p10, %p3218_p8  ;;  %p3267_p1 = por %p3266_p0, %p3265_p13 }
  0x30   : > { %p3261_p12 = pneg %p3260_p11 }
  0x32   : > { %p3268_p5 = pnand %p3267_p1, %p3261_p12 }
  0x34   : > { %3271 = shalt.err (!%p3268_p5)
}
  0x35   : > { %2943 = dma.hbm_to_vmem [thread:$0]  (!%p3384_p6), %s4011_s5, 4096, %s3388_s23, [#allocation11], %s3298_s14, %s3298_s14, %s3299_s15  }
  0x36   : > { %p4026_p7 = scmp.ne.s32.totalorder %s4024_s21, 0 }
  0x37   : > { %p4027_p2 = scmp.eq.s32.totalorder (!%p4026_p7), %s3370_s18, 0 }
  0x38   : > { %378 = sbr.rel (%p4026_p7) target bundleno = 964 (0x3c4), region = 52 }
  0x3f   : > { %3281 = dma.done.wait (%p4027_p2), [#allocation9], 4096   ;;  %p4028_p8 = pmov %p4027_p2 }
  0x40   : > { %p4029_p3 = pmov %p4027_p2 }
  0x41   : > { %3283 = vsyncadd (%p4028_p8), [#allocation9], 4294963200 }
  0x42   : > { %3285 = dma.done.wait (%p4029_p3), [#allocation11], 4096   ;;  %p4030_p4 = pmov %p4027_p2 }
  0x43   : > { %s2669_s24 = sshll.u32 %s3370_s18, 3  ;;  %s440_s16 = ssub.s32 1, %s3370_s18 }
  0x44   : > { %3287 = vsyncadd (%p4030_p4), [#allocation11], 4294963200  ;;  %p435_p6 = scmp.lt.s32.totalorder %s2669_s24, 15  ;;  %s2671_s23 = sshll.u32 %s440_s16, 3 }
  0x45   : > { %p442_p9 = scmp.lt.s32.totalorder %s2671_s23, 15  ;;  %p4031_p10 = scmp.ne.s32.totalorder %s3370_s18, 0 }
  0x46   : > { %s4038_s24 = smov (!%p435_p6, %s2669_s24), 15  ;;  %v3300_v0 = vmov (!%p4031_p10), 0   ;;  %v3301_v1 = vmov (!%p4031_p10), 0.0  }
  0x47   : > { %s4040_s23 = smov (!%p442_p9, %s2671_s23), 15  ;;  %s2670_s21 = sshll.u32 %s4038_s24, 2  ;;  %467 = vst [vmem:[#allocation4] sm:$0xff] (!%p4031_p10), %v3300_v0  ;;  %468 = vst [vmem:[#allocation6] sm:$0xff] (!%p4031_p10), %v3300_v0 }
  0x48   : > { %s3452_s19 = scalar_lea.vmem %s4006_s0, %s2670_s21  ;;  %s2672_s22 = sshll.u32 %s4040_s23, 2  ;;  %469 = vst [vmem:[#allocation5] sm:$0xff] (!%p4031_p10), %v3301_v1  ;;  %470 = vst [vmem:[#allocation5 + $0x8] sm:$0xff] (!%p4031_p10), %v3301_v1 }
  0x49   : > { %s3457_s27 = scalar_lea.vmem %s4007_s1, %s2672_s22  ;;  %s3462_s30 = scalar_lea.vmem %s4014_s8, %s2670_s21  ;;  %471 = vst [vmem:[#allocation7] sm:$0xff] (!%p4031_p10), %v3301_v1  ;;  %472 = vst [vmem:[#allocation7 + $0x8] sm:$0xff] (!%p4031_p10), %v3301_v1 }
  0x4a   : > { %s3467_s13 = scalar_lea.vmem %s4015_s9, %s2672_s22  ;;  %466 = sbr.rel (%p4031_p10) target bundleno = 81 (0x51), region = 64 }
  0x51 PF: > { %v2972_v2 = vld [vmem:[%s4008_s2 + $0x4] ss:$16 sps:$4 sm:$0xff]   ;;  %v2974_v3 = vld [vmem:[%s4008_s2 + $0xc] ss:$16 sps:$4 sm:$0xff]   ;;  %v3302_v4 = vmov 0   ;;  %vm559_vm0 = vcmask 130048   ;;  %v499_v19 = vlaneseq }
  0x52   : > { %604 = vmatprep.mubr.bf16.mxu0 %v3302_v4  ;;  %677 = vmatprep.mubr.bf16.mxu1 %v3302_v4  ;;  %v2976_v5 = vld [vmem:[%s4008_s2] ss:$16 sps:$4 sm:$0xff]   ;;  %v2977_v6 = vld [vmem:[%s4008_s2 + $0x8] ss:$16 sps:$4 sm:$0xff]   ;;  %v2981_v9 = vld [vmem:[%s4009_s3 + $0x4] ss:$16 sps:$4 sm:$0xff]  }
  0x53   : > { %572 = vmatprep.subr.bf16.mxu0 %v2972_v2  ;;  %645 = vmatprep.subr.bf16.mxu1 %v2974_v3  ;;  %v2978_v7 = vld [vmem:[%s3452_s19] sm:$0xff]   ;;  %v2982_v10 = vld [vmem:[%s4009_s3 + $0x8] ss:$16 sps:$4 sm:$0xff]   ;;  %v2984_v11 = vld [vmem:[%s4009_s3 + $0xc] ss:$16 sps:$4 sm:$0xff]   ;;  %v3519_v20 = vshrl.u32 %v499_v19, 7 }
  0x54   : > { %573 = vmatpush1.bf16.msra.mxu0 %v2976_v5  ;;  %646 = vmatpush1.bf16.msra.mxu1 %v2977_v6  ;;  %v2979_v8 = vld [vmem:[%s4009_s3] ss:$16 sps:$4 sm:$0xff]   ;;  %v2985_v12 = vld [vmem:[%s3452_s19 + $0x8] sm:$0xff]   ;;  %v2987_v14 = vld [vmem:[%s3452_s19 + $0x18] sm:$0xff]   ;;  %s3627_s15 = smov 0  }
  0x55   : > { %824 = vmatprep.subr.bf16.mxu0 %v2981_v9  ;;  %897 = vmatprep.subr.bf16.mxu1 %v2984_v11  ;;  %v2986_v13 = vld [vmem:[%s3452_s19 + $0x10] sm:$0xff]   ;;  %v2988_v15 = vld [vmem:[%s3457_s27] sm:$0xff]   ;;  %v2989_v16 = vld [vmem:[%s3457_s27 + $0x8] sm:$0xff]   ;;  %v501_v21 = vsub.s32 0, %v3519_v20  ;;  %v509_v22 = vsub.s32 2, %v3519_v20  ;;  %v505_v24 = vsub.s32 1, %v3519_v20 }
  0x56   : > { %v2990_v17 = vld [vmem:[%s3457_s27 + $0x10] sm:$0xff]   ;;  %v2991_v18 = vld [vmem:[%s3457_s27 + $0x18] sm:$0xff]   ;;  %v497_v23 = vld [vmem:[%s4012_s6] sm:$0xf]  ;;  %v513_v25 = vsub.s32 3, %v3519_v20 }
  0x57   : > { %2686 = vmatmul.mubr.msk.bf16.vlgmr.msra.gmra.mrb[0].mxu0 %vm559_vm0, %v2978_v7  ;;  %2690 = vmatmul.mubr.msk.bf16.vlgmr.msra.gmra.mrb[0].mxu1 %vm559_vm0, %v2978_v7  ;;  %v3530_v26 = vrot.slane %v497_v23, %v501_v21  ;;  %v3534_v27 = vrot.slane %v497_v23, %v509_v22  ;;  %v3538_v28 = vrot.slane %v497_v23, %v505_v24 }
  0x58   : > { %825 = vmatpush1.bf16.msra.mxu0 %v2979_v8  ;;  %898 = vmatpush1.bf16.msra.mxu1 %v2982_v10  ;;  %v3542_v29 = vrot.slane %v497_v23, %v513_v25 }
  0x59   : > { %614 = vmatprep.mubr.bf16.mxu0 %v3302_v4  ;;  %687 = vmatprep.mubr.bf16.mxu1 %v3302_v4 }
  0x5f   : > { %2687 = vmatmul.mubr.msk.bf16.gmra.mrb[4].mxu0 %vm559_vm0, %v2985_v12  ;;  %2691 = vmatmul.mubr.msk.bf16.gmra.mrb[4].mxu1 %vm559_vm0, %v2985_v12 }
  0x60   : > { %624 = vmatprep.mubr.bf16.mxu0 %v3302_v4  ;;  %697 = vmatprep.mubr.bf16.mxu1 %v3302_v4 }
  0x67   : > { %2688 = vmatmul.mubr.msk.bf16.gmra.mrb[8].mxu0 %vm559_vm0, %v2986_v13  ;;  %2692 = vmatmul.mubr.msk.bf16.gmra.mrb[8].mxu1 %vm559_vm0, %v2986_v13 }
  0x68   : > { %634 = vmatprep.mubr.bf16.mxu0 %v3302_v4  ;;  %707 = vmatprep.mubr.bf16.mxu1 %v3302_v4 }
  0x6f   : > { %2689 = vmatmul.mubr.msk.bf16.gmra.mrb[12].mxu0 %vm559_vm0, %v2987_v14  ;;  %2693 = vmatmul.mubr.msk.bf16.gmra.mrb[12].mxu1 %vm559_vm0, %v2987_v14 }
  0x70   : > { %856 = vmatprep.mubr.bf16.mxu0 %v3302_v4  ;;  %929 = vmatprep.mubr.bf16.mxu1 %v3302_v4 }
  0x77   : > { %2702 = vmatmul.mubr.msk.bf16.vlgmr.msra.gmra.mrb[16].mxu0 %vm559_vm0, %v2988_v15  ;;  %2706 = vmatmul.mubr.msk.bf16.vlgmr.msra.gmra.mrb[16].mxu1 %vm559_vm0, %v2988_v15 }
  0x78   : > { %866 = vmatprep.mubr.bf16.mxu0 %v3302_v4  ;;  %939 = vmatprep.mubr.bf16.mxu1 %v3302_v4 }
  0x7f   : > { %2703 = vmatmul.mubr.msk.bf16.gmra.mrb[20].mxu0 %vm559_vm0, %v2989_v16  ;;  %2707 = vmatmul.mubr.msk.bf16.gmra.mrb[20].mxu1 %vm559_vm0, %v2989_v16 }
  0x80   : > { %876 = vmatprep.mubr.bf16.mxu0 %v3302_v4  ;;  %949 = vmatprep.mubr.bf16.mxu1 %v3302_v4 }
  0x87   : > { %2704 = vmatmul.mubr.msk.bf16.gmra.mrb[24].mxu0 %vm559_vm0, %v2990_v17  ;;  %2708 = vmatmul.mubr.msk.bf16.gmra.mrb[24].mxu1 %vm559_vm0, %v2990_v17 }
  0x88   : > { %886 = vmatprep.mubr.bf16.mxu0 %v3302_v4  ;;  %959 = vmatprep.mubr.bf16.mxu1 %v3302_v4 }
  0x8f   : > { %2705 = vmatmul.mubr.msk.bf16.gmra.mrb[28].mxu0 %vm559_vm0, %v2991_v18  ;;  %2709 = vmatmul.mubr.msk.bf16.gmra.mrb[28].mxu1 %vm559_vm0, %v2991_v18 }
 0x12a   : > { %v606_v30 = vpop.f32.mrb[0].mxu0  ;;  %v679_v31 = vpop.f32.mrb[0].mxu1 }
 0x12b   : > { %v607_v32 = vadd.f32 %v606_v30, %v3530_v26  ;;  %v680_v33 = vadd.f32 %v679_v31, %v3534_v27  ;;  %v608_v34 = vpop.f32.mrb[1].mxu0  ;;  %v681_v35 = vpop.f32.mrb[1].mxu1 }
 0x12c   : > { %v609_v36 = vadd.f32 %v608_v34, %v3538_v28  ;;  %v682_v37 = vadd.f32 %v681_v35, %v3542_v29  ;;  %v610_v38 = vpop.f32.mrb[2].mxu0  ;;  %v683_v39 = vpop.f32.mrb[2].mxu1 }
 0x12d   : > { %718 = vst [vmem:[#allocation2] sm:$0xff] %v607_v32  ;;  %720 = vst [vmem:[#allocation2 + $0x10] sm:$0xff] %v680_v33  ;;  %v611_v40 = vadd.f32 %v610_v38, %v3530_v26  ;;  %v684_v41 = vadd.f32 %v683_v39, %v3534_v27  ;;  %v612_v42 = vpop.f32.mrb[3].mxu0  ;;  %v685_v43 = vpop.f32.mrb[3].mxu1  ;;  %v750_v33 = vld [vmem:[%s4013_s7] sm:$0xf] }
 0x12e   : > { %719 = vst [vmem:[#allocation2 + $0x8] sm:$0xff] %v609_v36  ;;  %721 = vst [vmem:[#allocation2 + $0x18] sm:$0xff] %v682_v37  ;;  %v613_v44 = vadd.f32 %v612_v42, %v3538_v28  ;;  %v686_v45 = vadd.f32 %v685_v43, %v3542_v29 }
 0x12f   : > { %722 = vst [vmem:[#allocation2 + $0x20] sm:$0xff] %v611_v40  ;;  %724 = vst [vmem:[#allocation2 + $0x30] sm:$0xff] %v684_v41  ;;  %v3581_v40 = vrot.slane %v750_v33, %v501_v21  ;;  %v3585_v41 = vrot.slane %v750_v33, %v509_v22 }
 0x130   : > { %723 = vst [vmem:[#allocation2 + $0x28] sm:$0xff] %v613_v44  ;;  %725 = vst [vmem:[#allocation2 + $0x38] sm:$0xff] %v686_v45 }
 0x132   : > { %v616_v46 = vpop.f32.mrb[4].mxu0  ;;  %v689_v47 = vpop.f32.mrb[4].mxu1 }
 0x133   : > { %v617_v48 = vadd.f32 %v616_v46, %v3530_v26  ;;  %v690_v49 = vadd.f32 %v689_v47, %v3534_v27  ;;  %v618_v50 = vpop.f32.mrb[5].mxu0  ;;  %v691_v51 = vpop.f32.mrb[5].mxu1 }
 0x134   : > { %v619_v52 = vadd.f32 %v618_v50, %v3538_v28  ;;  %v692_v53 = vadd.f32 %v691_v51, %v3542_v29  ;;  %v620_v54 = vpop.f32.mrb[6].mxu0  ;;  %v693_v55 = vpop.f32.mrb[6].mxu1 }
 0x135   : > { %726 = vst [vmem:[#allocation2 + $0x40] sm:$0xff] %v617_v48  ;;  %728 = vst [vmem:[#allocation2 + $0x50] sm:$0xff] %v690_v49  ;;  %v621_v56 = vadd.f32 %v620_v54, %v3530_v26  ;;  %v694_v57 = vadd.f32 %v693_v55, %v3534_v27  ;;  %v622_v58 = vpop.f32.mrb[7].mxu0  ;;  %v695_v59 = vpop.f32.mrb[7].mxu1 }
 0x136   : > { %727 = vst [vmem:[#allocation2 + $0x48] sm:$0xff] %v619_v52  ;;  %729 = vst [vmem:[#allocation2 + $0x58] sm:$0xff] %v692_v53  ;;  %v623_v60 = vadd.f32 %v622_v58, %v3538_v28  ;;  %v696_v61 = vadd.f32 %v695_v59, %v3542_v29 }
 0x137   : > { %730 = vst [vmem:[#allocation2 + $0x60] sm:$0xff] %v621_v56  ;;  %732 = vst [vmem:[#allocation2 + $0x70] sm:$0xff] %v694_v57 }
 0x138   : > { %731 = vst [vmem:[#allocation2 + $0x68] sm:$0xff] %v623_v60  ;;  %733 = vst [vmem:[#allocation2 + $0x78] sm:$0xff] %v696_v61 }
 0x13a   : > { %v626_v62 = vpop.f32.mrb[8].mxu0  ;;  %v699_v63 = vpop.f32.mrb[8].mxu1 }
 0x13b   : > { %v627_v0 = vadd.f32 %v626_v62, %v3530_v26  ;;  %v700_v1 = vadd.f32 %v699_v63, %v3534_v27  ;;  %v628_v2 = vpop.f32.mrb[9].mxu0  ;;  %v701_v3 = vpop.f32.mrb[9].mxu1 }
 0x13c   : > { %v629_v4 = vadd.f32 %v628_v2, %v3538_v28  ;;  %v702_v5 = vadd.f32 %v701_v3, %v3542_v29  ;;  %v630_v6 = vpop.f32.mrb[10].mxu0  ;;  %v703_v7 = vpop.f32.mrb[10].mxu1 }
 0x13d   : > { %734 = vst [vmem:[#allocation2 + $0x80] sm:$0xff] %v627_v0  ;;  %736 = vst [vmem:[#allocation2 + $0x90] sm:$0xff] %v700_v1  ;;  %v631_v8 = vadd.f32 %v630_v6, %v3530_v26  ;;  %v704_v9 = vadd.f32 %v703_v7, %v3534_v27  ;;  %v632_v10 = vpop.f32.mrb[11].mxu0  ;;  %v705_v11 = vpop.f32.mrb[11].mxu1 }
 0x13e   : > { %735 = vst [vmem:[#allocation2 + $0x88] sm:$0xff] %v629_v4  ;;  %737 = vst [vmem:[#allocation2 + $0x98] sm:$0xff] %v702_v5  ;;  %v633_v12 = vadd.f32 %v632_v10, %v3538_v28  ;;  %v706_v13 = vadd.f32 %v705_v11, %v3542_v29 }
 0x13f   : > { %738 = vst [vmem:[#allocation2 + $0xa0] sm:$0xff] %v631_v8  ;;  %740 = vst [vmem:[#allocation2 + $0xb0] sm:$0xff] %v704_v9 }
 0x140   : > { %739 = vst [vmem:[#allocation2 + $0xa8] sm:$0xff] %v633_v12  ;;  %741 = vst [vmem:[#allocation2 + $0xb8] sm:$0xff] %v706_v13 }
 0x142   : > { %v636_v14 = vpop.f32.mrb[12].mxu0  ;;  %v709_v15 = vpop.f32.mrb[12].mxu1 }
 0x143   : > { %v637_v16 = vadd.f32 %v636_v14, %v3530_v26  ;;  %v710_v17 = vadd.f32 %v709_v15, %v3534_v27  ;;  %v638_v18 = vpop.f32.mrb[13].mxu0  ;;  %v711_v19 = vpop.f32.mrb[13].mxu1 }
 0x144   : > { %v639_v23 = vadd.f32 %v638_v18, %v3538_v28  ;;  %v712_v30 = vadd.f32 %v711_v19, %v3542_v29  ;;  %v640_v31 = vpop.f32.mrb[14].mxu0  ;;  %v713_v32 = vpop.f32.mrb[14].mxu1 }
 0x145   : > { %742 = vst [vmem:[#allocation2 + $0xc0] sm:$0xff] %v637_v16  ;;  %744 = vst [vmem:[#allocation2 + $0xd0] sm:$0xff] %v710_v17  ;;  %v641_v34 = vadd.f32 %v640_v31, %v3530_v26  ;;  %v714_v35 = vadd.f32 %v713_v32, %v3534_v27  ;;  %v642_v36 = vpop.f32.mrb[15].mxu0  ;;  %v715_v37 = vpop.f32.mrb[15].mxu1  ;;  %v3589_v26 = vrot.slane %v750_v33, %v505_v24 }
 0x146   : > { %743 = vst [vmem:[#allocation2 + $0xc8] sm:$0xff] %v639_v23  ;;  %745 = vst [vmem:[#allocation2 + $0xd8] sm:$0xff] %v712_v30  ;;  %v643_v38 = vadd.f32 %v642_v36, %v3538_v28  ;;  %v716_v39 = vadd.f32 %v715_v37, %v3542_v29  ;;  %v3593_v27 = vrot.slane %v750_v33, %v513_v25 }
 0x147   : > { %746 = vst [vmem:[#allocation2 + $0xe0] sm:$0xff] %v641_v34  ;;  %748 = vst [vmem:[#allocation2 + $0xf0] sm:$0xff] %v714_v35 }
 0x148   : > { %747 = vst [vmem:[#allocation2 + $0xe8] sm:$0xff] %v643_v38  ;;  %749 = vst [vmem:[#allocation2 + $0xf8] sm:$0xff] %v716_v39 }
 0x14a   : > { %v858_v28 = vpop.f32.mrb[16].mxu0  ;;  %v931_v29 = vpop.f32.mrb[16].mxu1 }
 0x14b   : > { %v859_v42 = vadd.f32 %v858_v28, %v3581_v40  ;;  %v932_v21 = vadd.f32 %v931_v29, %v3585_v41  ;;  %v860_v43 = vpop.f32.mrb[17].mxu0  ;;  %v933_v44 = vpop.f32.mrb[17].mxu1 }
 0x14c   : > { %v861_v22 = vadd.f32 %v860_v43, %v3589_v26  ;;  %v934_v45 = vadd.f32 %v933_v44, %v3593_v27  ;;  %v862_v46 = vpop.f32.mrb[18].mxu0  ;;  %v935_v47 = vpop.f32.mrb[18].mxu1 }
 0x14d   : > { %970 = vst [vmem:[#allocation3] sm:$0xff] %v859_v42  ;;  %972 = vst [vmem:[#allocation3 + $0x10] sm:$0xff] %v932_v21  ;;  %v863_v20 = vadd.f32 %v862_v46, %v3581_v40  ;;  %v936_v24 = vadd.f32 %v935_v47, %v3585_v41  ;;  %v864_v25 = vpop.f32.mrb[19].mxu0  ;;  %v937_v48 = vpop.f32.mrb[19].mxu1 }
 0x14e   : > { %971 = vst [vmem:[#allocation3 + $0x8] sm:$0xff] %v861_v22  ;;  %973 = vst [vmem:[#allocation3 + $0x18] sm:$0xff] %v934_v45  ;;  %v865_v49 = vadd.f32 %v864_v25, %v3589_v26  ;;  %v938_v50 = vadd.f32 %v937_v48, %v3593_v27 }
 0x14f   : > { %974 = vst [vmem:[#allocation3 + $0x20] sm:$0xff] %v863_v20  ;;  %976 = vst [vmem:[#allocation3 + $0x30] sm:$0xff] %v936_v24 }
 0x150   : > { %975 = vst [vmem:[#allocation3 + $0x28] sm:$0xff] %v865_v49  ;;  %977 = vst [vmem:[#allocation3 + $0x38] sm:$0xff] %v938_v50 }
 0x152   : > { %v868_v51 = vpop.f32.mrb[20].mxu0  ;;  %v941_v52 = vpop.f32.mrb[20].mxu1 }
 0x153   : > { %v869_v53 = vadd.f32 %v868_v51, %v3581_v40  ;;  %v942_v54 = vadd.f32 %v941_v52, %v3585_v41  ;;  %v870_v55 = vpop.f32.mrb[21].mxu0  ;;  %v943_v56 = vpop.f32.mrb[21].mxu1 }
 0x154   : > { %v871_v57 = vadd.f32 %v870_v55, %v3589_v26  ;;  %v944_v58 = vadd.f32 %v943_v56, %v3593_v27  ;;  %v872_v59 = vpop.f32.mrb[22].mxu0  ;;  %v945_v60 = vpop.f32.mrb[22].mxu1 }
 0x155   : > { %978 = vst [vmem:[#allocation3 + $0x40] sm:$0xff] %v869_v53  ;;  %980 = vst [vmem:[#allocation3 + $0x50] sm:$0xff] %v942_v54  ;;  %v873_v61 = vadd.f32 %v872_v59, %v3581_v40  ;;  %v946_v62 = vadd.f32 %v945_v60, %v3585_v41  ;;  %v874_v63 = vpop.f32.mrb[23].mxu0  ;;  %v947_v0 = vpop.f32.mrb[23].mxu1 }
 0x156   : > { %979 = vst [vmem:[#allocation3 + $0x48] sm:$0xff] %v871_v57  ;;  %981 = vst [vmem:[#allocation3 + $0x58] sm:$0xff] %v944_v58  ;;  %v875_v1 = vadd.f32 %v874_v63, %v3589_v26  ;;  %v948_v2 = vadd.f32 %v947_v0, %v3593_v27 }
 0x157   : > { %982 = vst [vmem:[#allocation3 + $0x60] sm:$0xff] %v873_v61  ;;  %984 = vst [vmem:[#allocation3 + $0x70] sm:$0xff] %v946_v62 }
 0x158   : > { %983 = vst [vmem:[#allocation3 + $0x68] sm:$0xff] %v875_v1  ;;  %985 = vst [vmem:[#allocation3 + $0x78] sm:$0xff] %v948_v2 }
 0x15a   : > { %v878_v3 = vpop.f32.mrb[24].mxu0  ;;  %v951_v4 = vpop.f32.mrb[24].mxu1 }
 0x15b   : > { %v879_v5 = vadd.f32 %v878_v3, %v3581_v40  ;;  %v952_v6 = vadd.f32 %v951_v4, %v3585_v41  ;;  %v880_v7 = vpop.f32.mrb[25].mxu0  ;;  %v953_v8 = vpop.f32.mrb[25].mxu1 }
 0x15c   : > { %v881_v9 = vadd.f32 %v880_v7, %v3589_v26  ;;  %v954_v10 = vadd.f32 %v953_v8, %v3593_v27  ;;  %v882_v11 = vpop.f32.mrb[26].mxu0  ;;  %v955_v12 = vpop.f32.mrb[26].mxu1 }
 0x15d   : > { %986 = vst [vmem:[#allocation3 + $0x80] sm:$0xff] %v879_v5  ;;  %988 = vst [vmem:[#allocation3 + $0x90] sm:$0xff] %v952_v6  ;;  %v883_v13 = vadd.f32 %v882_v11, %v3581_v40  ;;  %v956_v14 = vadd.f32 %v955_v12, %v3585_v41  ;;  %v884_v15 = vpop.f32.mrb[27].mxu0  ;;  %v957_v16 = vpop.f32.mrb[27].mxu1 }
 0x15e   : > { %987 = vst [vmem:[#allocation3 + $0x88] sm:$0xff] %v881_v9  ;;  %989 = vst [vmem:[#allocation3 + $0x98] sm:$0xff] %v954_v10  ;;  %v885_v17 = vadd.f32 %v884_v15, %v3589_v26  ;;  %v958_v18 = vadd.f32 %v957_v16, %v3593_v27 }
 0x15f   : > { %990 = vst [vmem:[#allocation3 + $0xa0] sm:$0xff] %v883_v13  ;;  %992 = vst [vmem:[#allocation3 + $0xb0] sm:$0xff] %v956_v14 }
 0x160   : > { %991 = vst [vmem:[#allocation3 + $0xa8] sm:$0xff] %v885_v17  ;;  %993 = vst [vmem:[#allocation3 + $0xb8] sm:$0xff] %v958_v18 }
 0x162   : > { %v888_v19 = vpop.f32.mrb[28].mxu0  ;;  %v961_v23 = vpop.f32.mrb[28].mxu1 }
 0x163   : > { %v889_v30 = vadd.f32 %v888_v19, %v3581_v40  ;;  %v962_v31 = vadd.f32 %v961_v23, %v3585_v41  ;;  %v890_v32 = vpop.f32.mrb[29].mxu0  ;;  %v963_v33 = vpop.f32.mrb[29].mxu1 }
 0x164   : > { %v891_v34 = vadd.f32 %v890_v32, %v3589_v26  ;;  %v964_v35 = vadd.f32 %v963_v33, %v3593_v27  ;;  %v892_v36 = vpop.f32.mrb[30].mxu0  ;;  %v965_v37 = vpop.f32.mrb[30].mxu1 }
 0x165   : > { %994 = vst [vmem:[#allocation3 + $0xc0] sm:$0xff] %v889_v30  ;;  %996 = vst [vmem:[#allocation3 + $0xd0] sm:$0xff] %v962_v31  ;;  %v893_v38 = vadd.f32 %v892_v36, %v3581_v40  ;;  %v966_v39 = vadd.f32 %v965_v37, %v3585_v41  ;;  %v894_v28 = vpop.f32.mrb[31].mxu0  ;;  %v967_v29 = vpop.f32.mrb[31].mxu1 }
 0x166   : > { %995 = vst [vmem:[#allocation3 + $0xc8] sm:$0xff] %v891_v34  ;;  %997 = vst [vmem:[#allocation3 + $0xd8] sm:$0xff] %v964_v35  ;;  %v895_v42 = vadd.f32 %v894_v28, %v3589_v26  ;;  %v968_v21 = vadd.f32 %v967_v29, %v3593_v27 }
 0x167   : > { %998 = vst [vmem:[#allocation3 + $0xe0] sm:$0xff] %v893_v38  ;;  %1000 = vst [vmem:[#allocation3 + $0xf0] sm:$0xff] %v966_v39 }
 0x168   : > { %999 = vst [vmem:[#allocation3 + $0xe8] sm:$0xff] %v895_v42  ;;  %1001 = vst [vmem:[#allocation3 + $0xf8] sm:$0xff] %v968_v21 }
 0x169 LB: >> { %v3632_v40 = vld [vmem:[#allocation8 + $0x4] ss:$16 sps:$4 sm:$0xff]   ;;  %v3634_v41 = vld [vmem:[#allocation8] ss:$16 sps:$4 sm:$0xff]   ;;  %v4020_v43 = vmov 0   ;;  %s2711_s22 = sshll.u32 %s3294_s15, 5  ;;  %s3294_s15 = sphi %s3627_s15, %s1007_s15  }
 0x16a   : >> { %1237 = vmatprep.mubr.bf16.mxu0 %v4020_v43  ;;  %1280 = vmatprep.mubr.bf16.mxu1 %v4020_v43  ;;  %v3639_v26 = vld [vmem:[#allocation8 + $0x24] ss:$16 sps:$4 sm:$0xff]   ;;  %v3642_v27 = vld [vmem:[#allocation8 + $0x20] ss:$16 sps:$4 sm:$0xff]   ;;  %v3647_v22 = vld [vmem:[#allocation8 + $0xc] ss:$16 sps:$4 sm:$0xff]  }
 0x16b   : >> { %1205 = vmatprep.subr.bf16.mxu0 %v3632_v40  ;;  %v3645_v44 = vld [vmem:[#allocation8 + $0x44] ss:$16 sps:$4 sm:$0xff]   ;;  %v3649_v45 = vld [vmem:[#allocation8 + $0x8] ss:$16 sps:$4 sm:$0xff]   ;;  %v3652_v46 = vld [vmem:[#allocation8 + $0x40] ss:$16 sps:$4 sm:$0xff]   ;;  %1248 = vmatprep.subr.bf16.mxu1 %v3647_v22 }
 0x16c   : >> { %1206 = vmatpush1.bf16.msra.mxu0 %v3634_v41  ;;  %v3656_v47 = vld [vmem:[#allocation8 + $0x64] ss:$16 sps:$4 sm:$0xff]   ;;  %1249 = vmatpush1.bf16.msra.mxu1 %v3649_v45  ;;  %v3659_v20 = vld [vmem:[#allocation8 + $0x2c] ss:$16 sps:$4 sm:$0xff]   ;;  %v3661_v24 = vld [vmem:[#allocation8 + $0x28] ss:$16 sps:$4 sm:$0xff]  }
 0x16d   : >> { %1207 = vmatprep.subr.bf16.mxu0 %v3639_v26  ;;  %1250 = vmatprep.subr.bf16.mxu1 %v3659_v20  ;;  %v3665_v25 = vld [vmem:[#allocation8 + $0x60] ss:$16 sps:$4 sm:$0xff]   ;;  %v3667_v48 = vld [vmem:[#allocation8 + $0x84] ss:$16 sps:$4 sm:$0xff]   ;;  %v3669_v49 = vld [vmem:[#allocation8 + $0x4c] ss:$16 sps:$4 sm:$0xff]  }
 0x16e   : >> { %v3673_v50 = vld [vmem:[#allocation8 + $0x48] ss:$16 sps:$4 sm:$0xff]   ;;  %v3676_v51 = vld [vmem:[#allocation8 + $0x6c] ss:$16 sps:$4 sm:$0xff]   ;;  %v3679_v52 = vld [vmem:[#allocation8 + $0x80] ss:$16 sps:$4 sm:$0xff]  }
 0x16f   : >> { %v3682_v53 = vld [vmem:[#allocation8 + $0xa4] ss:$16 sps:$4 sm:$0xff]   ;;  %v3685_v54 = vld [vmem:[#allocation8 + $0x68] ss:$16 sps:$4 sm:$0xff]   ;;  %v3688_v55 = vld [vmem:[#allocation8 + $0x8c] ss:$16 sps:$4 sm:$0xff]  }
 0x170   : >> { %1208 = vmatpush1.bf16.msra.mxu0 %v3642_v27  ;;  %1251 = vmatpush1.bf16.msra.mxu1 %v3661_v24  ;;  %v3691_v56 = vld [vmem:[#allocation8 + $0xa0] ss:$16 sps:$4 sm:$0xff]   ;;  %v3693_v57 = vld [vmem:[#allocation8 + $0xc4] ss:$16 sps:$4 sm:$0xff]   ;;  %v3697_v58 = vld [vmem:[#allocation8 + $0x88] ss:$16 sps:$4 sm:$0xff]  }
 0x171   : >> { %1209 = vmatprep.subr.bf16.mxu0 %v3645_v44  ;;  %1252 = vmatprep.subr.bf16.mxu1 %v3669_v49  ;;  %v3700_v59 = vld [vmem:[#allocation8 + $0xac] ss:$16 sps:$4 sm:$0xff]   ;;  %v3702_v60 = vld [vmem:[#allocation8 + $0xc0] ss:$16 sps:$4 sm:$0xff]   ;;  %v3705_v61 = vld [vmem:[#allocation8 + $0xe4] ss:$16 sps:$4 sm:$0xff]  }
 0x172   : >> { %v3709_v62 = vld [vmem:[#allocation8 + $0xa8] ss:$16 sps:$4 sm:$0xff]   ;;  %v3712_v63 = vld [vmem:[#allocation8 + $0xcc] ss:$16 sps:$4 sm:$0xff]   ;;  %v3714_v0 = vld [vmem:[#allocation8 + $0xe0] ss:$16 sps:$4 sm:$0xff]  }
 0x173   : >> { %v3717_v1 = vld [vmem:[#allocation10 + $0x4] ss:$16 sps:$4 sm:$0xff]   ;;  %v3721_v2 = vld [vmem:[#allocation8 + $0xc8] ss:$16 sps:$4 sm:$0xff]   ;;  %v3724_v3 = vld [vmem:[#allocation8 + $0xec] ss:$16 sps:$4 sm:$0xff]  }
 0x174   : >> { %1210 = vmatpush1.bf16.msra.mxu0 %v3652_v46  ;;  %1253 = vmatpush1.bf16.msra.mxu1 %v3673_v50  ;;  %v1012_v4 = vld [vmem:[#allocation4] sm:$0xff]  ;;  %v3733_v7 = vld [vmem:[#allocation8 + $0xe8] ss:$16 sps:$4 sm:$0xff]   ;;  %v3736_v8 = vld [vmem:[#allocation10 + $0xc] ss:$16 sps:$4 sm:$0xff]   ;;  %s3867_s25 = sshra.s32 %s2711_s22, 3 }
 0x175   : >> { %1211 = vmatprep.subr.bf16.mxu0 %v3656_v47  ;;  %1254 = vmatprep.subr.bf16.mxu1 %v3676_v51  ;;  %v3726_v5 = vld [vmem:[#allocation10] ss:$16 sps:$4 sm:$0xff]   ;;  %v3729_v6 = vld [vmem:[#allocation10 + $0x24] ss:$16 sps:$4 sm:$0xff]   ;;  %v3746_v11 = vld [vmem:[#allocation10 + $0x8] ss:$16 sps:$4 sm:$0xff]  }
 0x176   : >> { %v3738_v9 = vld [vmem:[#allocation10 + $0x20] ss:$16 sps:$4 sm:$0xff]   ;;  %v3741_v10 = vld [vmem:[#allocation10 + $0x44] ss:$16 sps:$4 sm:$0xff]   ;;  %v3749_v12 = vld [vmem:[#allocation10 + $0x2c] ss:$16 sps:$4 sm:$0xff]  }
 0x177   : >> { %v3752_v13 = vld [vmem:[#allocation10 + $0x40] ss:$16 sps:$4 sm:$0xff]   ;;  %v3755_v14 = vld [vmem:[#allocation10 + $0x64] ss:$16 sps:$4 sm:$0xff]   ;;  %v3758_v15 = vld [vmem:[#allocation10 + $0x28] ss:$16 sps:$4 sm:$0xff]  }
 0x178   : >> { %1212 = vmatpush1.bf16.msra.mxu0 %v3665_v25  ;;  %1255 = vmatpush1.bf16.msra.mxu1 %v3685_v54  ;;  %v3761_v16 = vld [vmem:[#allocation10 + $0x4c] ss:$16 sps:$4 sm:$0xff]   ;;  %v3765_v17 = vld [vmem:[#allocation10 + $0x60] ss:$16 sps:$4 sm:$0xff]   ;;  %v3768_v18 = vld [vmem:[#allocation10 + $0x84] ss:$16 sps:$4 sm:$0xff]  }
 0x179   : >> { %1213 = vmatprep.subr.bf16.mxu0 %v3667_v48  ;;  %1256 = vmatprep.subr.bf16.mxu1 %v3688_v55  ;;  %v3771_v19 = vld [vmem:[#allocation10 + $0x48] ss:$16 sps:$4 sm:$0xff]   ;;  %v3774_v23 = vld [vmem:[#allocation10 + $0x6c] ss:$16 sps:$4 sm:$0xff]   ;;  %v3777_v30 = vld [vmem:[#allocation10 + $0x80] ss:$16 sps:$4 sm:$0xff]  }
 0x17a   : >> { %v3780_v31 = vld [vmem:[#allocation10 + $0xa4] ss:$16 sps:$4 sm:$0xff]   ;;  %v3783_v32 = vld [vmem:[#allocation10 + $0x68] ss:$16 sps:$4 sm:$0xff]   ;;  %v3786_v33 = vld [vmem:[#allocation10 + $0x8c] ss:$16 sps:$4 sm:$0xff]  }
 0x17b   : >> { %v3789_v34 = vld [vmem:[#allocation10 + $0xa0] ss:$16 sps:$4 sm:$0xff]   ;;  %v3792_v35 = vld [vmem:[#allocation10 + $0xc4] ss:$16 sps:$4 sm:$0xff]   ;;  %v3795_v36 = vld [vmem:[#allocation10 + $0x88] ss:$16 sps:$4 sm:$0xff]  }
 0x17c   : >> { %1214 = vmatpush1.bf16.msra.mxu0 %v3679_v52  ;;  %1257 = vmatpush1.bf16.msra.mxu1 %v3697_v58  ;;  %4032 = vst [vmem:[#allocation14_spill] sm:$0xff] %v3792_v35  ;;  %v3798_v37 = vld [vmem:[#allocation10 + $0xac] ss:$16 sps:$4 sm:$0xff]   ;;  %v3801_v38 = vld [vmem:[#allocation10 + $0xc0] ss:$16 sps:$4 sm:$0xff]   ;;  %s2894_s26 = sshll.u32 %s3867_s25, 5 }
 0x17d   : >> { %1215 = vmatprep.subr.bf16.mxu0 %v3682_v53  ;;  %1258 = vmatprep.subr.bf16.mxu1 %v3700_v59  ;;  %v3804_v39 = vld [vmem:[#allocation10 + $0xe4] ss:$16 sps:$4 sm:$0xff]   ;;  %v3807_v28 = vld [vmem:[#allocation10 + $0xa8] ss:$16 sps:$4 sm:$0xff]   ;;  %v3810_v29 = vld [vmem:[#allocation10 + $0xcc] ss:$16 sps:$4 sm:$0xff]  }
 0x17e   : >> { %4033 = vst [vmem:[#allocation15_spill] sm:$0xff] %v3804_v39  ;;  %v3813_v42 = vld [vmem:[#allocation10 + $0xe0] ss:$16 sps:$4 sm:$0xff]   ;;  %v3817_v21 = vld [vmem:[#allocation10 + $0xc8] ss:$16 sps:$4 sm:$0xff]   ;;  %s1574_s28 = scalar_lea.vmem [#allocation2], %s2894_s26 }
 0x17f   : >> { %s2710_s29 = sshll.u32 %s3294_s15, 1  ;;  %s2795_s19 = sshll.u32 %s3867_s25, 2 }
 0x180   : >> { %1216 = vmatpush1.bf16.msra.mxu0 %v3691_v56  ;;  %1259 = vmatpush1.bf16.msra.mxu1 %v3709_v62  ;;  %s1010_s20 = ssub.s32 3, %s2710_s29  ;;  %s1728_s21 = scalar_lea.vmem %s3462_s30, %s2795_s19 }
 0x181   : >> { %1217 = vmatprep.subr.bf16.mxu0 %v3693_v57  ;;  %1260 = vmatprep.subr.bf16.mxu1 %v3712_v63  ;;  %s2712_s12 = sshll.u32 %s1010_s20, 4  ;;  %s3936_s25 = sadd.s32 16, %s2711_s22 }
 0x182   : >> { %s3873_s24 = sshra.s32 %s2712_s12, 3  ;;  %s2304_s26 = sshra.s32 %s3936_s25, 3 }
 0x183   : >> { %s2895_s16 = sshll.u32 %s3873_s24, 5  ;;  %s2798_s27 = sshll.u32 %s3873_s24, 2 }
 0x184   : >> { %1218 = vmatpush1.bf16.msra.mxu0 %v3702_v60  ;;  %1261 = vmatpush1.bf16.msra.mxu1 %v3721_v2  ;;  %s3876_s23 = scalar_lea.vmem [#allocation3], %s2895_s16  ;;  %s1739_s14 = scalar_lea.vmem %s3467_s13, %s2798_s27 }
 0x185   : >> { %1219 = vmatprep.subr.bf16.mxu0 %v3705_v61  ;;  %1262 = vmatprep.subr.bf16.mxu1 %v3724_v3  ;;  %s1744_s22 = ssub.s32 2, %s2710_s29  ;;  %s1007_s15 = sadd.s32 1, %s3294_s15  }
 0x186   : >> { %s2800_s12 = sshll.u32 %s1744_s22, 4  ;;  %p1004_p11 = scmp.ge.s32.totalorder %s1007_s15, 2  }
 0x187   : >> { %s3953_s24 = sshra.s32 %s2800_s12, 3  ;;  %p2887_p12 = scmp.ne.s32.totalorder (%p1004_p11), %s3370_s18, 1 }
 0x188   : >> { %1220 = vmatpush1.bf16.msra.mxu0 %v3714_v0  ;;  %1263 = vmatpush1.bf16.msra.mxu1 %v3733_v7  ;;  %s2903_s29 = sshll.u32 %s3953_s24, 5 }
 0x189   : >> { %1484 = vmatprep.subr.bf16.mxu0 %v3717_v1  ;;  %1527 = vmatprep.subr.bf16.mxu1 %v3736_v8  ;;  %s3957_s16 = scalar_lea.vmem [#allocation3], %s2903_s29 }
 0x18b   : >> { %1238 = vmatmul.mubr.bf16.vlgmr.msra.gmra.mrb[0].mxu0 %v1012_v4  ;;  %1281 = vmatmul.mubr.bf16.vlgmr.msra.gmra.mrb[0].mxu1 %v1012_v4  ;;  %v3820_v4 = vld [vmem:[#allocation10 + $0xec] ss:$16 sps:$4 sm:$0xff]  }
 0x18c   : >> { %1485 = vmatpush1.bf16.msra.mxu0 %v3726_v5  ;;  %1516 = vmatprep.mubr.bf16.mxu0 %v4020_v43 }
 0x18d   : >> { %1486 = vmatprep.subr.bf16.mxu0 %v3729_v6  ;;  %1528 = vmatpush1.bf16.msra.mxu1 %v3746_v11 }
 0x18e   : >> { %1529 = vmatprep.subr.bf16.mxu1 %v3749_v12  ;;  %1559 = vmatprep.mubr.bf16.mxu1 %v4020_v43  ;;  %v1291_v43 = vld [vmem:[#allocation6] sm:$0xff] }
 0x190   : >> { %1487 = vmatpush1.bf16.msra.mxu0 %v3738_v9 }
 0x191   : >> { %1488 = vmatprep.subr.bf16.mxu0 %v3741_v10  ;;  %1530 = vmatpush1.bf16.msra.mxu1 %v3758_v15 }
 0x192   : >> { %1531 = vmatprep.subr.bf16.mxu1 %v3761_v16 }
 0x194   : >> { %1489 = vmatpush1.bf16.msra.mxu0 %v3752_v13 }
 0x195   : >> { %1490 = vmatprep.subr.bf16.mxu0 %v3755_v14  ;;  %1532 = vmatpush1.bf16.msra.mxu1 %v3771_v19 }
 0x196   : >> { %1533 = vmatprep.subr.bf16.mxu1 %v3774_v23 }
 0x198   : >> { %1491 = vmatpush1.bf16.msra.mxu0 %v3765_v17 }
 0x199   : >> { %1492 = vmatprep.subr.bf16.mxu0 %v3768_v18  ;;  %1534 = vmatpush1.bf16.msra.mxu1 %v3783_v32 }
 0x19a   : >> { %1535 = vmatprep.subr.bf16.mxu1 %v3786_v33 }
 0x19c   : >> { %1493 = vmatpush1.bf16.msra.mxu0 %v3777_v30 }
 0x19d   : >> { %1494 = vmatprep.subr.bf16.mxu0 %v3780_v31  ;;  %1536 = vmatpush1.bf16.msra.mxu1 %v3795_v36 }
 0x19e   : >> { %1537 = vmatprep.subr.bf16.mxu1 %v3798_v37 }
 0x1a0   : >> { %1495 = vmatpush1.bf16.msra.mxu0 %v3789_v34 }
 0x1a1   : >> { %1496 = vmatprep.subr.bf16.mxu0 %v3792_v35  ;;  %1538 = vmatpush1.bf16.msra.mxu1 %v3807_v28  ;;  %v3824_v35 = vld [vmem:[#allocation10 + $0xe8] ss:$16 sps:$4 sm:$0xff]  }
 0x1a2   : >> { %1539 = vmatprep.subr.bf16.mxu1 %v3810_v29 }
 0x1a4   : >> { %1497 = vmatpush1.bf16.msra.mxu0 %v3801_v38 }
 0x1a5   : >> { %1498 = vmatprep.subr.bf16.mxu0 %v3804_v39  ;;  %1540 = vmatpush1.bf16.msra.mxu1 %v3817_v21  ;;  %v4034_v39 = vmov 0  }
 0x1a6   : >> { %1541 = vmatprep.subr.bf16.mxu1 %v3820_v4 }
 0x1a8   : >> { %1499 = vmatpush1.bf16.msra.mxu0 %v3813_v42 }
 0x1a9   : >> { %1939 = vmatprep.subr.bf16.mxu0 %v3632_v40  ;;  %1542 = vmatpush1.bf16.msra.mxu1 %v3824_v35  ;;  %v1575_v40 = vld [vmem:[%s1574_s28] sm:$0xff] }
 0x1aa   : >> { %1982 = vmatprep.subr.bf16.mxu1 %v3647_v22  ;;  %v1580_v22 = vld [vmem:[%s1574_s28 + $0x28] sm:$0xff] }
 0x1ab   : >> { %1517 = vmatmul.mubr.bf16.vlgmr.msra.gmra.mrb[4].mxu0 %v1291_v43 }
 0x1ac   : >> { %1940 = vmatpush1.bf16.msra.mxu0 %v3634_v41  ;;  %1971 = vmatprep.mubr.bf16.mxu0 %v4034_v39  ;;  %v1576_v41 = vld [vmem:[%s1574_s28 + $0x8] sm:$0xff] }
 0x1ad   : >> { %1941 = vmatprep.subr.bf16.mxu0 %v3639_v26  ;;  %1560 = vmatmul.mubr.bf16.vlgmr.msra.gmra.mrb[4].mxu1 %v1291_v43  ;;  %v1579_v26 = vld [vmem:[%s1574_s28 + $0x20] sm:$0xff] }
 0x1ae   : >> { %1983 = vmatpush1.bf16.msra.mxu1 %v3649_v45  ;;  %2014 = vmatprep.mubr.bf16.mxu1 %v4034_v39 }
 0x1af   : >> { %1984 = vmatprep.subr.bf16.mxu1 %v3659_v20 }
 0x1b0   : >> { %1942 = vmatpush1.bf16.msra.mxu0 %v3642_v27 }
 0x1b1   : >> { %1943 = vmatprep.subr.bf16.mxu0 %v3645_v44 }
 0x1b2   : >> { %1985 = vmatpush1.bf16.msra.mxu1 %v3661_v24 }
 0x1b3   : >> { %1986 = vmatprep.subr.bf16.mxu1 %v3669_v49 }
 0x1b4   : >> { %1944 = vmatpush1.bf16.msra.mxu0 %v3652_v46 }
 0x1b5   : >> { %1945 = vmatprep.subr.bf16.mxu0 %v3656_v47 }
 0x1b6   : >> { %1987 = vmatpush1.bf16.msra.mxu1 %v3673_v50 }
 0x1b7   : >> { %1988 = vmatprep.subr.bf16.mxu1 %v3676_v51  ;;  %v1578_v51 = vld [vmem:[%s1574_s28 + $0x18] sm:$0xff] }
 0x1b8   : >> { %1946 = vmatpush1.bf16.msra.mxu0 %v3665_v25 }
 0x1b9   : >> { %1947 = vmatprep.subr.bf16.mxu0 %v3667_v48 }
 0x1ba   : >> { %1989 = vmatpush1.bf16.msra.mxu1 %v3685_v54  ;;  %v1582_v54 = vld [vmem:[%s1574_s28 + $0x38] sm:$0xff] }
 0x1bb   : >> { %1990 = vmatprep.subr.bf16.mxu1 %v3688_v55  ;;  %v1577_v55 = vld [vmem:[%s1574_s28 + $0x10] sm:$0xff] }
 0x1bc   : >> { %1948 = vmatpush1.bf16.msra.mxu0 %v3679_v52 }
 0x1bd   : >> { %1949 = vmatprep.subr.bf16.mxu0 %v3682_v53 }
 0x1be   : >> { %1991 = vmatpush1.bf16.msra.mxu1 %v3697_v58  ;;  %v1581_v58 = vld [vmem:[%s1574_s28 + $0x30] sm:$0xff]  ;;  %s2902_s28 = sshll.u32 %s2304_s26, 5 }
 0x1bf   : >> { %1992 = vmatprep.subr.bf16.mxu1 %v3700_v59  ;;  %s3941_s20 = scalar_lea.vmem [#allocation2], %s2902_s28 }
 0x1c0   : >> { %1950 = vmatpush1.bf16.msra.mxu0 %v3691_v56 }
 0x1c1   : >> { %1951 = vmatprep.subr.bf16.mxu0 %v3693_v57 }
 0x1c2   : >> { %1993 = vmatpush1.bf16.msra.mxu1 %v3709_v62 }
 0x1c3   : >> { %1994 = vmatprep.subr.bf16.mxu1 %v3712_v63 }
 0x1c4   : >> { %1952 = vmatpush1.bf16.msra.mxu0 %v3702_v60 }
 0x1c5   : >> { %1953 = vmatprep.subr.bf16.mxu0 %v3705_v61 }
 0x1c6   : >> { %1995 = vmatpush1.bf16.msra.mxu1 %v3721_v2 }
 0x1c7   : >> { %1996 = vmatprep.subr.bf16.mxu1 %v3724_v3 }
 0x1c8   : >> { %1954 = vmatpush1.bf16.msra.mxu0 %v3714_v0 }
 0x1c9   : >> { %2218 = vmatprep.subr.bf16.mxu0 %v3717_v1 }
 0x1ca   : >> { %1997 = vmatpush1.bf16.msra.mxu1 %v3733_v7 }
 0x1cb   : >> { %2261 = vmatprep.subr.bf16.mxu1 %v3736_v8 }
 0x25e   : >> { %v1239_v43 = vpop.f32.mrb[0].mxu0  ;;  %v1282_v50 = vpop.f32.mrb[0].mxu1 }
 0x25f   : >> { %v1583_v27 = vadd.f32 %v1575_v40, %v1239_v43  ;;  %v1241_v44 = vpop.f32.mrb[1].mxu0  ;;  %v1284_v53 = vpop.f32.mrb[1].mxu1  ;;  %v1585_v61 = vadd.f32 %v1577_v55, %v1282_v50  ;;  %v1596_v50 = vld [vmem:[%s3876_s23] sm:$0xff] }
 0x260   : >> { %v1584_v45 = vadd.f32 %v1576_v41, %v1241_v44  ;;  %v1243_v46 = vpop.f32.mrb[2].mxu0  ;;  %v1286_v56 = vpop.f32.mrb[2].mxu1  ;;  %v1586_v57 = vadd.f32 %v1578_v51, %v1284_v53 }
 0x261   : >> { %v2781_v47 = vmul.f32 -1.442695, %v1583_v27  ;;  %v1587_v20 = vadd.f32 %v1579_v26, %v1243_v46  ;;  %v1245_v24 = vpop.f32.mrb[3].mxu0  ;;  %v1288_v59 = vpop.f32.mrb[3].mxu1  ;;  %v1589_v62 = vadd.f32 %v1581_v58, %v1286_v56  ;;  %v1600_v58 = vld [vmem:[%s3876_s23 + $0x20] sm:$0xff] }
 0x262   : >> { %v2783_v25 = vmul.f32 -1.442695, %v1584_v45  ;;  %v1588_v48 = vadd.f32 %v1580_v22, %v1245_v24  ;;  %v1590_v60 = vadd.f32 %v1582_v54, %v1288_v59  ;;  %v2785_v63 = vmul.f32 -1.442695, %v1586_v57  ;;  %v1650_v45 = vld [vmem:[#allocation5] sm:$0xff] }
 0x263   : >> { %3088 = vpow2.f32 %v2781_v47  ;;  %v2782_v49 = vmul.f32 -1.442695, %v1587_v20  ;;  %v1651_v20 = vld [vmem:[#allocation5 + $0x8] sm:$0xff]  ;;  %v1597_v54 = vld [vmem:[%s3876_s23 + $0x8] sm:$0xff] }
 0x264   : >> { %3090 = vpow2.f32 %v2783_v25  ;;  %v2784_v52 = vmul.f32 -1.442695, %v1588_v48  ;;  %v2786_v0 = vmul.f32 -1.442695, %v1590_v60 }
 0x265   : >> { %3092 = vpow2.f32 %v2782_v49 }
 0x266   : >> { %3094 = vpow2.f32 %v2784_v52 }
 0x267   : >> { %3096 = vtanh.f32 %v1585_v61  ;;  %v1601_v61 = vld [vmem:[%s3876_s23 + $0x28] sm:$0xff] }
 0x268   : >> { %3098 = vtanh.f32 %v1589_v62 }
 0x269   : >> { %3100 = vpow2.f32 %v2785_v63 }
 0x26a   : >> { %3102 = vpow2.f32 %v2786_v0 }
 0x26d   : >> { %v3089_v1 = vpop.eup %3088 }
 0x26e   : >> { %v3091_v2 = vpop.eup %3090  ;;  %v1618_v3 = vadd.f32 1.0, %v3089_v1 }
 0x26f   : >> { %v3093_v7 = vpop.eup %3092  ;;  %v1630_v8 = vadd.f32 1.0, %v3091_v2 }
 0x270   : >> { %v3095_v40 = vpop.eup %3094  ;;  %3104 = vrcp.f32 %v1618_v3  ;;  %v1619_v41 = vadd.f32 1.0, %v3093_v7 }
 0x271   : >> { %3106 = vrcp.f32 %v1630_v8  ;;  %v1631_v43 = vadd.f32 1.0, %v3095_v40  ;;  %v3097_v26 = vpop.eup %3096 }
 0x272   : >> { %3108 = vrcp.f32 %v1619_v41  ;;  %v3099_v27 = vpop.eup %3098 }
 0x273   : >> { %3110 = vrcp.f32 %v1631_v43  ;;  %v3101_v44 = vpop.eup %3100  ;;  %v1599_v43 = vld [vmem:[%s3876_s23 + $0x18] sm:$0xff] }
 0x274   : >> { %v3103_v22 = vpop.eup %3102  ;;  %v1644_v25 = vadd.f32 1.0, %v3101_v44  ;;  %v1603_v44 = vld [vmem:[%s3876_s23 + $0x38] sm:$0xff] }
 0x275   : >> { %v1645_v53 = vadd.f32 1.0, %v3103_v22  ;;  %v1598_v22 = vld [vmem:[%s3876_s23 + $0x10] sm:$0xff] }
 0x276   : >> { %3112 = vrcp.f32 %v1644_v25 }
 0x27a   : >> { %v3105_v46 = vpop.eup %3104 }
 0x27b   : >> { %v3107_v47 = vpop.eup %3106  ;;  %v1654_v24 = vmul.f32 %v3105_v46, %v3097_v26 }
 0x27c   : >> { %v3109_v48 = vpop.eup %3108  ;;  %v1652_v49 = vmul.f32 %v3107_v47, %v1650_v45  ;;  %v1602_v47 = vld [vmem:[%s3876_s23 + $0x30] sm:$0xff]  ;;  %s2883_s23 = sshll.u32 %s2304_s26, 2 }
 0x27d   : >> { %v3111_v51 = vpop.eup %3110  ;;  %v1655_v52 = vmul.f32 %v3109_v48, %v3099_v27  ;;  %s2462_s19 = scalar_lea.vmem %s3462_s30, %s2883_s23 }
 0x27e   : >> { %v1653_v55 = vmul.f32 %v3111_v51, %v1651_v20  ;;  %v3880_v56 = vadd.f32 %v1654_v24, %v1652_v49  ;;  %v1518_v57 = vpop.f32.mrb[4].mxu0 }
 0x27f   : >> { %v1604_v59 = vadd.f32 %v1596_v50, %v1518_v57  ;;  %v1520_v60 = vpop.f32.mrb[5].mxu0 }
 0x280   : >> { %3114 = vtanh.f32 %v3880_v56  ;;  %v3885_v62 = vadd.f32 %v1655_v52, %v1653_v55  ;;  %v1605_v63 = vadd.f32 %v1597_v54, %v1520_v60  ;;  %v1522_v0 = vpop.f32.mrb[6].mxu0  ;;  %v1561_v41 = vpop.f32.mrb[4].mxu1 }
 0x281   : >> { %3116 = vrcp.f32 %v1645_v53  ;;  %v2787_v1 = vmul.f32 -1.442695, %v1604_v59  ;;  %v1608_v2 = vadd.f32 %v1600_v58, %v1522_v0  ;;  %v1524_v3 = vpop.f32.mrb[7].mxu0  ;;  %v1563_v27 = vpop.f32.mrb[5].mxu1  ;;  %v1606_v25 = vadd.f32 %v1598_v22, %v1561_v41 }
 0x282   : >> { %3118 = vtanh.f32 %v3885_v62  ;;  %v2789_v7 = vmul.f32 -1.442695, %v1605_v63  ;;  %v1609_v8 = vadd.f32 %v1601_v61, %v1524_v3  ;;  %v1565_v45 = vpop.f32.mrb[6].mxu1  ;;  %v1607_v46 = vadd.f32 %v1599_v43, %v1563_v27  ;;  %v3113_v48 = vpop.eup %3112 }
 0x283   : >> { %3120 = vpow2.f32 %v2787_v1  ;;  %v2788_v40 = vmul.f32 -1.442695, %v1608_v2  ;;  %v1567_v20 = vpop.f32.mrb[7].mxu1  ;;  %v1610_v49 = vadd.f32 %v1602_v47, %v1565_v45 }
 0x284   : >> { %3122 = vpow2.f32 %v2789_v7  ;;  %v2790_v26 = vmul.f32 -1.442695, %v1609_v8  ;;  %v1611_v24 = vadd.f32 %v1603_v44, %v1567_v20  ;;  %v2791_v51 = vmul.f32 -1.442695, %v1607_v46 }
 0x285   : >> { %3124 = vpow2.f32 %v2788_v40  ;;  %v1700_v40 = vld [vmem:[#allocation7] sm:$0xff] }
 0x286   : >> { %3126 = vpow2.f32 %v2790_v26  ;;  %v2792_v53 = vmul.f32 -1.442695, %v1611_v24 }
 0x287   : >> { %3128 = vtanh.f32 %v1606_v25 }
 0x288   : >> { %3130 = vtanh.f32 %v1610_v49  ;;  %v2312_v49 = vld [vmem:[%s3941_s20 + $0x18] sm:$0xff] }
 0x289   : >> { %3132 = vpow2.f32 %v2791_v51 }
 0x28a   : >> { %v3115_v50 = vpop.eup %3114  ;;  %3134 = vpow2.f32 %v2792_v53  ;;  %v2311_v53 = vld [vmem:[%s3941_s20 + $0x10] sm:$0xff] }
 0x28b   : >> { %v3117_v52 = vpop.eup %3116  ;;  %v1660_v57 = vmul.f32 %v3115_v50, %v3113_v48 }
 0x28c   : >> { %v3119_v54 = vpop.eup %3118 }
 0x28d   : >> { %v3121_v55 = vpop.eup %3120  ;;  %v1661_v58 = vmul.f32 %v3119_v54, %v3117_v52  ;;  %v2316_v52 = vld [vmem:[%s3941_s20 + $0x38] sm:$0xff] }
 0x28e   : >> { %v3123_v59 = vpop.eup %3122  ;;  %v1668_v60 = vadd.f32 1.0, %v3121_v55 }
 0x28f   : >> { %v3125_v61 = vpop.eup %3124  ;;  %v1716_v63 = vpack.c.bf16 %v1661_v58, %v1660_v57  ;;  %v1680_v0 = vadd.f32 1.0, %v3123_v59  ;;  %v2315_v59 = vld [vmem:[%s3941_s20 + $0x30] sm:$0xff] }
 0x290   : >> { %v3127_v1 = vpop.eup %3126  ;;  %3136 = vrcp.f32 %v1668_v60  ;;  %v1669_v2 = vadd.f32 1.0, %v3125_v61 }
 0x291   : >> { %2912 = vst [vmem:[%s1728_s21] sm:$0xff] %v1716_v63   ;;  %3138 = vrcp.f32 %v1680_v0  ;;  %v1681_v3 = vadd.f32 1.0, %v3127_v1  ;;  %1972 = vmatmul.mubr.bf16.vlgmr.msra.gmra.mrb[8].mxu0 %v1716_v63  ;;  %2015 = vmatmul.mubr.bf16.vlgmr.msra.gmra.mrb[8].mxu1 %v1716_v63  ;;  %v3129_v7 = vpop.eup %3128  ;;  %s2886_s21 = sshll.u32 %s3953_s24, 2 }
 0x292   : >> { %3140 = vrcp.f32 %v1669_v2  ;;  %2219 = vmatpush1.bf16.msra.mxu0 %v3726_v5  ;;  %2262 = vmatpush1.bf16.msra.mxu1 %v3746_v11  ;;  %v3131_v8 = vpop.eup %3130  ;;  %s2473_s27 = scalar_lea.vmem %s3467_s13, %s2886_s21 }
 0x293   : >> { %3142 = vrcp.f32 %v1681_v3  ;;  %2220 = vmatprep.subr.bf16.mxu0 %v3729_v6  ;;  %2263 = vmatprep.subr.bf16.mxu1 %v3749_v12  ;;  %v3133_v5 = vpop.eup %3132 }
 0x294   : >> { %2250 = vmatprep.mubr.bf16.mxu0 %v4034_v39  ;;  %2293 = vmatprep.mubr.bf16.mxu1 %v4034_v39  ;;  %v3135_v11 = vpop.eup %3134  ;;  %v1701_v39 = vld [vmem:[#allocation7 + $0x8] sm:$0xff]  ;;  %v1694_v43 = vadd.f32 1.0, %v3133_v5 }
 0x295   : >> { %v1695_v26 = vadd.f32 1.0, %v3135_v11 }
 0x296   : >> { %2221 = vmatpush1.bf16.msra.mxu0 %v3738_v9  ;;  %2264 = vmatpush1.bf16.msra.mxu1 %v3758_v15  ;;  %3144 = vrcp.f32 %v1694_v43 }
 0x297   : >> { %2222 = vmatprep.subr.bf16.mxu0 %v3741_v10  ;;  %2265 = vmatprep.subr.bf16.mxu1 %v3761_v16 }
 0x29a   : >> { %v3137_v6 = vpop.eup %3136  ;;  %2223 = vmatpush1.bf16.msra.mxu0 %v3752_v13  ;;  %2266 = vmatpush1.bf16.msra.mxu1 %v3771_v19 }
 0x29b   : >> { %v3139_v12 = vpop.eup %3138  ;;  %v1704_v41 = vmul.f32 %v3137_v6, %v3129_v7  ;;  %2224 = vmatprep.subr.bf16.mxu0 %v3755_v14  ;;  %2267 = vmatprep.subr.bf16.mxu1 %v3774_v23  ;;  %v4035_v14 = vld [vmem:[#allocation14_spill] sm:$0xff]  ;;  %v4036_v23 = vld [vmem:[#allocation15_spill] sm:$0xff] }
 0x29c   : >> { %v3141_v9 = vpop.eup %3140  ;;  %v1702_v10 = vmul.f32 %v3139_v12, %v1700_v40 }
 0x29d   : >> { %v3143_v15 = vpop.eup %3142  ;;  %v1705_v16 = vmul.f32 %v3141_v9, %v3131_v8 }
 0x29e   : >> { %v1703_v27 = vmul.f32 %v3143_v15, %v1701_v39  ;;  %v3908_v44 = vadd.f32 %v1704_v41, %v1702_v10  ;;  %2225 = vmatpush1.bf16.msra.mxu0 %v3765_v17  ;;  %2268 = vmatpush1.bf16.msra.mxu1 %v3783_v32  ;;  %v2330_v15 = vld [vmem:[%s3957_s16] sm:$0xff] }
 0x29f   : >> { %2226 = vmatprep.subr.bf16.mxu0 %v3768_v18  ;;  %2269 = vmatprep.subr.bf16.mxu1 %v3786_v33 }
 0x2a0   : >> { %3146 = vtanh.f32 %v3908_v44  ;;  %v3915_v13 = vadd.f32 %v1705_v16, %v1703_v27  ;;  %v3145_v17 = vpop.eup %3144 }
 0x2a1   : >> { %3148 = vrcp.f32 %v1695_v26  ;;  %v2331_v26 = vld [vmem:[%s3957_s16 + $0x8] sm:$0xff] }
 0x2a2   : >> { %3150 = vtanh.f32 %v3915_v13  ;;  %2227 = vmatpush1.bf16.msra.mxu0 %v3777_v30  ;;  %2270 = vmatpush1.bf16.msra.mxu1 %v3795_v36 }
 0x2a3   : >> { %2228 = vmatprep.subr.bf16.mxu0 %v3780_v31  ;;  %2271 = vmatprep.subr.bf16.mxu1 %v3798_v37 }
 0x2a6   : >> { %2229 = vmatpush1.bf16.msra.mxu0 %v3789_v34  ;;  %2272 = vmatpush1.bf16.msra.mxu1 %v3807_v28  ;;  %v2309_v34 = vld [vmem:[%s3941_s20] sm:$0xff] }
 0x2a7   : >> { %2230 = vmatprep.subr.bf16.mxu0 %v4035_v14  ;;  %2273 = vmatprep.subr.bf16.mxu1 %v3810_v29 }
 0x2aa   : >> { %v3147_v18 = vpop.eup %3146  ;;  %2231 = vmatpush1.bf16.msra.mxu0 %v3801_v38  ;;  %2274 = vmatpush1.bf16.msra.mxu1 %v3817_v21  ;;  %v2313_v38 = vld [vmem:[%s3941_s20 + $0x20] sm:$0xff]  ;;  %v2314_v21 = vld [vmem:[%s3941_s20 + $0x28] sm:$0xff] }
 0x2ab   : >> { %v3149_v19 = vpop.eup %3148  ;;  %2232 = vmatprep.subr.bf16.mxu0 %v4036_v23  ;;  %2275 = vmatprep.subr.bf16.mxu1 %v3820_v4  ;;  %v1710_v31 = vmul.f32 %v3147_v18, %v3145_v17  ;;  %v2334_v23 = vld [vmem:[%s3957_s16 + $0x20] sm:$0xff] }
 0x2ac   : >> { %v3151_v30 = vpop.eup %3150 }
 0x2ad   : >> { %v1711_v32 = vmul.f32 %v3151_v30, %v3149_v19 }
 0x2ae   : >> { %2233 = vmatpush1.bf16.msra.mxu0 %v3813_v42  ;;  %2276 = vmatpush1.bf16.msra.mxu1 %v3824_v35  ;;  %v2310_v35 = vld [vmem:[%s3941_s20 + $0x8] sm:$0xff] }
 0x2af   : >> { %v1718_v33 = vpack.c.bf16 %v1711_v32, %v1710_v31 }
 0x2b1   : >> { %2917 = vst [vmem:[%s1739_s14] sm:$0xff] %v1718_v33   ;;  %2251 = vmatmul.mubr.bf16.vlgmr.msra.gmra.mrb[12].mxu0 %v1718_v33  ;;  %2294 = vmatmul.mubr.bf16.vlgmr.msra.gmra.mrb[12].mxu1 %v1718_v33  ;;  %v2335_v33 = vld [vmem:[%s3957_s16 + $0x28] sm:$0xff] }
 0x364   : >> { %v1973_v36 = vpop.f32.mrb[8].mxu0  ;;  %v2016_v37 = vpop.f32.mrb[8].mxu1 }
 0x365   : >> { %v2317_v28 = vadd.f32 %v2309_v34, %v1973_v36  ;;  %v1975_v29 = vpop.f32.mrb[9].mxu0  ;;  %v2018_v42 = vpop.f32.mrb[9].mxu1  ;;  %v2319_v57 = vadd.f32 %v2311_v53, %v2016_v37 }
 0x366   : >> { %v2318_v4 = vadd.f32 %v2310_v35, %v1975_v29  ;;  %v1977_v22 = vpop.f32.mrb[10].mxu0  ;;  %v2020_v45 = vpop.f32.mrb[10].mxu1  ;;  %v2320_v54 = vadd.f32 %v2312_v49, %v2018_v42 }
 0x367   : >> { %v2869_v46 = vmul.f32 -1.442695, %v2317_v28  ;;  %v2321_v47 = vadd.f32 %v2313_v38, %v1977_v22  ;;  %v1979_v20 = vpop.f32.mrb[11].mxu0  ;;  %v2022_v24 = vpop.f32.mrb[11].mxu1  ;;  %v2323_v1 = vadd.f32 %v2315_v59, %v2020_v45 }
 0x368   : >> { %v2871_v25 = vmul.f32 -1.442695, %v2318_v4  ;;  %v2322_v48 = vadd.f32 %v2314_v21, %v1979_v20  ;;  %v2324_v55 = vadd.f32 %v2316_v52, %v2022_v24  ;;  %v2873_v58 = vmul.f32 -1.442695, %v2320_v54  ;;  %v2337_v24 = vld [vmem:[%s3957_s16 + $0x38] sm:$0xff] }
 0x369   : >> { %3152 = vpow2.f32 %v2869_v46  ;;  %v2870_v50 = vmul.f32 -1.442695, %v2321_v47  ;;  %v2332_v47 = vld [vmem:[%s3957_s16 + $0x10] sm:$0xff] }
 0x36a   : >> { %3154 = vpow2.f32 %v2871_v25  ;;  %v2872_v51 = vmul.f32 -1.442695, %v2322_v48  ;;  %v2874_v60 = vmul.f32 -1.442695, %v2324_v55 }
 0x36b   : >> { %3156 = vpow2.f32 %v2870_v50  ;;  %v2336_v50 = vld [vmem:[%s3957_s16 + $0x30] sm:$0xff] }
 0x36c   : >> { %3158 = vpow2.f32 %v2872_v51 }
 0x36d   : >> { %3160 = vtanh.f32 %v2319_v57 }
 0x36e   : >> { %3162 = vpow2.f32 %v2873_v58 }
 0x36f   : >> { %3164 = vpow2.f32 %v2874_v60 }
 0x373   : >> { %v3153_v61 = vpop.eup %3152 }
 0x374   : >> { %v3155_v63 = vpop.eup %3154  ;;  %v2352_v0 = vadd.f32 1.0, %v3153_v61 }
 0x375   : >> { %v2364_v2 = vadd.f32 1.0, %v3155_v63  ;;  %v3157_v3 = vpop.eup %3156 }
 0x376   : >> { %3166 = vrcp.f32 %v2352_v0  ;;  %v2353_v7 = vadd.f32 1.0, %v3157_v3  ;;  %v3159_v8 = vpop.eup %3158 }
 0x377   : >> { %3168 = vrcp.f32 %v2364_v2  ;;  %v2365_v5 = vadd.f32 1.0, %v3159_v8  ;;  %v3161_v11 = vpop.eup %3160 }
 0x378   : >> { %3170 = vtanh.f32 %v2323_v1  ;;  %v3163_v40 = vpop.eup %3162 }
 0x379   : >> { %3172 = vrcp.f32 %v2353_v7  ;;  %v3165_v6 = vpop.eup %3164  ;;  %v2378_v43 = vadd.f32 1.0, %v3163_v40 }
 0x37a   : >> { %3174 = vrcp.f32 %v2365_v5  ;;  %v2379_v17 = vadd.f32 1.0, %v3165_v6 }
 0x37b   : >> { %3176 = vrcp.f32 %v2378_v43 }
 0x380   : >> { %v3167_v12 = vpop.eup %3166 }
 0x381   : >> { %v3169_v39 = vpop.eup %3168  ;;  %v2388_v41 = vmul.f32 %v3167_v12, %v3161_v11 }
 0x382   : >> { %v3171_v9 = vpop.eup %3170  ;;  %v2386_v10 = vmul.f32 %v3169_v39, %v3880_v56 }
 0x383   : >> { %v3173_v16 = vpop.eup %3172 }
 0x384   : >> { %v2390_v27 = vadd.f32 %v2388_v41, %v2386_v10  ;;  %v2389_v14 = vmul.f32 %v3173_v16, %v3171_v9  ;;  %v2252_v18 = vpop.f32.mrb[12].mxu0  ;;  %v2295_v19 = vpop.f32.mrb[12].mxu1 }
 0x385   : >> { %v3175_v30 = vpop.eup %3174  ;;  %v2338_v31 = vadd.f32 %v2330_v15, %v2252_v18  ;;  %v2254_v32 = vpop.f32.mrb[13].mxu0  ;;  %v2340_v49 = vadd.f32 %v2332_v47, %v2295_v19 }
 0x386   : >> { %v2297_v56 = vpop.f32.mrb[13].mxu1  ;;  %3178 = vtanh.f32 %v2390_v27  ;;  %2446 = vst [vmem:[#allocation5] sm:$0xff] %v2390_v27  ;;  %v2387_v34 = vmul.f32 %v3175_v30, %v3885_v62  ;;  %v2339_v35 = vadd.f32 %v2331_v26, %v2254_v32  ;;  %v2256_v36 = vpop.f32.mrb[14].mxu0  ;;  %v2333_v62 = vld [vmem:[%s3957_s16 + $0x18] sm:$0xff] }
 0x387   : >> { %v2299_v37 = vpop.f32.mrb[14].mxu1  ;;  %v2875_v38 = vmul.f32 -1.442695, %v2338_v31  ;;  %v2342_v28 = vadd.f32 %v2334_v23, %v2256_v36  ;;  %v2258_v29 = vpop.f32.mrb[15].mxu0  ;;  %3180 = vrcp.f32 %v2379_v17  ;;  %v2341_v20 = vadd.f32 %v2333_v62, %v2297_v56 }
 0x388   : >> { %v2301_v42 = vpop.f32.mrb[15].mxu1  ;;  %v2391_v21 = vadd.f32 %v2389_v14, %v2387_v34  ;;  %v2877_v4 = vmul.f32 -1.442695, %v2339_v35  ;;  %v2343_v22 = vadd.f32 %v2335_v33, %v2258_v29  ;;  %v3177_v25 = vpop.eup %3176  ;;  %v2344_v57 = vadd.f32 %v2336_v50, %v2299_v37 }
 0x389   : >> { %3182 = vpow2.f32 %v2875_v38  ;;  %v2876_v45 = vmul.f32 -1.442695, %v2342_v28  ;;  %v2879_v52 = vmul.f32 -1.442695, %v2341_v20  ;;  %v2345_v53 = vadd.f32 %v2337_v24, %v2301_v42 }
 0x38a   : >> { %3184 = vtanh.f32 %v2391_v21  ;;  %2447 = vst [vmem:[#allocation5 + $0x8] sm:$0xff] %v2391_v21  ;;  %v2878_v46 = vmul.f32 -1.442695, %v2343_v22 }
 0x38b   : >> { %3186 = vpow2.f32 %v2877_v4  ;;  %v2880_v63 = vmul.f32 -1.442695, %v2345_v53 }
 0x38c   : >> { %3188 = vpow2.f32 %v2876_v45 }
 0x38d   : >> { %3190 = vpow2.f32 %v2878_v46 }
 0x38e   : >> { %3192 = vtanh.f32 %v2340_v49 }
 0x38f   : >> { %3194 = vpow2.f32 %v2879_v52 }
 0x390   : >> { %v3179_v48 = vpop.eup %3178 }
 0x391   : >> { %v2394_v51 = vmul.f32 %v3179_v48, %v3177_v25  ;;  %v3181_v54 = vpop.eup %3180 }
 0x393   : >> { %v3183_v55 = vpop.eup %3182 }
 0x394   : >> { %v3185_v58 = vpop.eup %3184  ;;  %v2402_v59 = vadd.f32 1.0, %v3183_v55 }
 0x395   : >> { %v3187_v60 = vpop.eup %3186  ;;  %v2395_v61 = vmul.f32 %v3185_v58, %v3181_v54 }
 0x396   : >> { %3196 = vrcp.f32 %v2402_v59  ;;  %v2414_v0 = vadd.f32 1.0, %v3187_v60  ;;  %v3189_v1 = vpop.eup %3188 }
 0x397   : >> { %v2450_v2 = vpack.c.bf16 %v2395_v61, %v2394_v51  ;;  %3198 = vtanh.f32 %v2344_v57  ;;  %v2403_v3 = vadd.f32 1.0, %v3189_v1  ;;  %v3191_v7 = vpop.eup %3190 }
 0x398   : >> { %3200 = vrcp.f32 %v2414_v0  ;;  %v2415_v8 = vadd.f32 1.0, %v3191_v7  ;;  %v3193_v5 = vpop.eup %3192 }
 0x399   : >> { %2451 = vst [vmem:[#allocation4] sm:$0xff] %v2450_v2  ;;  %2922 = vst [vmem:[%s2462_s19] sm:$0xff] %v2450_v2   ;;  %3202 = vpow2.f32 %v2880_v63  ;;  %v3195_v11 = vpop.eup %3194 }
 0x39a   : >> { %3204 = vrcp.f32 %v2403_v3  ;;  %v2428_v41 = vadd.f32 1.0, %v3195_v11 }
 0x39b   : >> { %3206 = vrcp.f32 %v2415_v8 }
 0x39c   : >> { %3208 = vrcp.f32 %v2428_v41 }
 0x3a0   : >> { %v3197_v40 = vpop.eup %3196 }
 0x3a1   : >> { %v3199_v6 = vpop.eup %3198  ;;  %v2438_v12 = vmul.f32 %v3197_v40, %v3193_v5 }
 0x3a2   : >> { %v3201_v39 = vpop.eup %3200 }
 0x3a3   : >> { %v3203_v43 = vpop.eup %3202  ;;  %v2436_v9 = vmul.f32 %v3201_v39, %v3908_v44 }
 0x3a4   : >> { %v3205_v10 = vpop.eup %3204  ;;  %v2429_v27 = vadd.f32 1.0, %v3203_v43 }
 0x3a5   : >> { %v2440_v15 = vadd.f32 %v2438_v12, %v2436_v9  ;;  %v2439_v16 = vmul.f32 %v3205_v10, %v3199_v6  ;;  %v3207_v26 = vpop.eup %3206 }
 0x3a6   : >> { %v2437_v14 = vmul.f32 %v3207_v26, %v3915_v13  ;;  %v3209_v18 = vpop.eup %3208 }
 0x3a7   : >> { %3210 = vtanh.f32 %v2440_v15  ;;  %2448 = vst [vmem:[#allocation7] sm:$0xff] %v2440_v15 }
 0x3a8   : >> { %v2441_v17 = vadd.f32 %v2439_v16, %v2437_v14  ;;  %3212 = vrcp.f32 %v2429_v27 }
 0x3aa   : >> { %3214 = vtanh.f32 %v2441_v17  ;;  %2449 = vst [vmem:[#allocation7 + $0x8] sm:$0xff] %v2441_v17 }
 0x3b1   : >> { %v3211_v19 = vpop.eup %3210 }
 0x3b2   : >> { %v2444_v23 = vmul.f32 %v3211_v19, %v3209_v18  ;;  %v3213_v44 = vpop.eup %3212 }
 0x3b3   : > { %1006 = sbr.rel (!%p1004_p11) target bundleno = 361 (0x169), region = 147 }
 0x3b4   : >> { %v3215_v30 = vpop.eup %3214 }
 0x3b5   : >> { %v2445_v31 = vmul.f32 %v3215_v30, %v3213_v44 }
 0x3b7   : >> { %v2452_v32 = vpack.c.bf16 %v2445_v31, %v2444_v23 }
 0x3b9   : >> { %2453 = vst [vmem:[#allocation6] sm:$0xff] %v2452_v32  ;;  %2927 = vst [vmem:[%s2473_s27] sm:$0xff] %v2452_v32  }
 0x3ba   : > { %2479 = sbr.rel (%p2887_p12) target bundleno = 964 (0x3c4), region = 75  ;;  %v2480_v13 = vld [vmem:[#allocation4] sm:$0xff] (!%p2887_p12)  ;;  %v2491_v33 = vld [vmem:[#allocation5] sm:$0xff] (!%p2887_p12)  ;;  %v2492_v38 = vld [vmem:[#allocation5 + $0x8] sm:$0xff] (!%p2887_p12) }
 0x3bb   : > { %v2481_v34 = vunpack.c.l.bf16 (!%p2887_p12), %v2480_v13  ;;  %v2482_v35 = vunpack.c.h.bf16 (!%p2887_p12), %v2480_v13  ;;  %2493 = vst [vmem:[%s4017_s11] sm:$0xff] (!%p2887_p12), %v2491_v33  ;;  %v2495_v28 = vld [vmem:[#allocation7] sm:$0xff] (!%p2887_p12)  ;;  %v2496_v29 = vld [vmem:[#allocation7 + $0x8] sm:$0xff] (!%p2887_p12)  ;;  %2494 = vst [vmem:[%s4017_s11 + $0x8] sm:$0xff] (!%p2887_p12), %v2492_v38 }
 0x3bc   : > { %2890 = vst [vmem:[%s4017_s11 + $0x10] sm:$0xff] (!%p2887_p12), %v2495_v28  ;;  %2891 = vst [vmem:[%s4017_s11 + $0x18] sm:$0xff] (!%p2887_p12), %v2496_v29 }
 0x3bd   : > { %2483 = vst [vmem:[%s4016_s10] sm:$0xff] (!%p2887_p12), %v2481_v34  ;;  %2484 = vst [vmem:[%s4016_s10 + $0x8] sm:$0xff] (!%p2887_p12), %v2482_v35 }
 0x3c0   : > { %v2485_v56 = vld [vmem:[#allocation6] sm:$0xff] (!%p2887_p12) }
 0x3c1   : > { %v2486_v36 = vunpack.c.l.bf16 %v2485_v56  ;;  %v2487_v37 = vunpack.c.h.bf16 %v2485_v56 }
 0x3c3   : > { %2888 = vst [vmem:[%s4016_s10 + $0x10] sm:$0xff] %v2486_v36  ;;  %2889 = vst [vmem:[%s4016_s10 + $0x18] sm:$0xff] %v2487_v37 }
 0x3c4 PF: > { %s24_s17 = sadd.s32 1, %s3290_s17  }
 0x3c5   : > { %p21_p13 = scmp.ge.s32.totalorder %s24_s17, 4  }
 0x3c7   :  { %23 = sbr.rel (!%p21_p13) target bundleno = 2 (0x2), region = 158 }
 0x3ce   :  { %2554 = vsyncpa [#allocation9], 1 }
 0x3cf   :  { %2556 = vsyncpa [#allocation9 + $0x1], 1 }
 0x3d0   :  { %2557 = vsyncpa [#allocation11], 1 }

</bundles_post_ra>
